<compile_context>
chip_gen: v6e
topology: v6e:2x2x1
jax: 0.10.0
libtpu: 0.0.40
codegen_flags: <defaults>
</compile_context>

<pallas_src>
import jax
import jax.numpy as jnp
from jax.experimental import pallas as pl
from jax.experimental.pallas import tpu as pltpu

EPS = 1e-5  # nn.BatchNorm2d default eps


def bottleneck_ir_kernel(x_ref, m1_ref, m2_ref, par_ref, out_ref, pad_ref):
    """One grid step = Nb batch samples, H-major and lane-dense.

    x_ref, out_ref : (H, Nb, WC)      activations, WC = W*C (multiple of 128)
    m1_ref, m2_ref : (3, WC, WC)      block-banded conv weights, one per ky tap
    par_ref        : (8, WC) f32      rows [s1, b1, s2, b2, prelu_a, s3, b3, 0]
    pad_ref        : ((H+2)*Nb, WC)   VMEM scratch in MXU compute dtype,
                                      row = h_pad*Nb + n
    """
    H, Nb, WC = x_ref.shape
    R = H * Nb
    cdt = pad_ref.dtype

    p = par_ref[...]

    def row(i):                        # (1, WC): broadcasts over all rows
        return p[i:i + 1, :]

    s1, b1, s2, b2, pr_a, s3, b3 = (row(i) for i in range(7))

    # Zero only the two H-pad border row groups; the interior is always fully
    # overwritten and the W padding is folded into the band matrices.  Done
    # every grid step so the batch axis stays safe under megacore "parallel".
    zrows = jnp.zeros((Nb, WC), cdt)
    pad_ref[0:Nb, :] = zrows
    pad_ref[(H + 1) * Nb:(H + 2) * Nb, :] = zrows

    def conv3x3(a, m_ref):
        # a: (H*Nb, WC) f32, row = h*Nb + n.  out[h] = sum_dy a_pad[h+dy-1] @ M[dy]
        pad_ref[Nb:(H + 1) * Nb, :] = a.astype(cdt)    # single cast, interior only
        acc = None
        for dy in range(3):                            # unrolled at trace time
            lhs = pad_ref[dy * Nb:(dy + H) * Nb, :]    # dy-shifted rows, no reshape
            t = jnp.dot(lhs, m_ref[dy], preferred_element_type=jnp.float32)
            acc = t if acc is None else acc + t        # v7x: MRB in-place accumulate
        return acc

    x2d = x_ref[...].reshape(R, WC).astype(jnp.float32)
    c1 = conv3x3(x2d * s1 + b1, m1_ref)                        # BN1 -> conv1
    a2 = c1 * s2 + b2                                          # BN2
    c2 = conv3x3(jnp.where(a2 >= 0, a2, pr_a * a2), m2_ref)    # PReLU -> conv2
    # BN3 + identity shortcut; the residual is re-read from the VMEM-resident
    # input block instead of staying live across both convs (vreg pressure).
    res = c2 * s3 + b3 + x_ref[...].reshape(R, WC).astype(jnp.float32)
    out_ref[...] = res.reshape(H, Nb, WC).astype(out_ref.dtype)


def _band_weight_matrices(w_hwio, W, dtype):
    """(3, 3, C, C) HWIO conv weights -> (3, W*C, W*C) block-banded matrices.

    M[dy][(wo+dx-1)*C + ci, wo*C + co] = w[dy, dx, ci, co]; taps falling outside
    [0, W) are simply absent, which implements the zero padding along W.
    """
    C = w_hwio.shape[-1]
    mats = []
    for dy in range(3):
        m = jnp.zeros((W * C, W * C), jnp.float32)
        for dx in range(3):
            m = m + jnp.kron(jnp.eye(W, k=1 - dx, dtype=jnp.float32),
                             w_hwio[dy, dx].astype(jnp.float32))
        mats.append(m)
    return jnp.stack(mats).astype(dtype)


def _fold_bn(gamma, beta, mean, var):
    """Inference-mode BatchNorm2d -> per-channel (scale, bias)."""
    s = gamma / jnp.sqrt(var + EPS)
    return s, beta - mean * s


def _pack_params(bn1, bn2, bn3, prelu_alpha, W):
    """Fold BN/PReLU params into an (8, W*C) f32 table (lane j holds channel j%C)."""
    s1, b1 = _fold_bn(*bn1)
    s2, b2 = _fold_bn(*bn2)
    s3, b3 = _fold_bn(*bn3)
    rows = [s1, b1, s2, b2, prelu_alpha, s3, b3]
    rep = jnp.stack([jnp.tile(r.astype(jnp.float32), W) for r in rows])
    pad = jnp.zeros((8 - len(rows), rep.shape[1]), jnp.float32)
    return jnp.concatenate([rep, pad], axis=0)


def bottleneck_ir_unit(x, w1_hwio, w2_hwio, bn1, bn2, bn3, prelu_alpha, *,
                       block_batch=8, compute_dtype=jnp.bfloat16):
    """Fused bottleneck_IR forward for the in_channel == depth, stride == 1 case.

    x: (N, H, W, C) f32 NHWC.  w*_hwio: (3, 3, C, C) conv weights (bias=False).
    bn*: (gamma, beta, running_mean, running_var).  prelu_alpha: (C,) slopes.
    """
    N, H, W, C = x.shape
    WC = W * C
    assert WC % 128 == 0, "W*C must be a multiple of 128 for the lane-dense layout"

    # block_batch=8 amortizes the ~0.35us/step grid overhead (perf review; try 16
    # on v6e/v7x if the bundle shows no spill) while keeping >= 2 grid steps so
    # the "parallel" batch axis can shard across both v7x TensorCores.
    Nb = min(block_batch, N)
    if N // Nb < 2 and (N // 2) % 8 == 0:
        Nb = N // 2
    assert N % Nb == 0, "batch must divide by the block batch"
    assert Nb % 8 == 0 or Nb == N, "block batch must be 8-aligned (sublane) or the full batch"

    # H-major, lane-dense repack: (N, H, W, C) -> (H, N, W*C).  W and C share
    # the 128-wide lane axis; the batch block sits on the sublane axis, so the
    # dy-shifted conv operands are plain row slices inside the kernel.
    x_t = jnp.transpose(x.reshape(N, H, WC), (1, 0, 2))

    m1 = _band_weight_matrices(w1_hwio, W, compute_dtype)    # (3, WC, WC)
    m2 = _band_weight_matrices(w2_hwio, W, compute_dtype)
    params = _pack_params(bn1, bn2, bn3, prelu_alpha, W)     # (8, WC) f32

    cost = pl.CostEstimate(
        flops=int(12 * N * H * WC * WC),          # 2 convs x 3 band matmuls each
        transcendentals=0,
        bytes_accessed=int(2 * x.size * x.dtype.itemsize
                           + (m1.size + m2.size) * m1.dtype.itemsize
                           + params.size * 4),
    )

    def build(weight_pipeline_mode):
        def const_spec(shape):
            imap = lambda n: (0,) * len(shape)
            if weight_pipeline_mode is None:
                return pl.BlockSpec(shape, imap)
            return pl.BlockSpec(shape, imap, pipeline_mode=weight_pipeline_mode)

        return pl.pallas_call(
            bottleneck_ir_kernel,
            out_shape=jax.ShapeDtypeStruct((H, N, WC), x.dtype),
            grid_spec=pltpu.PrefetchScalarGridSpec(
                num_scalar_prefetch=0,
                grid=(N // Nb,),
                in_specs=[
                    pl.BlockSpec((H, Nb, WC), lambda n: (0, n, 0)),   # activations
                    const_spec((3, WC, WC)),                          # conv1 band weights
                    const_spec((3, WC, WC)),                          # conv2 band weights
                    const_spec((8, WC)),                              # folded BN / PReLU params
                ],
                out_specs=pl.BlockSpec((H, Nb, WC), lambda n: (0, n, 0)),
                scratch_shapes=[pltpu.VMEM(((H + 2) * Nb, WC), compute_dtype)],
            ),
            compiler_params=pltpu.CompilerParams(
                dimension_semantics=("parallel",),    # batch shards across v7x's 2 TCs
                vmem_limit_bytes=32 * 1024 * 1024,    # headroom vs v7x's 64 MiB VMEM
            ),
            cost_estimate=cost,
        )

    try:
        # Constant-index inputs are DMA'd once; single-buffer them (perf review).
        out_t = jax.block_until_ready(build(pl.Buffered(1))(x_t, m1, m2, params))
    except Exception:
        # Fallback if pipeline_mode=pl.Buffered(1) is rejected by this jax/libtpu.
        out_t = build(None)(x_t, m1, m2, params)

    return jnp.transpose(out_t, (1, 0, 2)).reshape(N, H, W, C)


def reference_forward(x, w1_hwio, w2_hwio, bn1, bn2, bn3, prelu_alpha):
    """Pure-JAX NHWC reference for bottleneck_IR (in == depth, stride = 1, eval BN)."""
    def cc(v):
        return v.reshape(1, 1, 1, -1)

    def bn(a, p):
        gamma, beta, mean, var = p
        return (a - cc(mean)) / jnp.sqrt(cc(var) + EPS) * cc(gamma) + cc(beta)

    def conv(a, w):
        return jax.lax.conv_general_dilated(
            a, w, window_strides=(1, 1), padding="SAME",
            dimension_numbers=("NHWC", "HWIO", "NHWC"),
            precision=jax.lax.Precision.HIGHEST)

    res = bn(x, bn1)
    res = conv(res, w1_hwio)
    res = bn(res, bn2)
    res = jnp.where(res >= 0, res, cc(prelu_alpha) * res)     # PReLU(depth)
    res = conv(res, w2_hwio)
    res = bn(res, bn3)
    return res + x                                            # MaxPool2d(1, 1) == identity


if __name__ == "__main__":
    # Toy-size bottleneck_IR(in_channel == depth, stride = 1) unit:
    # C = 8 channels, 16x16 spatial so W*C = 128 (one full lane group);
    # batch 16 -> block_batch 8 gives 2 grid steps (both v7x TCs get work).
    N, H, W, C = 16, 16, 16, 8

    key = jax.random.PRNGKey(0)
    keys = jax.random.split(key, 8)

    x = jax.random.normal(keys[0], (N, H, W, C), jnp.float32)

    # Conv weights: PyTorch OIHW kaiming(fan_out) init, converted to HWIO.
    std = (2.0 / (9 * C)) ** 0.5
    w1 = jnp.transpose(std * jax.random.normal(keys[1], (C, C, 3, 3), jnp.float32),
                       (2, 3, 1, 0))
    w2 = jnp.transpose(std * jax.random.normal(keys[2], (C, C, 3, 3), jnp.float32),
                       (2, 3, 1, 0))

    def bn_params(k):
        kg, kb, km, kv = jax.random.split(k, 4)
        return (1.0 + 0.1 * jax.random.normal(kg, (C,), jnp.float32),   # gamma
                0.1 * jax.random.normal(kb, (C,), jnp.float32),         # beta
                0.1 * jax.random.normal(km, (C,), jnp.float32),         # running_mean
                jax.random.uniform(kv, (C,), jnp.float32, 0.5, 1.5))    # running_var

    bn1, bn2, bn3 = bn_params(keys[3]), bn_params(keys[4]), bn_params(keys[5])
    prelu_alpha = 0.25 + 0.05 * jax.random.normal(keys[6], (C,), jnp.float32)

    ref = reference_forward(x, w1, w2, bn1, bn2, bn3, prelu_alpha)

    # Full-precision MXU path: tight check of the fused semantics.
    out_f32 = jax.block_until_ready(
        bottleneck_ir_unit(x, w1, w2, bn1, bn2, bn3, prelu_alpha,
                           block_batch=8, compute_dtype=jnp.float32))
    assert out_f32.shape == (N, H, W, C)
    assert jnp.allclose(out_f32, ref, atol=1e-2, rtol=1e-2), (
        float(jnp.max(jnp.abs(out_f32 - ref))))

    # Default bf16 MXU path (v6e/v7x peak): looser tolerance for bf16 operands.
    out_bf16 = jax.block_until_ready(
        bottleneck_ir_unit(x, w1, w2, bn1, bn2, bn3, prelu_alpha,
                           block_batch=8, compute_dtype=jnp.bfloat16))
    assert jnp.allclose(out_bf16, ref, atol=2e-1, rtol=1e-1), (
        float(jnp.max(jnp.abs(out_bf16 - ref))))

    print("KERNEL_OK")
</pallas_src>

<mosaic_0001>
module attributes {stable_mosaic.version = 11 : i64} {
  func.func @bottleneck_ir_kernel(%arg0: i32, %arg1: memref<16x8x128xf32, #tpu.memory_space<vmem>>, %arg2: memref<3x128x128xf32, #tpu.memory_space<vmem>>, %arg3: memref<3x128x128xf32, #tpu.memory_space<vmem>>, %arg4: memref<8x128xf32, #tpu.memory_space<vmem>>, %arg5: memref<16x8x128xf32, #tpu.memory_space<vmem>>, %arg6: memref<144x128xf32, #tpu.memory_space<vmem>>) attributes {dimension_semantics = [#tpu.dimension_semantics<parallel>], iteration_bounds = array<i64: 2>, scalar_prefetch = 0 : i64, scratch_operands = 1 : i64, tpu.core_type = #tpu.core_type<tc>, window_params = [{transform_indices = @transform_0, window_bounds = array<i64: 16, 8, 128>}, {pipeline_mode = #tpu.pipeline_mode<synchronous>, transform_indices = @transform_1, window_bounds = array<i64: 3, 128, 128>}, {pipeline_mode = #tpu.pipeline_mode<synchronous>, transform_indices = @transform_2, window_bounds = array<i64: 3, 128, 128>}, {pipeline_mode = #tpu.pipeline_mode<synchronous>, transform_indices = @transform_3, window_bounds = array<i64: 8, 128>}, {transform_indices = @transform_4, window_bounds = array<i64: 16, 8, 128>}]} {
    %c0 = arith.constant 0 : index
    %c0_0 = arith.constant 0 : index
    %0 = vector.load %arg4[%c0, %c0_0] : memref<8x128xf32, #tpu.memory_space<vmem>>, vector<8x128xf32>
    %1 = vector.extract_strided_slice %0 {offsets = [0, 0], sizes = [1, 128], strides = [1, 1]} : vector<8x128xf32> to vector<1x128xf32>
    %2 = vector.extract_strided_slice %0 {offsets = [1, 0], sizes = [1, 128], strides = [1, 1]} : vector<8x128xf32> to vector<1x128xf32>
    %3 = vector.extract_strided_slice %0 {offsets = [2, 0], sizes = [1, 128], strides = [1, 1]} : vector<8x128xf32> to vector<1x128xf32>
    %4 = vector.extract_strided_slice %0 {offsets = [3, 0], sizes = [1, 128], strides = [1, 1]} : vector<8x128xf32> to vector<1x128xf32>
    %5 = vector.extract_strided_slice %0 {offsets = [4, 0], sizes = [1, 128], strides = [1, 1]} : vector<8x128xf32> to vector<1x128xf32>
    %6 = vector.extract_strided_slice %0 {offsets = [5, 0], sizes = [1, 128], strides = [1, 1]} : vector<8x128xf32> to vector<1x128xf32>
    %7 = vector.extract_strided_slice %0 {offsets = [6, 0], sizes = [1, 128], strides = [1, 1]} : vector<8x128xf32> to vector<1x128xf32>
    %cst = arith.constant 0.000000e+00 : f32
    %8 = vector.broadcast %cst : f32 to vector<8x128xf32>
    %c0_1 = arith.constant 0 : index
    %c0_2 = arith.constant 0 : index
    %9 = vector.load %arg6[%c0_1, %c0_2] : memref<144x128xf32, #tpu.memory_space<vmem>>, vector<8x128xf32>
    tpu.vector_store %arg6[%c0_1, %c0_2], %8 {strides = array<i32>} : memref<144x128xf32, #tpu.memory_space<vmem>>, vector<8x128xf32>,
    %c136 = arith.constant 136 : index
    %c0_3 = arith.constant 0 : index
    %10 = vector.load %arg6[%c136, %c0_3] : memref<144x128xf32, #tpu.memory_space<vmem>>, vector<8x128xf32>
    tpu.vector_store %arg6[%c136, %c0_3], %8 {strides = array<i32>} : memref<144x128xf32, #tpu.memory_space<vmem>>, vector<8x128xf32>,
    %c0_4 = arith.constant 0 : index
    %c0_5 = arith.constant 0 : index
    %c0_6 = arith.constant 0 : index
    %11 = vector.load %arg1[%c0_4, %c0_5, %c0_6] : memref<16x8x128xf32, #tpu.memory_space<vmem>>, vector<16x8x128xf32>
    %12 = vector.shape_cast %11 : vector<16x8x128xf32> to vector<128x128xf32>
    %13 = vector.broadcast %1 : vector<1x128xf32> to vector<128x128xf32>
    %14 = arith.mulf %12, %13 : vector<128x128xf32>
    %15 = vector.broadcast %2 : vector<1x128xf32> to vector<128x128xf32>
    %16 = arith.addf %14, %15 : vector<128x128xf32>
    %c8 = arith.constant 8 : index
    %c0_7 = arith.constant 0 : index
    %17 = vector.load %arg6[%c8, %c0_7] : memref<144x128xf32, #tpu.memory_space<vmem>>, vector<128x128xf32>
    tpu.vector_store %arg6[%c8, %c0_7], %16 {strides = array<i32>} : memref<144x128xf32, #tpu.memory_space<vmem>>, vector<128x128xf32>,
    %c0_8 = arith.constant 0 : index
    %c0_9 = arith.constant 0 : index
    %18 = vector.load %arg6[%c0_8, %c0_9] : memref<144x128xf32, #tpu.memory_space<vmem>>, vector<128x128xf32>
    %c0_10 = arith.constant 0 : index
    %c0_11 = arith.constant 0 : index
    %c0_12 = arith.constant 0 : index
    %19 = vector.load %arg2[%c0_10, %c0_11, %c0_12] : memref<3x128x128xf32, #tpu.memory_space<vmem>>, vector<1x128x128xf32>
    %20 = vector.shape_cast %19 : vector<1x128x128xf32> to vector<128x128xf32>
    %cst_13 = arith.constant dense<0.000000e+00> : vector<128x128xf32>
    %21 = tpu.matmul %18, %20, %cst_13 {dimension_numbers = #tpu.dot_dimension_numbers<[1], [0], [0], [1], [0, 0, 1, 1], [], []>} : vector<128x128xf32>, vector<128x128xf32>, vector<128x128xf32> -> vector<128x128xf32>
    %c8_14 = arith.constant 8 : index
    %c0_15 = arith.constant 0 : index
    %22 = vector.load %arg6[%c8_14, %c0_15] : memref<144x128xf32, #tpu.memory_space<vmem>>, vector<128x128xf32>
    %c1 = arith.constant 1 : index
    %c0_16 = arith.constant 0 : index
    %c0_17 = arith.constant 0 : index
    %23 = vector.load %arg2[%c1, %c0_16, %c0_17] : memref<3x128x128xf32, #tpu.memory_space<vmem>>, vector<1x128x128xf32>
    %24 = vector.shape_cast %23 : vector<1x128x128xf32> to vector<128x128xf32>
    %cst_18 = arith.constant dense<0.000000e+00> : vector<128x128xf32>
    %25 = tpu.matmul %22, %24, %cst_18 {dimension_numbers = #tpu.dot_dimension_numbers<[1], [0], [0], [1], [0, 0, 1, 1], [], []>} : vector<128x128xf32>, vector<128x128xf32>, vector<128x128xf32> -> vector<128x128xf32>
    %26 = arith.addf %21, %25 : vector<128x128xf32>
    %c16 = arith.constant 16 : index
    %c0_19 = arith.constant 0 : index
    %27 = vector.load %arg6[%c16, %c0_19] : memref<144x128xf32, #tpu.memory_space<vmem>>, vector<128x128xf32>
    %c2 = arith.constant 2 : index
    %c0_20 = arith.constant 0 : index
    %c0_21 = arith.constant 0 : index
    %28 = vector.load %arg2[%c2, %c0_20, %c0_21] : memref<3x128x128xf32, #tpu.memory_space<vmem>>, vector<1x128x128xf32>
    %29 = vector.shape_cast %28 : vector<1x128x128xf32> to vector<128x128xf32>
    %cst_22 = arith.constant dense<0.000000e+00> : vector<128x128xf32>
    %30 = tpu.matmul %27, %29, %cst_22 {dimension_numbers = #tpu.dot_dimension_numbers<[1], [0], [0], [1], [0, 0, 1, 1], [], []>} : vector<128x128xf32>, vector<128x128xf32>, vector<128x128xf32> -> vector<128x128xf32>
    %31 = arith.addf %26, %30 : vector<128x128xf32>
    %32 = vector.broadcast %3 : vector<1x128xf32> to vector<128x128xf32>
    %33 = arith.mulf %31, %32 : vector<128x128xf32>
    %34 = vector.broadcast %4 : vector<1x128xf32> to vector<128x128xf32>
    %35 = arith.addf %33, %34 : vector<128x128xf32>
    %cst_23 = arith.constant 0.000000e+00 : f32
    %36 = vector.broadcast %cst_23 : f32 to vector<128x128xf32>
    %37 = arith.cmpf oge, %35, %36 : vector<128x128xf32>
    %38 = vector.broadcast %5 : vector<1x128xf32> to vector<128x128xf32>
    %39 = arith.mulf %38, %35 : vector<128x128xf32>
    %40 = arith.select %37, %35, %39 : vector<128x128xi1>, vector<128x128xf32>
    %c8_24 = arith.constant 8 : index
    %c0_25 = arith.constant 0 : index
    %41 = vector.load %arg6[%c8_24, %c0_25] : memref<144x128xf32, #tpu.memory_space<vmem>>, vector<128x128xf32>
    tpu.vector_store %arg6[%c8_24, %c0_25], %40 {strides = array<i32>} : memref<144x128xf32, #tpu.memory_space<vmem>>, vector<128x128xf32>,
    %c0_26 = arith.constant 0 : index
    %c0_27 = arith.constant 0 : index
    %42 = vector.load %arg6[%c0_26, %c0_27] : memref<144x128xf32, #tpu.memory_space<vmem>>, vector<128x128xf32>
    %c0_28 = arith.constant 0 : index
    %c0_29 = arith.constant 0 : index
    %c0_30 = arith.constant 0 : index
    %43 = vector.load %arg3[%c0_28, %c0_29, %c0_30] : memref<3x128x128xf32, #tpu.memory_space<vmem>>, vector<1x128x128xf32>
    %44 = vector.shape_cast %43 : vector<1x128x128xf32> to vector<128x128xf32>
    %cst_31 = arith.constant dense<0.000000e+00> : vector<128x128xf32>
    %45 = tpu.matmul %42, %44, %cst_31 {dimension_numbers = #tpu.dot_dimension_numbers<[1], [0], [0], [1], [0, 0, 1, 1], [], []>} : vector<128x128xf32>, vector<128x128xf32>, vector<128x128xf32> -> vector<128x128xf32>
    %c8_32 = arith.constant 8 : index
    %c0_33 = arith.constant 0 : index
    %46 = vector.load %arg6[%c8_32, %c0_33] : memref<144x128xf32, #tpu.memory_space<vmem>>, vector<128x128xf32>
    %c1_34 = arith.constant 1 : index
    %c0_35 = arith.constant 0 : index
    %c0_36 = arith.constant 0 : index
    %47 = vector.load %arg3[%c1_34, %c0_35, %c0_36] : memref<3x128x128xf32, #tpu.memory_space<vmem>>, vector<1x128x128xf32>
    %48 = vector.shape_cast %47 : vector<1x128x128xf32> to vector<128x128xf32>
    %cst_37 = arith.constant dense<0.000000e+00> : vector<128x128xf32>
    %49 = tpu.matmul %46, %48, %cst_37 {dimension_numbers = #tpu.dot_dimension_numbers<[1], [0], [0], [1], [0, 0, 1, 1], [], []>} : vector<128x128xf32>, vector<128x128xf32>, vector<128x128xf32> -> vector<128x128xf32>
    %50 = arith.addf %45, %49 : vector<128x128xf32>
    %c16_38 = arith.constant 16 : index
    %c0_39 = arith.constant 0 : index
    %51 = vector.load %arg6[%c16_38, %c0_39] : memref<144x128xf32, #tpu.memory_space<vmem>>, vector<128x128xf32>
    %c2_40 = arith.constant 2 : index
    %c0_41 = arith.constant 0 : index
    %c0_42 = arith.constant 0 : index
    %52 = vector.load %arg3[%c2_40, %c0_41, %c0_42] : memref<3x128x128xf32, #tpu.memory_space<vmem>>, vector<1x128x128xf32>
    %53 = vector.shape_cast %52 : vector<1x128x128xf32> to vector<128x128xf32>
    %cst_43 = arith.constant dense<0.000000e+00> : vector<128x128xf32>
    %54 = tpu.matmul %51, %53, %cst_43 {dimension_numbers = #tpu.dot_dimension_numbers<[1], [0], [0], [1], [0, 0, 1, 1], [], []>} : vector<128x128xf32>, vector<128x128xf32>, vector<128x128xf32> -> vector<128x128xf32>
    %55 = arith.addf %50, %54 : vector<128x128xf32>
    %56 = vector.broadcast %6 : vector<1x128xf32> to vector<128x128xf32>
    %57 = arith.mulf %55, %56 : vector<128x128xf32>
    %58 = vector.broadcast %7 : vector<1x128xf32> to vector<128x128xf32>
    %59 = arith.addf %57, %58 : vector<128x128xf32>
    %c0_44 = arith.constant 0 : index
    %c0_45 = arith.constant 0 : index
    %c0_46 = arith.constant 0 : index
    %60 = vector.load %arg1[%c0_44, %c0_45, %c0_46] : memref<16x8x128xf32, #tpu.memory_space<vmem>>, vector<16x8x128xf32>
    %61 = vector.shape_cast %60 : vector<16x8x128xf32> to vector<128x128xf32>
    %62 = arith.addf %59, %61 : vector<128x128xf32>
    %63 = vector.shape_cast %62 : vector<128x128xf32> to vector<16x8x128xf32>
    %c0_47 = arith.constant 0 : index
    %c0_48 = arith.constant 0 : index
    %c0_49 = arith.constant 0 : index
    %64 = vector.load %arg5[%c0_47, %c0_48, %c0_49] : memref<16x8x128xf32, #tpu.memory_space<vmem>>, vector<16x8x128xf32>
    tpu.vector_store %arg5[%c0_47, %c0_48, %c0_49], %63 {strides = array<i32>} : memref<16x8x128xf32, #tpu.memory_space<vmem>>, vector<16x8x128xf32>,
    return
  }
  func.func @transform_0(%arg0: i32) -> (i32, i32, i32) {
    %c0_i32 = arith.constant 0 : i32
    %c0_i32_0 = arith.constant 0 : i32
    %c0_i32_1 = arith.constant 0 : i32
    return %c0_i32, %arg0, %c0_i32_0 : i32, i32, i32
  }
  func.func @transform_1(%arg0: i32) -> (i32, i32, i32) {
    %c0_i32 = arith.constant 0 : i32
    %c0_i32_0 = arith.constant 0 : i32
    %c0_i32_1 = arith.constant 0 : i32
    %c0_i32_2 = arith.constant 0 : i32
    return %c0_i32, %c0_i32_0, %c0_i32_1 : i32, i32, i32
  }
  func.func @transform_2(%arg0: i32) -> (i32, i32, i32) {
    %c0_i32 = arith.constant 0 : i32
    %c0_i32_0 = arith.constant 0 : i32
    %c0_i32_1 = arith.constant 0 : i32
    %c0_i32_2 = arith.constant 0 : i32
    return %c0_i32, %c0_i32_0, %c0_i32_1 : i32, i32, i32
  }
  func.func @transform_3(%arg0: i32) -> (i32, i32) {
    %c0_i32 = arith.constant 0 : i32
    %c0_i32_0 = arith.constant 0 : i32
    %c0_i32_1 = arith.constant 0 : i32
    return %c0_i32, %c0_i32_0 : i32, i32
  }
  func.func @transform_4(%arg0: i32) -> (i32, i32, i32) {
    %c0_i32 = arith.constant 0 : i32
    %c0_i32_0 = arith.constant 0 : i32
    %c0_i32_1 = arith.constant 0 : i32
    return %c0_i32, %arg0, %c0_i32_0 : i32, i32, i32
  }
}

module attributes {stable_mosaic.version = 11 : i64} {
  func.func @bottleneck_ir_kernel(%arg0: i32, %arg1: memref<16x8x128xf32, #tpu.memory_space<vmem>>, %arg2: memref<3x128x128xf32, #tpu.memory_space<vmem>>, %arg3: memref<3x128x128xf32, #tpu.memory_space<vmem>>, %arg4: memref<8x128xf32, #tpu.memory_space<vmem>>, %arg5: memref<16x8x128xf32, #tpu.memory_space<vmem>>, %arg6: memref<144x128xf32, #tpu.memory_space<vmem>>) attributes {dimension_semantics = [#tpu.dimension_semantics<parallel>], iteration_bounds = array<i64: 2>, scalar_prefetch = 0 : i64, scratch_operands = 1 : i64, tpu.core_type = #tpu.core_type<tc>, window_params = [{transform_indices = @transform_0, window_bounds = array<i64: 16, 8, 128>}, {pipeline_mode = #tpu.pipeline_mode<synchronous>, transform_indices = @transform_1, window_bounds = array<i64: 3, 128, 128>}, {pipeline_mode = #tpu.pipeline_mode<synchronous>, transform_indices = @transform_2, window_bounds = array<i64: 3, 128, 128>}, {pipeline_mode = #tpu.pipeline_mode<synchronous>, transform_indices = @transform_3, window_bounds = array<i64: 8, 128>}, {transform_indices = @transform_4, window_bounds = array<i64: 16, 8, 128>}]} {
    %c0 = arith.constant 0 : index
    %c0_0 = arith.constant 0 : index
    %0 = vector.load %arg4[%c0, %c0_0] : memref<8x128xf32, #tpu.memory_space<vmem>>, vector<8x128xf32>
    %1 = vector.extract_strided_slice %0 {offsets = [0, 0], sizes = [1, 128], strides = [1, 1]} : vector<8x128xf32> to vector<1x128xf32>
    %2 = vector.extract_strided_slice %0 {offsets = [1, 0], sizes = [1, 128], strides = [1, 1]} : vector<8x128xf32> to vector<1x128xf32>
    %3 = vector.extract_strided_slice %0 {offsets = [2, 0], sizes = [1, 128], strides = [1, 1]} : vector<8x128xf32> to vector<1x128xf32>
    %4 = vector.extract_strided_slice %0 {offsets = [3, 0], sizes = [1, 128], strides = [1, 1]} : vector<8x128xf32> to vector<1x128xf32>
    %5 = vector.extract_strided_slice %0 {offsets = [4, 0], sizes = [1, 128], strides = [1, 1]} : vector<8x128xf32> to vector<1x128xf32>
    %6 = vector.extract_strided_slice %0 {offsets = [5, 0], sizes = [1, 128], strides = [1, 1]} : vector<8x128xf32> to vector<1x128xf32>
    %7 = vector.extract_strided_slice %0 {offsets = [6, 0], sizes = [1, 128], strides = [1, 1]} : vector<8x128xf32> to vector<1x128xf32>
    %cst = arith.constant 0.000000e+00 : f32
    %8 = vector.broadcast %cst : f32 to vector<8x128xf32>
    %c0_1 = arith.constant 0 : index
    %c0_2 = arith.constant 0 : index
    %9 = vector.load %arg6[%c0_1, %c0_2] : memref<144x128xf32, #tpu.memory_space<vmem>>, vector<8x128xf32>
    tpu.vector_store %arg6[%c0_1, %c0_2], %8 {strides = array<i32>} : memref<144x128xf32, #tpu.memory_space<vmem>>, vector<8x128xf32>,
    %c136 = arith.constant 136 : index
    %c0_3 = arith.constant 0 : index
    %10 = vector.load %arg6[%c136, %c0_3] : memref<144x128xf32, #tpu.memory_space<vmem>>, vector<8x128xf32>
    tpu.vector_store %arg6[%c136, %c0_3], %8 {strides = array<i32>} : memref<144x128xf32, #tpu.memory_space<vmem>>, vector<8x128xf32>,
    %c0_4 = arith.constant 0 : index
    %c0_5 = arith.constant 0 : index
    %c0_6 = arith.constant 0 : index
    %11 = vector.load %arg1[%c0_4, %c0_5, %c0_6] : memref<16x8x128xf32, #tpu.memory_space<vmem>>, vector<16x8x128xf32>
    %12 = vector.shape_cast %11 : vector<16x8x128xf32> to vector<128x128xf32>
    %13 = vector.broadcast %1 : vector<1x128xf32> to vector<128x128xf32>
    %14 = arith.mulf %12, %13 : vector<128x128xf32>
    %15 = vector.broadcast %2 : vector<1x128xf32> to vector<128x128xf32>
    %16 = arith.addf %14, %15 : vector<128x128xf32>
    %c8 = arith.constant 8 : index
    %c0_7 = arith.constant 0 : index
    %17 = vector.load %arg6[%c8, %c0_7] : memref<144x128xf32, #tpu.memory_space<vmem>>, vector<128x128xf32>
    tpu.vector_store %arg6[%c8, %c0_7], %16 {strides = array<i32>} : memref<144x128xf32, #tpu.memory_space<vmem>>, vector<128x128xf32>,
    %c0_8 = arith.constant 0 : index
    %c0_9 = arith.constant 0 : index
    %18 = vector.load %arg6[%c0_8, %c0_9] : memref<144x128xf32, #tpu.memory_space<vmem>>, vector<128x128xf32>
    %c0_10 = arith.constant 0 : index
    %c0_11 = arith.constant 0 : index
    %c0_12 = arith.constant 0 : index
    %19 = vector.load %arg2[%c0_10, %c0_11, %c0_12] : memref<3x128x128xf32, #tpu.memory_space<vmem>>, vector<1x128x128xf32>
    %20 = vector.shape_cast %19 : vector<1x128x128xf32> to vector<128x128xf32>
    %cst_13 = arith.constant dense<0.000000e+00> : vector<128x128xf32>
    %21 = tpu.matmul %18, %20, %cst_13 {dimension_numbers = #tpu.dot_dimension_numbers<[1], [0], [0], [1], [0, 0, 1, 1], [], []>} : vector<128x128xf32>, vector<128x128xf32>, vector<128x128xf32> -> vector<128x128xf32>
    %c8_14 = arith.constant 8 : index
    %c0_15 = arith.constant 0 : index
    %22 = vector.load %arg6[%c8_14, %c0_15] : memref<144x128xf32, #tpu.memory_space<vmem>>, vector<128x128xf32>
    %c1 = arith.constant 1 : index
    %c0_16 = arith.constant 0 : index
    %c0_17 = arith.constant 0 : index
    %23 = vector.load %arg2[%c1, %c0_16, %c0_17] : memref<3x128x128xf32, #tpu.memory_space<vmem>>, vector<1x128x128xf32>
    %24 = vector.shape_cast %23 : vector<1x128x128xf32> to vector<128x128xf32>
    %cst_18 = arith.constant dense<0.000000e+00> : vector<128x128xf32>
    %25 = tpu.matmul %22, %24, %cst_18 {dimension_numbers = #tpu.dot_dimension_numbers<[1], [0], [0], [1], [0, 0, 1, 1], [], []>} : vector<128x128xf32>, vector<128x128xf32>, vector<128x128xf32> -> vector<128x128xf32>
    %26 = arith.addf %21, %25 : vector<128x128xf32>
    %c16 = arith.constant 16 : index
    %c0_19 = arith.constant 0 : index
    %27 = vector.load %arg6[%c16, %c0_19] : memref<144x128xf32, #tpu.memory_space<vmem>>, vector<128x128xf32>
    %c2 = arith.constant 2 : index
    %c0_20 = arith.constant 0 : index
    %c0_21 = arith.constant 0 : index
    %28 = vector.load %arg2[%c2, %c0_20, %c0_21] : memref<3x128x128xf32, #tpu.memory_space<vmem>>, vector<1x128x128xf32>
    %29 = vector.shape_cast %28 : vector<1x128x128xf32> to vector<128x128xf32>
    %cst_22 = arith.constant dense<0.000000e+00> : vector<128x128xf32>
    %30 = tpu.matmul %27, %29, %cst_22 {dimension_numbers = #tpu.dot_dimension_numbers<[1], [0], [0], [1], [0, 0, 1, 1], [], []>} : vector<128x128xf32>, vector<128x128xf32>, vector<128x128xf32> -> vector<128x128xf32>
    %31 = arith.addf %26, %30 : vector<128x128xf32>
    %32 = vector.broadcast %3 : vector<1x128xf32> to vector<128x128xf32>
    %33 = arith.mulf %31, %32 : vector<128x128xf32>
    %34 = vector.broadcast %4 : vector<1x128xf32> to vector<128x128xf32>
    %35 = arith.addf %33, %34 : vector<128x128xf32>
    %cst_23 = arith.constant 0.000000e+00 : f32
    %36 = vector.broadcast %cst_23 : f32 to vector<128x128xf32>
    %37 = arith.cmpf oge, %35, %36 : vector<128x128xf32>
    %38 = vector.broadcast %5 : vector<1x128xf32> to vector<128x128xf32>
    %39 = arith.mulf %38, %35 : vector<128x128xf32>
    %40 = arith.select %37, %35, %39 : vector<128x128xi1>, vector<128x128xf32>
    %c8_24 = arith.constant 8 : index
    %c0_25 = arith.constant 0 : index
    %41 = vector.load %arg6[%c8_24, %c0_25] : memref<144x128xf32, #tpu.memory_space<vmem>>, vector<128x128xf32>
    tpu.vector_store %arg6[%c8_24, %c0_25], %40 {strides = array<i32>} : memref<144x128xf32, #tpu.memory_space<vmem>>, vector<128x128xf32>,
    %c0_26 = arith.constant 0 : index
    %c0_27 = arith.constant 0 : index
    %42 = vector.load %arg6[%c0_26, %c0_27] : memref<144x128xf32, #tpu.memory_space<vmem>>, vector<128x128xf32>
    %c0_28 = arith.constant 0 : index
    %c0_29 = arith.constant 0 : index
    %c0_30 = arith.constant 0 : index
    %43 = vector.load %arg3[%c0_28, %c0_29, %c0_30] : memref<3x128x128xf32, #tpu.memory_space<vmem>>, vector<1x128x128xf32>
    %44 = vector.shape_cast %43 : vector<1x128x128xf32> to vector<128x128xf32>
    %cst_31 = arith.constant dense<0.000000e+00> : vector<128x128xf32>
    %45 = tpu.matmul %42, %44, %cst_31 {dimension_numbers = #tpu.dot_dimension_numbers<[1], [0], [0], [1], [0, 0, 1, 1], [], []>} : vector<128x128xf32>, vector<128x128xf32>, vector<128x128xf32> -> vector<128x128xf32>
    %c8_32 = arith.constant 8 : index
    %c0_33 = arith.constant 0 : index
    %46 = vector.load %arg6[%c8_32, %c0_33] : memref<144x128xf32, #tpu.memory_space<vmem>>, vector<128x128xf32>
    %c1_34 = arith.constant 1 : index
    %c0_35 = arith.constant 0 : index
    %c0_36 = arith.constant 0 : index
    %47 = vector.load %arg3[%c1_34, %c0_35, %c0_36] : memref<3x128x128xf32, #tpu.memory_space<vmem>>, vector<1x128x128xf32>
    %48 = vector.shape_cast %47 : vector<1x128x128xf32> to vector<128x128xf32>
    %cst_37 = arith.constant dense<0.000000e+00> : vector<128x128xf32>
    %49 = tpu.matmul %46, %48, %cst_37 {dimension_numbers = #tpu.dot_dimension_numbers<[1], [0], [0], [1], [0, 0, 1, 1], [], []>} : vector<128x128xf32>, vector<128x128xf32>, vector<128x128xf32> -> vector<128x128xf32>
    %50 = arith.addf %45, %49 : vector<128x128xf32>
    %c16_38 = arith.constant 16 : index
    %c0_39 = arith.constant 0 : index
    %51 = vector.load %arg6[%c16_38, %c0_39] : memref<144x128xf32, #tpu.memory_space<vmem>>, vector<128x128xf32>
    %c2_40 = arith.constant 2 : index
    %c0_41 = arith.constant 0 : index
    %c0_42 = arith.constant 0 : index
    %52 = vector.load %arg3[%c2_40, %c0_41, %c0_42] : memref<3x128x128xf32, #tpu.memory_space<vmem>>, vector<1x128x128xf32>
    %53 = vector.shape_cast %52 : vector<1x128x128xf32> to vector<128x128xf32>
    %cst_43 = arith.constant dense<0.000000e+00> : vector<128x128xf32>
    %54 = tpu.matmul %51, %53, %cst_43 {dimension_numbers = #tpu.dot_dimension_numbers<[1], [0], [0], [1], [0, 0, 1, 1], [], []>} : vector<128x128xf32>, vector<128x128xf32>, vector<128x128xf32> -> vector<128x128xf32>
    %55 = arith.addf %50, %54 : vector<128x128xf32>
    %56 = vector.broadcast %6 : vector<1x128xf32> to vector<128x128xf32>
    %57 = arith.mulf %55, %56 : vector<128x128xf32>
    %58 = vector.broadcast %7 : vector<1x128xf32> to vector<128x128xf32>
    %59 = arith.addf %57, %58 : vector<128x128xf32>
    %c0_44 = arith.constant 0 : index
    %c0_45 = arith.constant 0 : index
    %c0_46 = arith.constant 0 : index
    %60 = vector.load %arg1[%c0_44, %c0_45, %c0_46] : memref<16x8x128xf32, #tpu.memory_space<vmem>>, vector<16x8x128xf32>
    %61 = vector.shape_cast %60 : vector<16x8x128xf32> to vector<128x128xf32>
    %62 = arith.addf %59, %61 : vector<128x128xf32>
    %63 = vector.shape_cast %62 : vector<128x128xf32> to vector<16x8x128xf32>
    %c0_47 = arith.constant 0 : index
    %c0_48 = arith.constant 0 : index
    %c0_49 = arith.constant 0 : index
    %64 = vector.load %arg5[%c0_47, %c0_48, %c0_49] : memref<16x8x128xf32, #tpu.memory_space<vmem>>, vector<16x8x128xf32>
    tpu.vector_store %arg5[%c0_47, %c0_48, %c0_49], %63 {strides = array<i32>} : memref<16x8x128xf32, #tpu.memory_space<vmem>>, vector<16x8x128xf32>,
    return
  }
  func.func @transform_0(%arg0: i32) -> (i32, i32, i32) {
    %c0_i32 = arith.constant 0 : i32
    %c0_i32_0 = arith.constant 0 : i32
    %c0_i32_1 = arith.constant 0 : i32
    return %c0_i32, %arg0, %c0_i32_0 : i32, i32, i32
  }
  func.func @transform_1(%arg0: i32) -> (i32, i32, i32) {
    %c0_i32 = arith.constant 0 : i32
    %c0_i32_0 = arith.constant 0 : i32
    %c0_i32_1 = arith.constant 0 : i32
    %c0_i32_2 = arith.constant 0 : i32
    return %c0_i32, %c0_i32_0, %c0_i32_1 : i32, i32, i32
  }
  func.func @transform_2(%arg0: i32) -> (i32, i32, i32) {
    %c0_i32 = arith.constant 0 : i32
    %c0_i32_0 = arith.constant 0 : i32
    %c0_i32_1 = arith.constant 0 : i32
    %c0_i32_2 = arith.constant 0 : i32
    return %c0_i32, %c0_i32_0, %c0_i32_1 : i32, i32, i32
  }
  func.func @transform_3(%arg0: i32) -> (i32, i32) {
    %c0_i32 = arith.constant 0 : i32
    %c0_i32_0 = arith.constant 0 : i32
    %c0_i32_1 = arith.constant 0 : i32
    return %c0_i32, %c0_i32_0 : i32, i32
  }
  func.func @transform_4(%arg0: i32) -> (i32, i32, i32) {
    %c0_i32 = arith.constant 0 : i32
    %c0_i32_0 = arith.constant 0 : i32
    %c0_i32_1 = arith.constant 0 : i32
    return %c0_i32, %arg0, %c0_i32_0 : i32, i32, i32
  }
}

</mosaic_0001>

<bundles_post_ra>
// kernel: tpu_custom_call.1
= control target key start
LH: loop header
LB: loop body
LE: loop exit
PB: predicated region body
PF: predicated region fallthrough
CT: control target
= control target key end

     0   :  { %9 = vsyncpa [#allocation4], 0  ;;  %s3127_s0 = inlined_call_operand.hbm [shape: f32[16,16,128], index: 0, kind: input, shape index: {}]   ;;  %s3128_s1 = inlined_call_operand.hbm [shape: f32[3,128,128], index: 1, kind: input, shape index: {}]   ;;  %s3129_s2 = inlined_call_operand.hbm [shape: f32[3,128,128], index: 2, kind: input, shape index: {}]   ;;  %s3130_s3 = inlined_call_operand.hbm [shape: f32[8,128], index: 3, kind: input, shape index: {}]   ;;  %s3131_s4 = inlined_call_operand.hbm [shape: f32[16,16,128], index: 4, kind: output, shape index: {}]  }
   0x1   :  { %11 = vsyncpa [#allocation4 + $0x1], 0 }
   0x2   :  { %12 = vsyncpa [#allocation7], 0 }
   0x3   :  { %13 = vsyncpa [#allocation10], 0 }
   0x4   :  { %14 = vsyncpa [#allocation5], 0 }
   0x5   :  { %16 = vsyncpa [#allocation5 + $0x1], 0  ;;  %s2559_s15 = smov 0   ;;  %s2561_s16 = smov 0  }
   0x6   :  { %s2563_s17 = smov 0   ;;  %s2565_s18 = smov 0  }
   0x7 LB: > { %s2580_s19 = sadd.s32 4294967295, %s2520_s18   ;;  %s1711_s20 = sadd.s32 4294967294, %s2520_s18   ;;  %s2520_s18 = sphi %s2565_s18, %s3155_s18   ;;  %s2516_s17 = sphi %s2563_s17, %s3154_s17   ;;  %s2512_s16 = sphi %s2561_s16, %s3153_s16   ;;  %s2508_s15 = sphi %s2559_s15, %s3152_s15  }
   0x8   : > { %s2584_s21 = sadd.s32 1, %s2520_s18   ;;  %s29_s22 = sadd.s32 1, %s2516_s17 }
   0x9   : > { %s26_s23 = ssub.s32 %s2520_s18, %s2584_s21  ;;  %p36_p0 = scmp.ne.s32.totalorder %s2516_s17, %s2512_s16 }
   0xa   : > { %p27_p1 = scmp.eq.s32.totalorder %s26_s23, 0  ;;  %p37_p2 = scmp.eq.s32.totalorder %s2520_s18, 0 }
   0xb   : > { %p42_p3 = scmp.ne.s32.totalorder %s2512_s16, %s2508_s15  ;;  %p3133_p4 = scmp.eq.s32.totalorder %s2580_s19, 0 }
   0xc   : > { %s2596_s24 = scalar_select %p27_p1, %s2516_s17, %s29_s22  }
   0xd   : > { %p2598_p5 = por %p37_p2, %p36_p0  ;;  %p2604_p6 = por %p3133_p4, %p42_p3 }
   0xe   : > { %p129_p7 = scmp.eq.s32.totalorder %s2580_s19, 1  ;;  %p135_p8 = scmp.eq.s32.totalorder %s1711_s20, 1 }
   0xf   : > { %s3137_s26 = scalar_select %p2604_p6, 1, 0 }
  0x10   : > { %p1712_p9 = scmp.ge.s32.totalorder %s2520_s18, 1  ;;  %p142_p10 = scmp.lt.s32.totalorder %s2520_s18, 3 }
  0x11   : > { %p2611_p11 = por %p129_p7, %p36_p0  ;;  %p2615_p12 = por %p135_p8, %p42_p3 }
  0x12   : > { %p2619_p13 = pnand %p1712_p9, %p142_p10  ;;  %s2522_s30 = smov [#allocation6]  }
  0x13   : > { %s3138_s27 = scalar_select %p2611_p11, 1, 0 }
  0x14   : > { %s3139_s28 = scalar_select %p2615_p12, 1, 0 }
  0x15   : > { %s3140_s29 = scalar_select %p2619_p13, 1, 0 }
  0x16   : > { %p2273_p1 = pneg %p2619_p13  ;;  %s154_s5 = sshll.u32 %s2522_s30, 4  ;;  %s155_s5 = int_to_ptr.vmem [resolvable:$true] %s154_s5 }
  0x17   : > { %p2294_p3 = scmp.lt.s32.totalorder %s2520_s18, 2  ;;  %s2523_s7 = smov [#allocation8]  }
  0x18   : > { %p2627_p2 = pnand %p2273_p1, %p3133_p4  ;;  %s167_s8 = sshll.u32 %s2523_s7, 4  ;;  %s168_s8 = int_to_ptr.vmem [resolvable:$true] %s167_s8 }
  0x19   : > { %s2353_s9 = scalar_lea.vmem %s155_s5, 6144  ;;  %p2361_p12 = scmp.lt.s32.totalorder %s155_s5, %s155_s5 }
  0x1a   : > { %p2344_p7 = pneg %p2627_p2  ;;  %p2354_p8 = scmp.ne.s32.totalorder %s155_s5, %s2353_s9 }
  0x1b   : > { %p2362_p11 = scmp.lt.s32.totalorder %s2353_s9, %s2353_s9 }
  0x1c   : > { %p2356_p9 = pnand %p2354_p8, %p2344_p7 }
  0x1d   : > { %p2363_p1 = por %p2362_p11, %p2361_p12 }
  0x1e   : > { %p2357_p10 = pneg %p2356_p9 }
  0x20   : > { %p2364_p4 = pnand %p2363_p1, %p2357_p10 }
  0x22   : > { %2367 = shalt.err (!%p2364_p4)
}
  0x23   : > { %s2524_s10 = smov 128   ;;  %s2525_s11 = smov 8  }
  0x24   : > { %2276 = dma.hbm_to_vmem [thread:$0]  (!%p2627_p2), %s3128_s1, 6144, %s155_s5, [#allocation7], %s2524_s10, %s2524_s10, %s2525_s11  }
  0x25   : > { %p2650_p8 = pnand %p2294_p3, %p2598_p5  ;;  %s2379_s20 = scalar_lea.vmem %s168_s8, 6144 }
  0x26   : > { %p2380_p4 = scmp.ne.s32.totalorder %s168_s8, %s2379_s20  ;;  %p2387_p9 = scmp.lt.s32.totalorder %s168_s8, %s168_s8 }
  0x27   : > { %p2388_p10 = scmp.lt.s32.totalorder %s2379_s20, %s2379_s20 }
  0x28   : > { %p2382_p11 = pnand %p2380_p4, %p2344_p7 }
  0x29   : > { %p2389_p1 = por %p2388_p10, %p2387_p9 }
  0x2a   : > { %p2383_p12 = pneg %p2382_p11 }
  0x2c   : > { %p2390_p0 = pnand %p2389_p1, %p2383_p12 }
  0x2e   : > { %2393 = shalt.err (!%p2390_p0)
}
  0x2f   : > { %2279 = dma.hbm_to_vmem [thread:$0]  (!%p2627_p2), %s3129_s2, 6144, %s168_s8, [#allocation7], %s2524_s10, %s2524_s10, %s2525_s11  }
  0x30   : > { %s2526_s25 = smov [#allocation9]   ;;  %s192_s5 = sand.u32 1, %s2516_s17  }
  0x31   : > { %s181_s30 = sshll.u32 %s2526_s25, 4  ;;  %s182_s30 = int_to_ptr.vmem [resolvable:$true] %s181_s30 }
  0x32   : > { %s2405_s7 = scalar_lea.vmem %s182_s30, 128  ;;  %p2413_p4 = scmp.lt.s32.totalorder %s182_s30, %s182_s30 }
  0x33   : > { %p2406_p5 = scmp.ne.s32.totalorder %s182_s30, %s2405_s7  ;;  %p2414_p11 = scmp.lt.s32.totalorder %s2405_s7, %s2405_s7 }
  0x35   : > { %p2408_p0 = pnand %p2406_p5, %p2344_p7  ;;  %p2415_p12 = por %p2414_p11, %p2413_p4 }
  0x37   : > { %p2409_p3 = pneg %p2408_p0 }
  0x39   : > { %p2416_p9 = pnand %p2415_p12, %p2409_p3 }
  0x3b   : > { %2419 = shalt.err (!%p2416_p9)
}
  0x3c   : > { %2282 = dma.hbm_to_vmem [thread:$0]  (!%p2627_p2), %s3130_s3, 128, %s182_s30, [#allocation10]  }
  0x3d   : > { %s1717_s8 = sshll.u32 %s192_s5, 7  ;;  %s1718_s13 = sshll.u32 %s2520_s18, 7 }
  0x3e   : > { %s2678_s23 = scalar_lea.hbm %s3127_s0, %s1718_s13  ;;  %s196_s25 = scalar_lea.vmem [#allocation3], %s1717_s8 }
  0x3f   : > { %s202_s7 = sshll.u32 %s196_s25, 4  ;;  %s2682_s6 = scalar_lea.sflag [#allocation4], %s192_s5  ;;  %s2680_s7 = int_to_ptr.vmem [resolvable:$true] %s202_s7 }
  0x40   : > { %s2420_s9 = scalar_lea.hbm %s2678_s23, 2048  ;;  %p2422_p2 = pneg %p2650_p8 }
  0x41   : > { %p2421_p7 = scmp.ne.s32.totalorder %s2678_s23, %s2420_s9  ;;  %s2425_s13 = scalar_lea.hbm %s3127_s0, 4096 }
  0x42   : > { %p2426_p5 = scmp.lt.s32.totalorder %s2678_s23, %s3127_s0  ;;  %p2427_p0 = scmp.lt.s32.totalorder %s2425_s13, %s2420_s9 }
  0x43   : > { %p2423_p10 = pnand %p2422_p2, %p2421_p7 }
  0x44   : > { %p2428_p3 = por %p2427_p0, %p2426_p5 }
  0x45   : > { %p2424_p1 = pneg %p2423_p10 }
  0x47   : > { %p2429_p4 = pnand %p2428_p3, %p2424_p1 }
  0x49   : > { %2432 = shalt.err (!%p2429_p4)
}
  0x4a   : > { %s2433_s5 = scalar_lea.vmem %s2680_s7, 2048  ;;  %s2527_s8 = smov [#allocation3]  }
  0x4b   : > { %p2434_p11 = scmp.ne.s32.totalorder %s2680_s7, %s2433_s5  ;;  %s2438_s25 = sshll.u32 %s2527_s8, 4  ;;  %s2439_s25 = int_to_ptr.vmem [resolvable:$false] %s2438_s25 }
  0x4c   : > { %s2440_s30 = scalar_lea.vmem %s2439_s25, 4096  ;;  %p2441_p7 = scmp.lt.s32.totalorder %s2680_s7, %s2439_s25 }
  0x4d   : > { %p2436_p12 = pnand %p2434_p11, %p2422_p2  ;;  %p2442_p10 = scmp.lt.s32.totalorder %s2440_s30, %s2433_s5 }
  0x4f   : > { %p2437_p9 = pneg %p2436_p12  ;;  %p2443_p6 = por %p2442_p10, %p2441_p7 }
  0x51   : > { %p2444_p13 = pnand %p2443_p6, %p2437_p9 }
  0x53   : > { %2447 = shalt.err (!%p2444_p13)
}
  0x54   : > { %s2528_s9 = smov 256   ;;  %p3143_p2 = scmp.ne.s32.totalorder %s3140_s29, 0 }
  0x55   : > { %2286 = dma.hbm_to_vmem [thread:$0]  (!%p2650_p8), %s2678_s23, 2048, %s2680_s7, %s2682_s6, %s2528_s9, %s2524_s10, %s2525_s11  }
  0x56   : > { %214 = sbr.rel (%p3143_p2) target bundleno = 652 (0x28c), region = 36  ;;  %s2708_s12 = sand.u32 (!%p3143_p2), 1, %s2512_s16  }
  0x57   : > { %s1720_s13 = sshll.u32 (!%p3143_p2), %s2708_s12, 7  ;;  %s217_s20 = scalar_lea.sflag (!%p3143_p2), [#allocation4], %s2708_s12 }
  0x58   : > { %s2714_s14 = scalar_lea.vmem (!%p3143_p2), [#allocation3], %s1720_s13  ;;  %p3144_p6 = scmp.ne.s32.totalorder (!%p3143_p2), %s3137_s26, 0 }
  0x5b   : > { %2491 = dma.done.wait (%p3144_p6), %s217_s20, 2048  }
  0x5c   : > { %2493 = vsyncadd (%p3144_p6), %s217_s20, 4294965248  ;;  %p3145_p13 = scmp.eq.s32.totalorder %s2580_s19, 0 }
  0x5e   : > { %2495 = dma.done.wait (%p3145_p13), [#allocation7], 12288   ;;  %p3146_p8 = pmov %p3145_p13 }
  0x60   : > { %2497 = vsyncadd (%p3146_p8), [#allocation7], 4294955008  ;;  %p3147_p1 = pmov %p3146_p8 }
  0x62   : > { %2499 = dma.done.wait (%p3147_p1), [#allocation10], 128   ;;  %p3148_p5 = pmov %p3147_p1 }
  0x63   : > { %v2529_v0 = vmov 0.0   ;;  %v381_v1 = vld [vmem:[#allocation6 + $0xf8] sm:$0xff]  ;;  %v380_v3 = vld [vmem:[#allocation6 + $0xf0] sm:$0xff]  ;;  %v379_v5 = vld [vmem:[#allocation6 + $0xe8] sm:$0xff]  ;;  %v276_v13 = vlaneseq  ;;  %s3011_s26 = scalar_lea.vmem [#allocation11], %s1720_s13  ;;  %s1726_s29 = sshll.u32 %s2580_s19, 7 }
  0x64   : > { %2501 = vsyncadd (%p3148_p5), [#allocation10], 4294967168  ;;  %2009 = vmatprep.mubr.f32.mxu1 %v2529_v0  ;;  %v363_v2 = vld [vmem:[#allocation6 + $0x78] sm:$0xff]  ;;  %1921 = vmatprep.subr.mxu0 %v381_v1  ;;  %v362_v4 = vld [vmem:[#allocation6 + $0x70] sm:$0xff]  ;;  %s1609_s10 = sshll.u32 %s3011_s26, 4  ;;  %s3080_s7 = scalar_lea.hbm %s3131_s4, %s1726_s29  ;;  %s3082_s10 = int_to_ptr.vmem [resolvable:$true] %s1609_s10 }
  0x65   : > { %1977 = vmatprep.subr.mxu1 %v363_v2  ;;  %1922 = vmatpush3.msra.mxu0 %v381_v1  ;;  %v361_v6 = vld [vmem:[#allocation6 + $0x68] sm:$0xff]  ;;  %v378_v7 = vld [vmem:[#allocation6 + $0xe0] sm:$0xff]  ;;  %v377_v9 = vld [vmem:[#allocation6 + $0xd8] sm:$0xff]  ;;  %v2729_v18 = vshrl.u32 %v276_v13, 7  ;;  %s1597_s19 = scalar_lea.sflag [#allocation5], %s2708_s12  ;;  %s2448_s6 = scalar_lea.vmem %s3082_s10, 2048 }
  0x66   : > { %1978 = vmatpush3.msra.mxu1 %v363_v2  ;;  %1923 = vmatprep.subr.mxu0 %v380_v3  ;;  %v360_v8 = vld [vmem:[#allocation6 + $0x60] sm:$0xff]  ;;  %v359_v10 = vld [vmem:[#allocation6 + $0x58] sm:$0xff]  ;;  %v376_v11 = vld [vmem:[#allocation6 + $0xd0] sm:$0xff]  ;;  %p2449_p0 = scmp.ne.s32.totalorder %s3082_s10, %s2448_s6  ;;  %p3149_p3 = scmp.ne.s32.totalorder %s3138_s27, 0 }
  0x67   : > { %1979 = vmatprep.subr.mxu1 %v362_v4  ;;  %1924 = vmatpush3.msra.mxu0 %v380_v3  ;;  %v358_v12 = vld [vmem:[#allocation6 + $0x50] sm:$0xff]  ;;  %v375_v14 = vld [vmem:[#allocation6 + $0xc8] sm:$0xff]  ;;  %v374_v16 = vld [vmem:[#allocation6 + $0xc0] sm:$0xff]  ;;  %v278_v23 = vsub.s32 0, %v2729_v18  ;;  %v298_v30 = vsub.s32 1, %v2729_v18  ;;  %s2530_s22 = smov [#allocation11]  }
  0x68   : > { %1980 = vmatpush3.msra.mxu1 %v362_v4  ;;  %1925 = vmatprep.subr.mxu0 %v379_v5  ;;  %v357_v15 = vld [vmem:[#allocation6 + $0x48] sm:$0xff]  ;;  %v356_v17 = vld [vmem:[#allocation6 + $0x40] sm:$0xff]  ;;  %v373_v19 = vld [vmem:[#allocation6 + $0xb8] sm:$0xff]  ;;  %p2450_p4 = pnand %p2449_p0, %p3149_p3  ;;  %s2452_s5 = sshll.u32 %s2530_s22, 4  ;;  %s2453_s5 = int_to_ptr.vmem [resolvable:$false] %s2452_s5 }
  0x69   : > { %1981 = vmatprep.subr.mxu1 %v361_v6  ;;  %1926 = vmatpush3.msra.mxu0 %v379_v5  ;;  %v355_v20 = vld [vmem:[#allocation6 + $0x38] sm:$0xff]  ;;  %v372_v21 = vld [vmem:[#allocation6 + $0xb0] sm:$0xff]  ;;  %v2732_v24 = vld [vmem:[#allocation9] sm:$0xff]  ;;  %s2454_s8 = scalar_lea.vmem %s2453_s5, 4096  ;;  %p2455_p12 = scmp.lt.s32.totalorder %s3082_s10, %s2453_s5 }
  0x6a   : > { %1982 = vmatpush3.msra.mxu1 %v361_v6  ;;  %1927 = vmatprep.subr.mxu0 %v378_v7  ;;  %v354_v22 = vld [vmem:[#allocation6 + $0x30] sm:$0xff]  ;;  %v371_v25 = vld [vmem:[#allocation6 + $0xa8] sm:$0xff]  ;;  %v370_v27 = vld [vmem:[#allocation6 + $0xa0] sm:$0xff]  ;;  %v2735_v29 = vrot.slane %v2732_v24, %v278_v23  ;;  %v2742_v38 = vrot.slane %v2732_v24, %v298_v30  ;;  %p2451_p11 = pneg %p2450_p4  ;;  %p2456_p9 = scmp.lt.s32.totalorder %s2454_s8, %s2448_s6 }
  0x6b   : > { %1983 = vmatprep.subr.mxu1 %v360_v8  ;;  %1928 = vmatpush3.msra.mxu0 %v378_v7  ;;  %v353_v26 = vld [vmem:[#allocation6 + $0x28] sm:$0xff]  ;;  %v352_v28 = vld [vmem:[#allocation6 + $0x20] sm:$0xff]  ;;  %v369_v32 = vld [vmem:[#allocation6 + $0x98] sm:$0xff] }
  0x6c   : > { %1984 = vmatpush3.msra.mxu1 %v360_v8  ;;  %1929 = vmatprep.subr.mxu0 %v377_v9  ;;  %v260_v31 = vld [vmem:[%s2714_s14] sm:$0xff]  ;;  %v351_v33 = vld [vmem:[#allocation6 + $0x18] sm:$0xff]  ;;  %v261_v34 = vld [vmem:[%s2714_s14 + $0x8] sm:$0xff]  ;;  %p2457_p7 = por %p2456_p9, %p2455_p12 }
  0x6d   : > { %1985 = vmatprep.subr.mxu1 %v359_v10  ;;  %1930 = vmatpush3.msra.mxu0 %v377_v9  ;;  %v368_v35 = vld [vmem:[#allocation6 + $0x90] sm:$0xff]  ;;  %v280_v37 = vmul.f32 %v2735_v29, %v260_v31  ;;  %v281_v40 = vmul.f32 %v2735_v29, %v261_v34  ;;  %v367_v41 = vld [vmem:[#allocation6 + $0x88] sm:$0xff]  ;;  %v263_v44 = vld [vmem:[%s2714_s14 + $0x18] sm:$0xff] }
  0x6e   : > { %1986 = vmatpush3.msra.mxu1 %v359_v10  ;;  %1931 = vmatprep.subr.mxu0 %v376_v11  ;;  %v350_v36 = vld [vmem:[#allocation6 + $0x10] sm:$0xff]  ;;  %v349_v42 = vld [vmem:[#allocation6 + $0x8] sm:$0xff]  ;;  %v366_v45 = vld [vmem:[#allocation6 + $0x80] sm:$0xff]  ;;  %v283_v50 = vmul.f32 %v2735_v29, %v263_v44  ;;  %p2458_p10 = pnand %p2457_p7, %p2451_p11 }
  0x6f   : > { %1987 = vmatprep.subr.mxu1 %v358_v12  ;;  %1932 = vmatpush3.msra.mxu0 %v376_v11  ;;  %v262_v39 = vld [vmem:[%s2714_s14 + $0x10] sm:$0xff]  ;;  %v348_v46 = vld [vmem:[#allocation6] sm:$0xff]  ;;  %v300_v47 = vadd.f32 %v2742_v38, %v280_v37  ;;  %v2751_v49 = vadd.f32 %v2742_v38, %v281_v40  ;;  %v704_v51 = vld [vmem:[#allocation6 + $0x178] sm:$0xff] }
  0x70   : > { %1988 = vmatpush3.msra.mxu1 %v358_v12  ;;  %1933 = vmatprep.subr.mxu0 %v375_v14  ;;  %v282_v43 = vmul.f32 %v2735_v29, %v262_v39  ;;  %v264_v48 = vld [vmem:[%s2714_s14 + $0x20] sm:$0xff]  ;;  %v265_v54 = vld [vmem:[%s2714_s14 + $0x28] sm:$0xff]  ;;  %v703_v55 = vld [vmem:[#allocation6 + $0x170] sm:$0xff]  ;;  %v2762_v57 = vadd.f32 %v2742_v38, %v283_v50 }
  0x71   : > { %1989 = vmatprep.subr.mxu1 %v357_v15  ;;  %1934 = vmatpush3.msra.mxu0 %v375_v14  ;;  %v284_v53 = vmul.f32 %v2735_v29, %v264_v48  ;;  %v266_v56 = vld [vmem:[%s2714_s14 + $0x30] sm:$0xff]  ;;  %v285_v59 = vmul.f32 %v2735_v29, %v265_v54  ;;  %v702_v60 = vld [vmem:[#allocation6 + $0x168] sm:$0xff]  ;;  %v267_v62 = vld [vmem:[%s2714_s14 + $0x38] sm:$0xff] }
  0x72   : > { %1990 = vmatpush3.msra.mxu1 %v357_v15  ;;  %1935 = vmatprep.subr.mxu0 %v374_v16  ;;  %v2755_v52 = vadd.f32 %v2742_v38, %v282_v43  ;;  %v286_v61 = vmul.f32 %v2735_v29, %v266_v56  ;;  %v268_v63 = vld [vmem:[%s2714_s14 + $0x40] sm:$0xff]  ;;  %v287_v3 = vmul.f32 %v2735_v29, %v267_v62  ;;  %v700_v4 = vld [vmem:[#allocation6 + $0x158] sm:$0xff]  ;;  %v269_v7 = vld [vmem:[%s2714_s14 + $0x48] sm:$0xff] }
  0x73   : > { %1991 = vmatprep.subr.mxu1 %v356_v17  ;;  %1936 = vmatpush3.msra.mxu0 %v374_v16  ;;  %v2766_v58 = vadd.f32 %v2742_v38, %v284_v53  ;;  %v701_v1 = vld [vmem:[#allocation6 + $0x160] sm:$0xff]  ;;  %v2777_v2 = vadd.f32 %v2742_v38, %v285_v59  ;;  %v288_v6 = vmul.f32 %v2735_v29, %v268_v63  ;;  %v270_v8 = vld [vmem:[%s2714_s14 + $0x50] sm:$0xff]  ;;  %v698_v12 = vld [vmem:[#allocation6 + $0x148] sm:$0xff] }
  0x74   : > { %1992 = vmatpush3.msra.mxu1 %v356_v17  ;;  %1937 = vmatprep.subr.mxu0 %v373_v19  ;;  %v2782_v5 = vadd.f32 %v2742_v38, %v286_v61  ;;  %v699_v9 = vld [vmem:[#allocation6 + $0x150] sm:$0xff]  ;;  %v2790_v10 = vadd.f32 %v2742_v38, %v287_v3  ;;  %v289_v11 = vmul.f32 %v2735_v29, %v269_v7  ;;  %v271_v15 = vld [vmem:[%s2714_s14 + $0x58] sm:$0xff]  ;;  %v272_v16 = vld [vmem:[%s2714_s14 + $0x60] sm:$0xff] }
  0x75   : > { %1993 = vmatprep.subr.mxu1 %v355_v20  ;;  %1938 = vmatpush3.msra.mxu0 %v373_v19  ;;  %v2795_v13 = vadd.f32 %v2742_v38, %v288_v6  ;;  %v290_v14 = vmul.f32 %v2735_v29, %v270_v8  ;;  %v697_v17 = vld [vmem:[#allocation6 + $0x140] sm:$0xff]  ;;  %v292_v23 = vmul.f32 %v2735_v29, %v272_v16  ;;  %v694_v31 = vld [vmem:[#allocation6 + $0x128] sm:$0xff]  ;;  %v275_v34 = vld [vmem:[%s2714_s14 + $0x78] sm:$0xff] }
  0x76   : > { %1994 = vmatpush3.msra.mxu1 %v355_v20  ;;  %1939 = vmatprep.subr.mxu0 %v372_v21  ;;  %v2804_v19 = vadd.f32 %v2742_v38, %v289_v11  ;;  %v291_v20 = vmul.f32 %v2735_v29, %v271_v15  ;;  %v295_v37 = vmul.f32 %v2735_v29, %v275_v34  ;;  %v692_v39 = vld [vmem:[#allocation6 + $0x118] sm:$0xff]  ;;  %v690_v43 = vld [vmem:[#allocation6 + $0x108] sm:$0xff]  ;;  %v1020_v50 = vld [vmem:[#allocation8 + $0xe0] sm:$0xff] }
  0x77   : > { %1995 = vmatprep.subr.mxu1 %v354_v22  ;;  %1940 = vmatpush3.msra.mxu0 %v372_v21  ;;  %v696_v21 = vld [vmem:[#allocation6 + $0x138] sm:$0xff]  ;;  %v1021_v48 = vld [vmem:[#allocation8 + $0xe8] sm:$0xff]  ;;  %v1000_v53 = vld [vmem:[#allocation8 + $0x50] sm:$0xff] }
  0x78   : > { %1996 = vmatpush3.msra.mxu1 %v354_v22  ;;  %1941 = vmatprep.subr.mxu0 %v371_v25  ;;  %v310_v22 = vadd.f32 %v2742_v38, %v290_v14  ;;  %v1023_v44 = vld [vmem:[#allocation8 + $0xf8] sm:$0xff]  ;;  %v1018_v54 = vld [vmem:[#allocation8 + $0xd0] sm:$0xff]  ;;  %v1017_v56 = vld [vmem:[#allocation8 + $0xc8] sm:$0xff] }
  0x79   : > { %1997 = vmatprep.subr.mxu1 %v353_v26  ;;  %1942 = vmatpush3.msra.mxu0 %v371_v25  ;;  %v273_v25 = vld [vmem:[%s2714_s14 + $0x68] sm:$0xff]  ;;  %v997_v59 = vld [vmem:[#allocation8 + $0x38] sm:$0xff]  ;;  %v996_v61 = vld [vmem:[#allocation8 + $0x30] sm:$0xff] }
  0x7a   : > { %1998 = vmatpush3.msra.mxu1 %v353_v26  ;;  %1943 = vmatprep.subr.mxu0 %v370_v27  ;;  %v274_v26 = vld [vmem:[%s2714_s14 + $0x70] sm:$0xff]  ;;  %v293_v30 = vmul.f32 %v2735_v29, %v273_v25  ;;  %v995_v63 = vld [vmem:[#allocation8 + $0x28] sm:$0xff]  ;;  %v1012_v3 = vld [vmem:[#allocation8 + $0xa0] sm:$0xff] }
  0x7b   : > { %1999 = vmatprep.subr.mxu1 %v352_v28  ;;  %1944 = vmatpush3.msra.mxu0 %v370_v27  ;;  %v695_v27 = vld [vmem:[#allocation6 + $0x130] sm:$0xff]  ;;  %v991_v8 = vld [vmem:[#allocation8 + $0x8] sm:$0xff]  ;;  %v1008_v11 = vld [vmem:[#allocation8 + $0x80] sm:$0xff] }
  0x7c   : > { %2000 = vmatpush3.msra.mxu1 %v352_v28  ;;  %1945 = vmatprep.subr.mxu0 %v369_v32  ;;  %v311_v28 = vadd.f32 %v2742_v38, %v291_v20  ;;  %v1014_v62 = vld [vmem:[#allocation8 + $0xb0] sm:$0xff] }
  0x7d   : > { %2001 = vmatprep.subr.mxu1 %v351_v33  ;;  %1946 = vmatpush3.msra.mxu0 %v369_v32  ;;  %v312_v32 = vadd.f32 %v2742_v38, %v292_v23  ;;  %v992_v6 = vld [vmem:[#allocation8 + $0x10] sm:$0xff] }
  0x7e   : > { %2002 = vmatpush3.msra.mxu1 %v351_v33  ;;  %1947 = vmatprep.subr.mxu0 %v368_v35  ;;  %v294_v33 = vmul.f32 %v2735_v29, %v274_v26  ;;  %v689_v29 = vld [vmem:[#allocation6 + $0x100] sm:$0xff]  ;;  %v1010_v7 = vld [vmem:[#allocation8 + $0x90] sm:$0xff] }
  0x7f   : > { %2003 = vmatprep.subr.mxu1 %v350_v36  ;;  %1948 = vmatpush3.msra.mxu0 %v368_v35  ;;  %v693_v35 = vld [vmem:[#allocation6 + $0x120] sm:$0xff] }
  0x80   : > { %2004 = vmatpush3.msra.mxu1 %v350_v36  ;;  %1949 = vmatprep.subr.mxu0 %v367_v41  ;;  %v313_v36 = vadd.f32 %v2742_v38, %v293_v30  ;;  %v314_v40 = vadd.f32 %v2742_v38, %v294_v33 }
  0x81   : > { %2005 = vmatprep.subr.mxu1 %v349_v42  ;;  %1950 = vmatpush3.msra.mxu0 %v367_v41  ;;  %v691_v41 = vld [vmem:[#allocation6 + $0x110] sm:$0xff] }
  0x82   : > { %2006 = vmatpush3.msra.mxu1 %v349_v42  ;;  %1951 = vmatprep.subr.mxu0 %v366_v45  ;;  %v315_v42 = vadd.f32 %v2742_v38, %v295_v37  ;;  %v1005_v38 = vld [vmem:[#allocation8 + $0x78] sm:$0xff] }
  0x83   : > { %2007 = vmatprep.subr.mxu1 %v348_v46  ;;  %1952 = vmatpush3.msra.mxu0 %v366_v45  ;;  %v1004_v45 = vld [vmem:[#allocation8 + $0x70] sm:$0xff] }
  0x84   : > { %1953 = vmatprep.mubr.f32.mxu0 %v300_v47  ;;  %2008 = vmatpush3.msra.mxu1 %v348_v46  ;;  %v1022_v46 = vld [vmem:[#allocation8 + $0xf0] sm:$0xff] }
  0x85   : > { %1954 = vmatmul.mubr.f32.vlgmr.msra.gmra.mxu0 %v2751_v49  ;;  %2010 = vmatmul.mubr.f32.vlgmr.msra.gmra.mxu1 %v300_v47  ;;  %v1003_v47 = vld [vmem:[#allocation8 + $0x68] sm:$0xff] }
  0x86   : > { %2033 = vmatprep.subr.mxu0 %v704_v51  ;;  %1956 = vmatprep.mubr.f32.mxu0 %v2755_v52 }
  0x87   : > { %2034 = vmatpush3.msra.mxu0 %v704_v51  ;;  %2012 = vmatprep.mubr.f32.mxu1 %v2751_v49  ;;  %v1001_v51 = vld [vmem:[#allocation8 + $0x58] sm:$0xff] }
  0x88   : > { %2035 = vmatprep.subr.mxu0 %v703_v55  ;;  %2089 = vmatprep.subr.mxu1 %v1023_v44 }
  0x89   : > { %2036 = vmatpush3.msra.mxu0 %v703_v55  ;;  %2013 = vmatmul.mubr.f32.gmra.mxu1 %v2755_v52  ;;  %v999_v55 = vld [vmem:[#allocation8 + $0x48] sm:$0xff] }
  0x8a   : > { %1957 = vmatmul.mubr.f32.gmra.mxu0 %v2762_v57  ;;  %2037 = vmatprep.subr.mxu0 %v702_v60 }
  0x8b   : > { %1959 = vmatprep.mubr.f32.mxu0 %v2766_v58  ;;  %2038 = vmatpush3.msra.mxu0 %v702_v60  ;;  %v1015_v60 = vld [vmem:[#allocation8 + $0xb8] sm:$0xff] }
  0x8c   : > { %2015 = vmatprep.mubr.f32.mxu1 %v2762_v57  ;;  %2039 = vmatprep.subr.mxu0 %v701_v1 }
  0x8d   : > { %2040 = vmatpush3.msra.mxu0 %v701_v1  ;;  %2016 = vmatmul.mubr.f32.gmra.mxu1 %v2766_v58  ;;  %v1013_v1 = vld [vmem:[#allocation8 + $0xa8] sm:$0xff] }
  0x8e   : > { %1960 = vmatmul.mubr.f32.gmra.mxu0 %v2777_v2  ;;  %2041 = vmatprep.subr.mxu0 %v700_v4 }
  0x8f   : > { %2042 = vmatpush3.msra.mxu0 %v700_v4  ;;  %1962 = vmatprep.mubr.f32.mxu0 %v2782_v5  ;;  %v993_v4 = vld [vmem:[#allocation8 + $0x18] sm:$0xff] }
  0x90   : > { %2043 = vmatprep.subr.mxu0 %v699_v9  ;;  %2018 = vmatprep.mubr.f32.mxu1 %v2777_v2 }
  0x91   : > { %2044 = vmatpush3.msra.mxu0 %v699_v9  ;;  %2019 = vmatmul.mubr.f32.gmra.mxu1 %v2782_v5  ;;  %v1009_v9 = vld [vmem:[#allocation8 + $0x88] sm:$0xff] }
  0x92   : > { %1963 = vmatmul.mubr.f32.gmra.mxu0 %v2790_v10  ;;  %2045 = vmatprep.subr.mxu0 %v698_v12 }
  0x93   : > { %2046 = vmatpush3.msra.mxu0 %v698_v12  ;;  %1965 = vmatprep.mubr.f32.mxu0 %v2795_v13  ;;  %v2836_v12 = vld [vmem:[#allocation8 + $0x178] sm:$0xff] }
  0x94   : > { %2047 = vmatprep.subr.mxu0 %v697_v17  ;;  %2021 = vmatprep.mubr.f32.mxu1 %v2790_v10 }
  0x95   : > { %2048 = vmatpush3.msra.mxu0 %v697_v17  ;;  %2022 = vmatmul.mubr.f32.gmra.mxu1 %v2795_v13 }
  0x96   : > { %1966 = vmatmul.mubr.f32.gmra.mxu0 %v2804_v19  ;;  %2049 = vmatprep.subr.mxu0 %v696_v21 }
  0x97   : > { %2050 = vmatpush3.msra.mxu0 %v696_v21  ;;  %1968 = vmatprep.mubr.f32.mxu0 %v310_v22 }
  0x98   : > { %2051 = vmatprep.subr.mxu0 %v695_v27  ;;  %2024 = vmatprep.mubr.f32.mxu1 %v2804_v19 }
  0x99   : > { %2052 = vmatpush3.msra.mxu0 %v695_v27  ;;  %2025 = vmatmul.mubr.f32.gmra.mxu1 %v310_v22 }
  0x9a   : > { %1969 = vmatmul.mubr.f32.gmra.mxu0 %v311_v28  ;;  %2053 = vmatprep.subr.mxu0 %v694_v31 }
  0x9b   : > { %2054 = vmatpush3.msra.mxu0 %v694_v31  ;;  %1971 = vmatprep.mubr.f32.mxu0 %v312_v32 }
  0x9c   : > { %2055 = vmatprep.subr.mxu0 %v693_v35  ;;  %2027 = vmatprep.mubr.f32.mxu1 %v311_v28 }
  0x9d   : > { %2056 = vmatpush3.msra.mxu0 %v693_v35  ;;  %2028 = vmatmul.mubr.f32.gmra.mxu1 %v312_v32 }
  0x9e   : > { %1972 = vmatmul.mubr.f32.gmra.mxu0 %v313_v36  ;;  %2057 = vmatprep.subr.mxu0 %v692_v39 }
  0x9f   : > { %2058 = vmatpush3.msra.mxu0 %v692_v39  ;;  %1974 = vmatprep.mubr.f32.mxu0 %v314_v40  ;;  %v868_v39 = vsub.s32 2, %v2729_v18 }
  0xa0   : > { %2059 = vmatprep.subr.mxu0 %v691_v41  ;;  %2030 = vmatprep.mubr.f32.mxu1 %v313_v36 }
  0xa1   : > { %2060 = vmatpush3.msra.mxu0 %v691_v41  ;;  %2031 = vmatmul.mubr.f32.gmra.mxu1 %v314_v40 }
  0xa2   : > { %1975 = vmatmul.mubr.f32.gmra.mxu0 %v315_v42  ;;  %2061 = vmatprep.subr.mxu0 %v690_v43 }
  0xa3   : > { %2062 = vmatpush3.msra.mxu0 %v690_v43  ;;  %2065 = vmatprep.mubr.f32.mxu0 %v2751_v49  ;;  %v1002_v49 = vld [vmem:[#allocation8 + $0x60] sm:$0xff] }
  0xa4   : > { %2063 = vmatprep.subr.mxu0 %v689_v29  ;;  %2090 = vmatpush3.msra.mxu1 %v1023_v44 }
  0xa5   : > { %2064 = vmatpush3.msra.mxu0 %v689_v29  ;;  %2091 = vmatprep.subr.mxu1 %v1022_v46 }
  0xa6   : > { %2066 = vmatmul.mubr.f32.vlgmr.msra.gmra.mxu0 %v2755_v52  ;;  %2145 = vmatprep.subr.mxu0 %v1005_v38  ;;  %v1019_v52 = vld [vmem:[#allocation8 + $0xd8] sm:$0xff] }
  0xa7   : > { %2068 = vmatprep.mubr.f32.mxu0 %v2762_v57  ;;  %2146 = vmatpush3.msra.mxu0 %v1005_v38  ;;  %v998_v57 = vld [vmem:[#allocation8 + $0x40] sm:$0xff]  ;;  %v2858_v38 = vrot.slane %v2732_v24, %v868_v39 }
  0xa8   : > { %2147 = vmatprep.subr.mxu0 %v1004_v45  ;;  %2092 = vmatpush3.msra.mxu1 %v1022_v46 }
  0xa9   : > { %2148 = vmatpush3.msra.mxu0 %v1004_v45  ;;  %2093 = vmatprep.subr.mxu1 %v1021_v48  ;;  %v924_v45 = vsub.s32 4, %v2729_v18 }
  0xaa   : > { %2069 = vmatmul.mubr.f32.gmra.mxu0 %v2766_v58  ;;  %2149 = vmatprep.subr.mxu0 %v1003_v47  ;;  %v1016_v58 = vld [vmem:[#allocation8 + $0xc0] sm:$0xff] }
  0xab   : > { %2071 = vmatprep.mubr.f32.mxu0 %v2777_v2  ;;  %2150 = vmatpush3.msra.mxu0 %v1003_v47  ;;  %v994_v2 = vld [vmem:[#allocation8 + $0x20] sm:$0xff] }
  0xac   : > { %2094 = vmatpush3.msra.mxu1 %v1021_v48  ;;  %2151 = vmatprep.subr.mxu0 %v1002_v49 }
  0xad   : > { %2095 = vmatprep.subr.mxu1 %v1020_v50  ;;  %2152 = vmatpush3.msra.mxu0 %v1002_v49 }
  0xae   : > { %2072 = vmatmul.mubr.f32.gmra.mxu0 %v2782_v5  ;;  %2096 = vmatpush3.msra.mxu1 %v1020_v50  ;;  %v1011_v5 = vld [vmem:[#allocation8 + $0x98] sm:$0xff] }
  0xaf   : > { %2074 = vmatprep.mubr.f32.mxu0 %v2790_v10  ;;  %2153 = vmatprep.subr.mxu0 %v1001_v51  ;;  %v990_v10 = vld [vmem:[#allocation8] sm:$0xff] }
  0xb0   : > { %2097 = vmatprep.subr.mxu1 %v1019_v52  ;;  %2154 = vmatpush3.msra.mxu0 %v1001_v51 }
  0xb1   : > { %2098 = vmatpush3.msra.mxu1 %v1019_v52  ;;  %2155 = vmatprep.subr.mxu0 %v1000_v53 }
  0xb2   : > { %2075 = vmatmul.mubr.f32.gmra.mxu0 %v2795_v13  ;;  %2099 = vmatprep.subr.mxu1 %v1018_v54 }
  0xb3   : > { %2077 = vmatprep.mubr.f32.mxu0 %v2804_v19  ;;  %2156 = vmatpush3.msra.mxu0 %v1000_v53 }
  0xb4   : > { %2100 = vmatpush3.msra.mxu1 %v1018_v54  ;;  %2157 = vmatprep.subr.mxu0 %v999_v55  ;;  %v2866_v54 = vrot.slane %v2732_v24, %v924_v45 }
  0xb5   : > { %2101 = vmatprep.subr.mxu1 %v1017_v56  ;;  %2158 = vmatpush3.msra.mxu0 %v999_v55 }
  0xb6   : > { %2078 = vmatmul.mubr.f32.gmra.mxu0 %v310_v22  ;;  %2102 = vmatpush3.msra.mxu1 %v1017_v56 }
  0xb7   : > { %2080 = vmatprep.mubr.f32.mxu0 %v311_v28  ;;  %2159 = vmatprep.subr.mxu0 %v998_v57 }
  0xb8   : > { %2103 = vmatprep.subr.mxu1 %v1016_v58  ;;  %2160 = vmatpush3.msra.mxu0 %v998_v57 }
  0xb9   : > { %2104 = vmatpush3.msra.mxu1 %v1016_v58  ;;  %2161 = vmatprep.subr.mxu0 %v997_v59 }
  0xba   : > { %2081 = vmatmul.mubr.f32.gmra.mxu0 %v312_v32  ;;  %2105 = vmatprep.subr.mxu1 %v1015_v60 }
  0xbb   : > { %2083 = vmatprep.mubr.f32.mxu0 %v313_v36  ;;  %2162 = vmatpush3.msra.mxu0 %v997_v59 }
  0xbc   : > { %2106 = vmatpush3.msra.mxu1 %v1015_v60  ;;  %2163 = vmatprep.subr.mxu0 %v996_v61 }
  0xbd   : > { %2107 = vmatprep.subr.mxu1 %v1014_v62  ;;  %2164 = vmatpush3.msra.mxu0 %v996_v61 }
  0xbe   : > { %2084 = vmatmul.mubr.f32.gmra.mxu0 %v314_v40  ;;  %2108 = vmatpush3.msra.mxu1 %v1014_v62 }
  0xbf   : > { %2086 = vmatprep.mubr.f32.mxu0 %v315_v42  ;;  %2165 = vmatprep.subr.mxu0 %v995_v63  ;;  %v888_v42 = vsub.s32 3, %v2729_v18 }
  0xc0   : > { %2109 = vmatprep.subr.mxu1 %v1013_v1  ;;  %2166 = vmatpush3.msra.mxu0 %v995_v63 }
  0xc1   : > { %2110 = vmatpush3.msra.mxu1 %v1013_v1  ;;  %2167 = vmatprep.subr.mxu0 %v994_v2  ;;  %v2862_v49 = vrot.slane %v2732_v24, %v888_v42 }
  0xc2   : > { %2087 = vmatmul.mubr.f32.gmra.mxu0 %v2529_v0  ;;  %2111 = vmatprep.subr.mxu1 %v1012_v3 }
  0xc3   : > { %2177 = vmatprep.mubr.f32.mxu0 %v2529_v0  ;;  %2168 = vmatpush3.msra.mxu0 %v994_v2 }
  0xc4   : > { %2112 = vmatpush3.msra.mxu1 %v1012_v3  ;;  %2169 = vmatprep.subr.mxu0 %v993_v4 }
  0xc5   : > { %2113 = vmatprep.subr.mxu1 %v1011_v5  ;;  %2170 = vmatpush3.msra.mxu0 %v993_v4 }
  0xc6   : > { %2114 = vmatpush3.msra.mxu1 %v1011_v5  ;;  %2171 = vmatprep.subr.mxu0 %v992_v6 }
  0xc7   : > { %2115 = vmatprep.subr.mxu1 %v1010_v7  ;;  %2172 = vmatpush3.msra.mxu0 %v992_v6 }
  0xc8   : > { %2116 = vmatpush3.msra.mxu1 %v1010_v7  ;;  %2173 = vmatprep.subr.mxu0 %v991_v8 }
  0xc9   : > { %2117 = vmatprep.subr.mxu1 %v1009_v9  ;;  %2174 = vmatpush3.msra.mxu0 %v991_v8 }
  0xca   : > { %2118 = vmatpush3.msra.mxu1 %v1009_v9  ;;  %2175 = vmatprep.subr.mxu0 %v990_v10 }
  0xcb   : > { %2119 = vmatprep.subr.mxu1 %v1008_v11  ;;  %2176 = vmatpush3.msra.mxu0 %v990_v10 }
  0xcc   : > { %2120 = vmatpush3.msra.mxu1 %v1008_v11 }
  0xcd   : > { %2201 = vmatprep.subr.mxu1 %v2836_v12 }
 0x145   : > { %v1955_v13 = vpop.f32.mrf.mxu0  ;;  %v2011_v14 = vpop.f32.mrf.mxu1 }
 0x146   : > { %v599_v29 = vadd.f32 %v2011_v14, %v1955_v13 }
 0x147   : > { %v448_v15 = vpop.f32.mrf.mxu0  ;;  %v593_v16 = vpop.f32.mrf.mxu1 }
 0x148   : > { %v594_v46 = vadd.f32 %v593_v16, %v448_v15 }
 0x149   : > { %v2014_v19 = vpop.f32.mrf.mxu1 }
 0x14a   : > { %v1958_v17 = vpop.f32.mrf.mxu0 }
 0x14b   : > { %v603_v22 = vpop.f32.mrf.mxu1  ;;  %v609_v51 = vadd.f32 %v2014_v19, %v1958_v17 }
 0x14c   : > { %v458_v20 = vpop.f32.mrf.mxu0 }
 0x14d   : > { %v2017_v26 = vpop.f32.mrf.mxu1  ;;  %v604_v56 = vadd.f32 %v603_v22, %v458_v20 }
 0x14e   : > { %v1961_v21 = vpop.f32.mrf.mxu0 }
 0x14f   : > { %v613_v30 = vpop.f32.mrf.mxu1  ;;  %v619_v62 = vadd.f32 %v2017_v26, %v1961_v21  ;;  %v1345_v26 = vld [vmem:[#allocation8 + $0x170] sm:$0xff] }
 0x150   : > { %v468_v23 = vpop.f32.mrf.mxu0 }
 0x151   : > { %v2020_v33 = vpop.f32.mrf.mxu1  ;;  %v614_v3 = vadd.f32 %v613_v30, %v468_v23 }
 0x152   : > { %v1964_v25 = vpop.f32.mrf.mxu0 }
 0x153   : > { %v623_v36 = vpop.f32.mrf.mxu1  ;;  %v629_v11 = vadd.f32 %v2020_v33, %v1964_v25 }
 0x154   : > { %v478_v27 = vpop.f32.mrf.mxu0 }
 0x155   : > { %v2023_v41 = vpop.f32.mrf.mxu1  ;;  %v624_v16 = vadd.f32 %v623_v36, %v478_v27 }
 0x156   : > { %v2839_v28 = vpop.f32.mrf.mxu0 }
 0x157   : > { %v633_v47 = vpop.f32.mrf.mxu1  ;;  %v639_v36 = vadd.f32 %v2023_v41, %v2839_v28 }
 0x158   : > { %v2841_v31 = vpop.f32.mrf.mxu0 }
 0x159   : > { %v2026_v57 = vpop.f32.mrf.mxu1 }
 0x15a   : > { %v2843_v32 = vpop.f32.mrf.mxu0 }
 0x15b   : > { %v643_v5 = vpop.f32.mrf.mxu1  ;;  %v649_v45 = vadd.f32 %v2026_v57, %v2843_v32 }
 0x15c   : > { %v2845_v34 = vpop.f32.mrf.mxu0 }
 0x15d   : > { %v2029_v21 = vpop.f32.mrf.mxu1 }
 0x15e   : > { %v2847_v35 = vpop.f32.mrf.mxu0 }
 0x160   : > { %v2849_v37 = vpop.f32.mrf.mxu0 }
 0x162   : > { %v2852_v40 = vpop.f32.mrf.mxu0 }
 0x164   : > { %v2855_v43 = vpop.f32.mrf.mxu0 }
 0x166   : > { %v2067_v44 = vpop.f32.mrf.mxu0 }
 0x167   : > { %v851_v48 = vadd.f32 %v2067_v44, %v599_v29  ;;  %v634_v44 = vadd.f32 %v633_v47, %v2841_v31  ;;  %v1343_v47 = vld [vmem:[#allocation8 + $0x160] sm:$0xff] }
 0x168   : > { %v771_v50 = vpop.f32.mrf.mxu0 }
 0x169   : > { %v871_v52 = vmul.f32 %v2858_v38, %v851_v48  ;;  %v850_v53 = vadd.f32 %v771_v50, %v594_v46  ;;  %v1344_v50 = vld [vmem:[#allocation8 + $0x168] sm:$0xff] }
 0x16a   : > { %v2070_v55 = vpop.f32.mrf.mxu0 }
 0x16b   : > { %v891_v58 = vadd.f32 %v2862_v49, %v871_v52  ;;  %v870_v59 = vmul.f32 %v2858_v38, %v850_v53  ;;  %v853_v60 = vadd.f32 %v2070_v55, %v609_v51  ;;  %v653_v51 = vpop.f32.mrf.mxu1 }
 0x16c   : > { %v781_v61 = vpop.f32.mrf.mxu0 }
 0x16d   : > { %v890_v63 = vadd.f32 %v2862_v49, %v870_v59  ;;  %v873_v1 = vmul.f32 %v2858_v38, %v853_v60  ;;  %v852_v2 = vadd.f32 %v781_v61, %v604_v56  ;;  %v927_v4 = vmul.f32 %v2866_v54, %v891_v58 }
 0x16e   : > { %v2073_v24 = vpop.f32.mrf.mxu0  ;;  %vm907_vm0 = vcmp.ge.f32.partialorder %v891_v58, 0.0  ;;  %v659_v59 = vadd.f32 %v2029_v21, %v2847_v35 }
 0x16f   : > { %v893_v6 = vadd.f32 %v2862_v49, %v873_v1  ;;  %v872_v7 = vmul.f32 %v2858_v38, %v852_v2  ;;  %v855_v8 = vadd.f32 %v2073_v24, %v619_v62  ;;  %vm906_vm1 = vcmp.ge.f32.partialorder %v890_v63, 0.0  ;;  %v2032_v62 = vpop.f32.mrf.mxu1 }
 0x170   : > { %v791_v9 = vpop.f32.mrf.mxu0  ;;  %v926_v10 = vmul.f32 %v2866_v54, %v890_v63  ;;  %v2878_v20 = vsel %vm907_vm0, %v891_v58, %v927_v4  ;;  %v644_v58 = vadd.f32 %v643_v5, %v2845_v34 }
 0x171   : > { %v892_v13 = vadd.f32 %v2862_v49, %v872_v7  ;;  %v875_v14 = vmul.f32 %v2858_v38, %v855_v8  ;;  %v854_v15 = vadd.f32 %v791_v9, %v614_v3  ;;  %v929_v25 = vmul.f32 %v2866_v54, %v893_v6  ;;  %v1342_v3 = vld [vmem:[#allocation8 + $0x158] sm:$0xff]  ;;  %v1341_v8 = vld [vmem:[#allocation8 + $0x150] sm:$0xff] }
 0x172   : > { %v2076_v17 = vpop.f32.mrf.mxu0  ;;  %v942_v19 = vsel %vm906_vm1, %v890_v63, %v926_v10  ;;  %vm909_vm3 = vcmp.ge.f32.partialorder %v893_v6, 0.0  ;;  %v654_v9 = vadd.f32 %v653_v51, %v2849_v37  ;;  %v669_v10 = vadd.f32 %v2032_v62, %v2852_v40 }
 0x173   : > { %v874_v22 = vmul.f32 %v2858_v38, %v854_v15  ;;  %v857_v23 = vadd.f32 %v2076_v17, %v629_v11  ;;  %2121 = vmatprep.mubr.f32.mxu1 %v942_v19  ;;  %2178 = vmatmul.mubr.f32.vlgmr.msra.gmra.mxu0 %v942_v19  ;;  %vm908_vm2 = vcmp.ge.f32.partialorder %v892_v13, 0.0  ;;  %v895_v30 = vadd.f32 %v2862_v49, %v875_v14  ;;  %v663_v14 = vpop.f32.mrf.mxu1  ;;  %v1340_v17 = vld [vmem:[#allocation8 + $0x148] sm:$0xff] }
 0x174   : > { %2122 = vmatmul.mubr.f32.vlgmr.msra.gmra.mxu1 %v2878_v20  ;;  %2180 = vmatprep.mubr.f32.mxu0 %v2878_v20  ;;  %v801_v27 = vpop.f32.mrf.mxu0  ;;  %v928_v33 = vmul.f32 %v2866_v54, %v892_v13 }
 0x175   : > { %v894_v39 = vadd.f32 %v2862_v49, %v874_v22  ;;  %v877_v42 = vmul.f32 %v2858_v38, %v857_v23  ;;  %v856_v29 = vadd.f32 %v801_v27, %v624_v16  ;;  %2202 = vmatpush3.msra.mxu1 %v2836_v12  ;;  %v2899_v12 = vsel %vm909_vm3, %v893_v6, %v929_v25 }
 0x176   : > { %2203 = vmatprep.subr.mxu1 %v1345_v26  ;;  %v2079_v46 = vpop.f32.mrf.mxu0  ;;  %v2893_v48 = vsel %vm908_vm2, %v892_v13, %v928_v33  ;;  %v931_v53 = vmul.f32 %v2866_v54, %v895_v30  ;;  %vm911_vm5 = vcmp.ge.f32.partialorder %v895_v30, 0.0  ;;  %v664_v27 = vadd.f32 %v663_v14, %v2855_v43 }
 0x177   : > { %v876_v28 = vmul.f32 %v2858_v38, %v856_v29  ;;  %v859_v41 = vadd.f32 %v2079_v46, %v639_v36  ;;  %2124 = vmatprep.mubr.f32.mxu1 %v2893_v48  ;;  %2181 = vmatmul.mubr.f32.gmra.mxu0 %v2893_v48  ;;  %vm910_vm4 = vcmp.ge.f32.partialorder %v894_v39, 0.0  ;;  %v897_v31 = vadd.f32 %v2862_v49, %v877_v42 }
 0x178   : > { %2204 = vmatpush3.msra.mxu1 %v1345_v26  ;;  %2183 = vmatprep.mubr.f32.mxu0 %v2899_v12  ;;  %v811_v32 = vpop.f32.mrf.mxu0  ;;  %v930_v52 = vmul.f32 %v2866_v54, %v894_v39  ;;  %v2918_v34 = vsel %vm911_vm5, %v895_v30, %v931_v53  ;;  %v1339_v30 = vld [vmem:[#allocation8 + $0x140] sm:$0xff] }
 0x179   : > { %v896_v55 = vadd.f32 %v2862_v49, %v876_v28  ;;  %v879_v56 = vmul.f32 %v2858_v38, %v859_v41  ;;  %2125 = vmatmul.mubr.f32.gmra.mxu1 %v2899_v12  ;;  %2205 = vmatprep.subr.mxu1 %v1344_v50  ;;  %v858_v57 = vadd.f32 %v811_v32, %v634_v44  ;;  %vm913_vm7 = vcmp.ge.f32.partialorder %v897_v31, 0.0  ;;  %v1338_v44 = vld [vmem:[#allocation8 + $0x138] sm:$0xff] }
 0x17a   : > { %2206 = vmatpush3.msra.mxu1 %v1344_v50  ;;  %v2082_v60 = vpop.f32.mrf.mxu0  ;;  %v2911_v61 = vsel %vm910_vm4, %v894_v39, %v930_v52  ;;  %v933_v24 = vmul.f32 %v2866_v54, %v897_v31  ;;  %v1336_v52 = vld [vmem:[#allocation8 + $0x128] sm:$0xff] }
 0x17b   : > { %v899_v63 = vadd.f32 %v2862_v49, %v879_v56  ;;  %v878_v1 = vmul.f32 %v2858_v38, %v858_v57  ;;  %2207 = vmatprep.subr.mxu1 %v1343_v47  ;;  %v861_v2 = vadd.f32 %v2082_v60, %v649_v45  ;;  %2127 = vmatprep.mubr.f32.mxu1 %v2911_v61  ;;  %vm912_vm6 = vcmp.ge.f32.partialorder %v896_v55, 0.0 }
 0x17c   : > { %2184 = vmatmul.mubr.f32.gmra.mxu0 %v2911_v61  ;;  %2208 = vmatpush3.msra.mxu1 %v1343_v47  ;;  %v821_v35 = vpop.f32.mrf.mxu0  ;;  %v932_v4 = vmul.f32 %v2866_v54, %v896_v55  ;;  %v2937_v40 = vsel %vm913_vm7, %v897_v31, %v933_v24  ;;  %v1337_v31 = vld [vmem:[#allocation8 + $0x130] sm:$0xff] }
 0x17d   : > { %v898_v5 = vadd.f32 %v2862_v49, %v878_v1  ;;  %v881_v6 = vmul.f32 %v2858_v38, %v861_v2  ;;  %2128 = vmatmul.mubr.f32.gmra.mxu1 %v2918_v34  ;;  %2186 = vmatprep.mubr.f32.mxu0 %v2918_v34  ;;  %v860_v7 = vadd.f32 %v821_v35, %v644_v58  ;;  %vm915_vm9 = vcmp.ge.f32.partialorder %v899_v63, 0.0  ;;  %v1333_v1 = vld [vmem:[#allocation8 + $0x110] sm:$0xff] }
 0x17e   : > { %2209 = vmatprep.subr.mxu1 %v1342_v3  ;;  %v2085_v11 = vpop.f32.mrf.mxu0  ;;  %v2929_v13 = vsel %vm912_vm6, %v896_v55, %v932_v4  ;;  %v935_v19 = vmul.f32 %v2866_v54, %v899_v63  ;;  %v1331_v4 = vld [vmem:[#allocation8 + $0x100] sm:$0xff] }
 0x17f   : > { %v880_v15 = vmul.f32 %v2858_v38, %v860_v7  ;;  %2210 = vmatpush3.msra.mxu1 %v1342_v3  ;;  %v863_v16 = vadd.f32 %v2085_v11, %v659_v59  ;;  %2130 = vmatprep.mubr.f32.mxu1 %v2929_v13  ;;  %vm914_vm8 = vcmp.ge.f32.partialorder %v898_v5, 0.0  ;;  %v901_v37 = vadd.f32 %v2862_v49, %v881_v6  ;;  %v1335_v59 = vld [vmem:[#allocation8 + $0x120] sm:$0xff]  ;;  %v1332_v3 = vld [vmem:[#allocation8 + $0x108] sm:$0xff] }
 0x180   : > { %2211 = vmatprep.subr.mxu1 %v1341_v8  ;;  %2187 = vmatmul.mubr.f32.gmra.mxu0 %v2929_v13  ;;  %v831_v21 = vpop.f32.mrf.mxu0  ;;  %v934_v22 = vmul.f32 %v2866_v54, %v898_v5  ;;  %v2951_v29 = vsel %vm915_vm9, %v899_v63, %v935_v19 }
 0x181   : > { %v900_v23 = vadd.f32 %v2862_v49, %v880_v15  ;;  %v883_v26 = vmul.f32 %v2858_v38, %v863_v16  ;;  %2212 = vmatpush3.msra.mxu1 %v1341_v8  ;;  %2189 = vmatprep.mubr.f32.mxu0 %v2937_v40  ;;  %v862_v25 = vadd.f32 %v831_v21, %v654_v9  ;;  %vm917_vm11 = vcmp.ge.f32.partialorder %v901_v37, 0.0 }
 0x182   : > { %2131 = vmatmul.mubr.f32.gmra.mxu1 %v2937_v40  ;;  %2213 = vmatprep.subr.mxu1 %v1340_v17  ;;  %v2088_v33 = vpop.f32.mrf.mxu0  ;;  %v2946_v36 = vsel %vm914_vm8, %v898_v5, %v934_v22  ;;  %v937_v50 = vmul.f32 %v2866_v54, %v901_v37 }
 0x183   : > { %v882_v39 = vmul.f32 %v2858_v38, %v862_v25  ;;  %2214 = vmatpush3.msra.mxu1 %v1340_v17  ;;  %v865_v42 = vadd.f32 %v2088_v33, %v669_v10  ;;  %2133 = vmatprep.mubr.f32.mxu1 %v2946_v36  ;;  %vm916_vm10 = vcmp.ge.f32.partialorder %v900_v23, 0.0  ;;  %v903_v43 = vadd.f32 %v2862_v49, %v883_v26 }
 0x184   : > { %2215 = vmatprep.subr.mxu1 %v1339_v30  ;;  %2190 = vmatmul.mubr.f32.gmra.mxu0 %v2946_v36  ;;  %v841_v45 = vpop.f32.mrf.mxu0  ;;  %v936_v46 = vmul.f32 %v2866_v54, %v900_v23  ;;  %v953_v55 = vsel %vm917_vm11, %v901_v37, %v937_v50 }
 0x185   : > { %v902_v51 = vadd.f32 %v2862_v49, %v882_v39  ;;  %v885_v28 = vmul.f32 %v2858_v38, %v865_v42  ;;  %2216 = vmatpush3.msra.mxu1 %v1339_v30  ;;  %2192 = vmatprep.mubr.f32.mxu0 %v2951_v29  ;;  %v864_v41 = vadd.f32 %v841_v45, %v664_v27  ;;  %vm919_vm13 = vcmp.ge.f32.partialorder %v903_v43, 0.0  ;;  %v2341_v30 = vld [vmem:[#allocation9] sm:$0xff] }
 0x186   : > { %2134 = vmatmul.mubr.f32.gmra.mxu1 %v2951_v29  ;;  %2217 = vmatprep.subr.mxu1 %v1338_v44  ;;  %v952_v32 = vsel %vm916_vm10, %v900_v23, %v936_v46  ;;  %v939_v56 = vmul.f32 %v2866_v54, %v903_v43  ;;  %v1530_v23 = vsub.s32 6, %v2729_v18 }
 0x187   : > { %v884_v47 = vmul.f32 %v2858_v38, %v864_v41  ;;  %2218 = vmatpush3.msra.mxu1 %v1338_v44  ;;  %2136 = vmatprep.mubr.f32.mxu1 %v952_v32  ;;  %vm918_vm12 = vcmp.ge.f32.partialorder %v902_v51, 0.0  ;;  %v938_v53 = vmul.f32 %v2866_v54, %v902_v51  ;;  %v905_v57 = vadd.f32 %v2862_v49, %v885_v28  ;;  %v1334_v38 = vld [vmem:[#allocation8 + $0x118] sm:$0xff] }
 0x188   : > { %2219 = vmatprep.subr.mxu1 %v1337_v31  ;;  %2193 = vmatmul.mubr.f32.gmra.mxu0 %v952_v32  ;;  %v955_v63 = vsel %vm919_vm13, %v903_v43, %v939_v56 }
 0x189   : > { %v904_v58 = vadd.f32 %v2862_v49, %v884_v47  ;;  %2220 = vmatpush3.msra.mxu1 %v1337_v31  ;;  %2195 = vmatprep.mubr.f32.mxu0 %v953_v55  ;;  %v954_v60 = vsel %vm918_vm12, %v902_v51, %v938_v53  ;;  %v941_v2 = vmul.f32 %v2866_v54, %v905_v57  ;;  %vm921_vm15 = vcmp.ge.f32.partialorder %v905_v57, 0.0 }
 0x18a   : > { %2137 = vmatmul.mubr.f32.gmra.mxu1 %v953_v55  ;;  %2221 = vmatprep.subr.mxu1 %v1336_v52 }
 0x18b   : > { %2222 = vmatpush3.msra.mxu1 %v1336_v52  ;;  %2139 = vmatprep.mubr.f32.mxu1 %v954_v60  ;;  %vm920_vm14 = vcmp.ge.f32.partialorder %v904_v58, 0.0  ;;  %v940_v62 = vmul.f32 %v2866_v54, %v904_v58  ;;  %v957_v35 = vsel %vm921_vm15, %v905_v57, %v941_v2  ;;  %v1548_v52 = vld [vmem:[%s2714_s14] sm:$0xff] }
 0x18c   : > { %2223 = vmatprep.subr.mxu1 %v1335_v59  ;;  %2196 = vmatmul.mubr.f32.gmra.mxu0 %v954_v60 }
 0x18d   : > { %2224 = vmatpush3.msra.mxu1 %v1335_v59  ;;  %2198 = vmatprep.mubr.f32.mxu0 %v955_v63  ;;  %v956_v49 = vsel %vm920_vm14, %v904_v58, %v940_v62 }
 0x18e   : > { %2140 = vmatmul.mubr.f32.gmra.mxu1 %v955_v63  ;;  %2225 = vmatprep.subr.mxu1 %v1334_v38 }
 0x18f   : > { %2226 = vmatpush3.msra.mxu1 %v1334_v38  ;;  %2142 = vmatprep.mubr.f32.mxu1 %v956_v49 }
 0x190   : > { %2227 = vmatprep.subr.mxu1 %v1333_v1  ;;  %2199 = vmatmul.mubr.f32.gmra.mxu0 %v956_v49 }
 0x191   : > { %2228 = vmatpush3.msra.mxu1 %v1333_v1 }
 0x192   : > { %2143 = vmatmul.mubr.f32.gmra.mxu1 %v957_v35  ;;  %2229 = vmatprep.subr.mxu1 %v1332_v3 }
 0x193   : > { %2230 = vmatpush3.msra.mxu1 %v1332_v3  ;;  %2233 = vmatprep.mubr.f32.mxu1 %v2878_v20 }
 0x194   : > { %2231 = vmatprep.subr.mxu1 %v1331_v4 }
 0x195   : > { %2232 = vmatpush3.msra.mxu1 %v1331_v4 }
 0x196   : > { %2234 = vmatmul.mubr.f32.vlgmr.msra.gmra.mxu1 %v2893_v48 }
 0x197   : > { %2236 = vmatprep.mubr.f32.mxu1 %v2899_v12 }
 0x19a   : > { %2237 = vmatmul.mubr.f32.gmra.mxu1 %v2911_v61 }
 0x19b   : > { %2239 = vmatprep.mubr.f32.mxu1 %v2918_v34 }
 0x19e   : > { %2240 = vmatmul.mubr.f32.gmra.mxu1 %v2929_v13 }
 0x19f   : > { %2242 = vmatprep.mubr.f32.mxu1 %v2937_v40  ;;  %v1510_v40 = vsub.s32 5, %v2729_v18  ;;  %v1549_v18 = vld [vmem:[%s2714_s14 + $0x8] sm:$0xff] }
 0x1a1   : > { %v2997_v27 = vrot.slane %v2341_v30, %v1510_v40 }
 0x1a2   : > { %2243 = vmatmul.mubr.f32.gmra.mxu1 %v2946_v36 }
 0x1a3   : > { %2245 = vmatprep.mubr.f32.mxu1 %v2951_v29  ;;  %v2999_v29 = vrot.slane %v2341_v30, %v1530_v23 }
 0x1a6   : > { %2246 = vmatmul.mubr.f32.gmra.mxu1 %v952_v32 }
 0x1a7   : > { %2248 = vmatprep.mubr.f32.mxu1 %v953_v55 }
 0x1aa   : > { %2249 = vmatmul.mubr.f32.gmra.mxu1 %v954_v60  ;;  %v1551_v60 = vld [vmem:[%s2714_s14 + $0x18] sm:$0xff] }
 0x1ab   : > { %2251 = vmatprep.mubr.f32.mxu1 %v955_v63 }
 0x1ae   : > { %2252 = vmatmul.mubr.f32.gmra.mxu1 %v956_v49 }
 0x1af   : > { %2254 = vmatprep.mubr.f32.mxu1 %v957_v35  ;;  %v1550_v35 = vld [vmem:[%s2714_s14 + $0x10] sm:$0xff] }
 0x1b2   : > { %2255 = vmatmul.mubr.f32.gmra.mxu1 %v2529_v0 }
 0x233   : > { %v2179_v54 = vpop.f32.mrf.mxu0 }
 0x234   : > { %v2123_v20 = vpop.f32.mrf.mxu1 }
 0x235   : > { %v1235_v12 = vpop.f32.mrf.mxu0  ;;  %v1241_v25 = vadd.f32 %v2179_v54, %v2123_v20 }
 0x236   : > { %v1090_v48 = vpop.f32.mrf.mxu1 }
 0x237   : > { %v2182_v34 = vpop.f32.mrf.mxu0  ;;  %v1236_v36 = vadd.f32 %v1235_v12, %v1090_v48 }
 0x239   : > { %v2126_v61 = vpop.f32.mrf.mxu1  ;;  %v1245_v6 = vpop.f32.mrf.mxu0 }
 0x23a   : > { %v1251_v43 = vadd.f32 %v2182_v34, %v2126_v61  ;;  %v1553_v34 = vld [vmem:[%s2714_s14 + $0x28] sm:$0xff] }
 0x23b   : > { %v1100_v24 = vpop.f32.mrf.mxu1 }
 0x23c   : > { %v2185_v9 = vpop.f32.mrf.mxu0  ;;  %v1246_v51 = vadd.f32 %v1245_v6, %v1100_v24 }
 0x23d   : > { %v2129_v5 = vpop.f32.mrf.mxu1 }
 0x23e   : > { %v1255_v13 = vpop.f32.mrf.mxu0  ;;  %v1261_v47 = vadd.f32 %v2185_v9, %v2129_v5 }
 0x23f   : > { %v1110_v7 = vpop.f32.mrf.mxu1 }
 0x240   : > { %v2188_v0 = vpop.f32.mrf.mxu0  ;;  %v1256_v59 = vadd.f32 %v1255_v13, %v1110_v7 }
 0x242   : > { %v2132_v8 = vpop.f32.mrf.mxu1  ;;  %v1265_v19 = vpop.f32.mrf.mxu0 }
 0x243   : > { %v1271_v3 = vadd.f32 %v2188_v0, %v2132_v8  ;;  %v1552_v0 = vld [vmem:[%s2714_s14 + $0x20] sm:$0xff] }
 0x244   : > { %v1120_v10 = vpop.f32.mrf.mxu1  ;;  %v2191_v22 = vpop.f32.mrf.mxu0 }
 0x245   : > { %v1266_v61 = vadd.f32 %v1265_v19, %v1120_v10 }
 0x246   : > { %v2979_v11 = vpop.f32.mrf.mxu1  ;;  %v1275_v39 = vpop.f32.mrf.mxu0 }
 0x247   : > { %v1281_v13 = vadd.f32 %v2191_v22, %v2979_v11 }
 0x248   : > { %v2981_v14 = vpop.f32.mrf.mxu1  ;;  %v2194_v28 = vpop.f32.mrf.mxu0 }
 0x249   : > { %v1276_v30 = vadd.f32 %v1275_v39, %v2981_v14 }
 0x24a   : > { %v2983_v15 = vpop.f32.mrf.mxu1  ;;  %v1285_v62 = vpop.f32.mrf.mxu0 }
 0x24c   : > { %v2985_v16 = vpop.f32.mrf.mxu1  ;;  %v2197_v5 = vpop.f32.mrf.mxu0 }
 0x24e   : > { %v2987_v17 = vpop.f32.mrf.mxu1 }
 0x250   : > { %v2989_v37 = vpop.f32.mrf.mxu1 }
 0x252   : > { %v2992_v21 = vpop.f32.mrf.mxu1 }
 0x254   : > { %v2995_v26 = vpop.f32.mrf.mxu1 }
 0x256   : > { %v2235_v33 = vpop.f32.mrf.mxu1 }
 0x257   : > { %v1493_v42 = vadd.f32 %v2235_v33, %v1241_v25  ;;  %v1555_v33 = vld [vmem:[%s2714_s14 + $0x38] sm:$0xff] }
 0x258   : > { %v1413_v44 = vpop.f32.mrf.mxu1 }
 0x259   : > { %v1513_v45 = vmul.f32 %v2997_v27, %v1493_v42  ;;  %v1492_v46 = vadd.f32 %v1413_v44, %v1236_v36  ;;  %v1295_v42 = vpop.f32.mrf.mxu0 }
 0x25a   : > { %v2238_v50 = vpop.f32.mrf.mxu1 }
 0x25b   : > { %v1533_v41 = vadd.f32 %v2999_v29, %v1513_v45  ;;  %v1512_v31 = vmul.f32 %v2997_v27, %v1492_v46  ;;  %v1495_v32 = vadd.f32 %v2238_v50, %v1251_v43  ;;  %v1291_v45 = vadd.f32 %v2194_v28, %v2983_v15  ;;  %v1554_v46 = vld [vmem:[%s2714_s14 + $0x30] sm:$0xff] }
 0x25c   : > { %v1423_v53 = vpop.f32.mrf.mxu1 }
 0x25d   : > { %v1565_v55 = vadd.f32 %v1549_v18, %v1533_v41  ;;  %v1532_v56 = vadd.f32 %v2999_v29, %v1512_v31  ;;  %v1515_v57 = vmul.f32 %v2997_v27, %v1495_v32  ;;  %v1494_v58 = vadd.f32 %v1423_v53, %v1246_v51  ;;  %v1557_v31 = vld [vmem:[%s2714_s14 + $0x48] sm:$0xff] }
 0x25e   : > { %v2241_v38 = vpop.f32.mrf.mxu1  ;;  %v1286_v41 = vadd.f32 %v1285_v62, %v2985_v16  ;;  %v1559_v62 = vld [vmem:[%s2714_s14 + $0x58] sm:$0xff] }
 0x25f   : > { %1581 = vst [vmem:[%s3011_s26 + $0x8] sm:$0xff] %v1565_v55  ;;  %v1564_v63 = vadd.f32 %v1548_v52, %v1532_v56  ;;  %v1535_v1 = vadd.f32 %v2999_v29, %v1515_v57  ;;  %v1514_v49 = vmul.f32 %v2997_v27, %v1494_v58  ;;  %v1497_v2 = vadd.f32 %v2241_v38, %v1261_v47  ;;  %v2200_v47 = vpop.f32.mrf.mxu0  ;;  %v1556_v56 = vld [vmem:[%s2714_s14 + $0x40] sm:$0xff] }
 0x260   : > { %v1433_v4 = vpop.f32.mrf.mxu1  ;;  %v1301_v55 = vadd.f32 %v2197_v5, %v2987_v17  ;;  %v1296_v38 = vadd.f32 %v1295_v42, %v2989_v37 }
 0x261   : > { %1580 = vst [vmem:[%s3011_s26] sm:$0xff] %v1564_v63  ;;  %v1567_v54 = vadd.f32 %v1551_v60, %v1535_v1  ;;  %v1534_v20 = vadd.f32 %v2999_v29, %v1514_v49  ;;  %v1517_v48 = vmul.f32 %v2997_v27, %v1497_v2  ;;  %v1496_v12 = vadd.f32 %v1433_v4, %v1256_v59  ;;  %v1305_v1 = vpop.f32.mrf.mxu0  ;;  %v1558_v4 = vld [vmem:[%s2714_s14 + $0x50] sm:$0xff] }
 0x262   : > { %v2244_v24 = vpop.f32.mrf.mxu1 }
 0x263   : > { %1583 = vst [vmem:[%s3011_s26 + $0x18] sm:$0xff] %v1567_v54  ;;  %v1566_v6 = vadd.f32 %v1550_v35, %v1534_v20  ;;  %v1537_v7 = vadd.f32 %v2999_v29, %v1517_v48  ;;  %v1516_v8 = vmul.f32 %v2997_v27, %v1496_v12  ;;  %v1499_v9 = vadd.f32 %v2244_v24, %v1271_v3 }
 0x264   : > { %v1443_v40 = vpop.f32.mrf.mxu1  ;;  %v1311_v35 = vadd.f32 %v2200_v47, %v2992_v21 }
 0x265   : > { %1582 = vst [vmem:[%s3011_s26 + $0x10] sm:$0xff] %v1566_v6  ;;  %v1569_v23 = vadd.f32 %v1553_v34, %v1537_v7  ;;  %v1536_v10 = vadd.f32 %v2999_v29, %v1516_v8  ;;  %v1519_v19 = vmul.f32 %v2997_v27, %v1499_v9  ;;  %v1498_v25 = vadd.f32 %v1443_v40, %v1266_v61  ;;  %v1561_v34 = vld [vmem:[%s2714_s14 + $0x68] sm:$0xff]  ;;  %v1560_v8 = vld [vmem:[%s2714_s14 + $0x60] sm:$0xff] }
 0x266   : > { %v2247_v36 = vpop.f32.mrf.mxu1  ;;  %v1306_v61 = vadd.f32 %v1305_v1, %v2995_v26 }
 0x267   : > { %1585 = vst [vmem:[%s3011_s26 + $0x28] sm:$0xff] %v1569_v23  ;;  %v1568_v44 = vadd.f32 %v1552_v0, %v1536_v10  ;;  %v1539_v11 = vadd.f32 %v2999_v29, %v1519_v19  ;;  %v1518_v22 = vmul.f32 %v2997_v27, %v1498_v25  ;;  %v1501_v43 = vadd.f32 %v2247_v36, %v1281_v13  ;;  %v1563_v23 = vld [vmem:[%s2714_s14 + $0x78] sm:$0xff] }
 0x268   : > { %v1453_v18 = vpop.f32.mrf.mxu1 }
 0x269   : > { %1584 = vst [vmem:[%s3011_s26 + $0x20] sm:$0xff] %v1568_v44  ;;  %v1571_v50 = vadd.f32 %v1555_v33, %v1539_v11  ;;  %v1538_v14 = vadd.f32 %v2999_v29, %v1518_v22  ;;  %v1521_v39 = vmul.f32 %v2997_v27, %v1501_v43  ;;  %v1500_v51 = vadd.f32 %v1453_v18, %v1276_v30  ;;  %v1562_v30 = vld [vmem:[%s2714_s14 + $0x70] sm:$0xff] }
 0x26a   : > { %v2250_v32 = vpop.f32.mrf.mxu1 }
 0x26b   : > { %1587 = vst [vmem:[%s3011_s26 + $0x38] sm:$0xff] %v1571_v50  ;;  %v1570_v52 = vadd.f32 %v1554_v46, %v1538_v14  ;;  %v1541_v15 = vadd.f32 %v2999_v29, %v1521_v39  ;;  %v1520_v28 = vmul.f32 %v2997_v27, %v1500_v51  ;;  %v1503_v53 = vadd.f32 %v2250_v32, %v1291_v45 }
 0x26c   : > { %v1463_v57 = vpop.f32.mrf.mxu1 }
 0x26d   : > { %1586 = vst [vmem:[%s3011_s26 + $0x30] sm:$0xff] %v1570_v52  ;;  %v1573_v58 = vadd.f32 %v1557_v31, %v1541_v15  ;;  %v1540_v16 = vadd.f32 %v2999_v29, %v1520_v28  ;;  %v1523_v59 = vmul.f32 %v2997_v27, %v1503_v53  ;;  %v1502_v60 = vadd.f32 %v1463_v57, %v1286_v41 }
 0x26e   : > { %v2253_v63 = vpop.f32.mrf.mxu1 }
 0x26f   : > { %1589 = vst [vmem:[%s3011_s26 + $0x48] sm:$0xff] %v1573_v58  ;;  %v1572_v17 = vadd.f32 %v1556_v56, %v1540_v16  ;;  %v1543_v49 = vadd.f32 %v2999_v29, %v1523_v59  ;;  %v1522_v2 = vmul.f32 %v2997_v27, %v1502_v60  ;;  %v1505_v3 = vadd.f32 %v2253_v63, %v1301_v55 }
 0x270   : > { %v1473_v54 = vpop.f32.mrf.mxu1 }
 0x271   : > { %1588 = vst [vmem:[%s3011_s26 + $0x40] sm:$0xff] %v1572_v17  ;;  %v1575_v37 = vadd.f32 %v1559_v62, %v1543_v49  ;;  %v1542_v20 = vadd.f32 %v2999_v29, %v1522_v2  ;;  %v1525_v48 = vmul.f32 %v2997_v27, %v1505_v3  ;;  %v1504_v12 = vadd.f32 %v1473_v54, %v1296_v38 }
 0x272   : > { %v2256_v24 = vpop.f32.mrf.mxu1 }
 0x273   : > { %1591 = vst [vmem:[%s3011_s26 + $0x58] sm:$0xff] %v1575_v37  ;;  %v1574_v21 = vadd.f32 %v1558_v4, %v1542_v20  ;;  %v1545_v5 = vadd.f32 %v2999_v29, %v1525_v48  ;;  %v1524_v6 = vmul.f32 %v2997_v27, %v1504_v12  ;;  %v1507_v7 = vadd.f32 %v2256_v24, %v1311_v35 }
 0x274   : > { %v1483_v9 = vpop.f32.mrf.mxu1 }
 0x275   : > { %1590 = vst [vmem:[%s3011_s26 + $0x50] sm:$0xff] %v1574_v21  ;;  %v1577_v13 = vadd.f32 %v1561_v34, %v1545_v5  ;;  %v1544_v26 = vadd.f32 %v2999_v29, %v1524_v6  ;;  %v1527_v0 = vmul.f32 %v2997_v27, %v1507_v7  ;;  %v1506_v40 = vadd.f32 %v1483_v9, %v1306_v61 }
 0x277   : > { %1593 = vst [vmem:[%s3011_s26 + $0x68] sm:$0xff] %v1577_v13  ;;  %v1576_v10 = vadd.f32 %v1560_v8, %v1544_v26  ;;  %v1547_v19 = vadd.f32 %v2999_v29, %v1527_v0  ;;  %v1526_v25 = vmul.f32 %v2997_v27, %v1506_v40 }
 0x279   : > { %1592 = vst [vmem:[%s3011_s26 + $0x60] sm:$0xff] %v1576_v10  ;;  %v1579_v33 = vadd.f32 %v1563_v23, %v1547_v19  ;;  %v1546_v36 = vadd.f32 %v2999_v29, %v1526_v25 }
 0x27b   : > { %1595 = vst [vmem:[%s3011_s26 + $0x78] sm:$0xff] %v1579_v33  ;;  %v1578_v42 = vadd.f32 %v1562_v30, %v1546_v36 }
 0x27d   : > { %1594 = vst [vmem:[%s3011_s26 + $0x70] sm:$0xff] %v1578_v42 }
 0x27e   : > { %2461 = shalt.err (!%p2458_p10)
}
 0x27f   : > { %s2462_s25 = scalar_lea.hbm %s3080_s7, 2048  ;;  %s2466_s13 = scalar_lea.hbm %s3131_s4, 4096 }
 0x280   : > { %p2463_p2 = scmp.ne.s32.totalorder %s3080_s7, %s2462_s25  ;;  %p2467_p8 = scmp.lt.s32.totalorder %s3080_s7, %s3131_s4 }
 0x281   : > { %p2468_p1 = scmp.lt.s32.totalorder %s2466_s13, %s2462_s25 }
 0x282   : > { %p2464_p6 = pnand %p2463_p2, %p3149_p3 }
 0x283   : > { %p2469_p5 = por %p2468_p1, %p2467_p8 }
 0x284   : > { %p2465_p13 = pneg %p2464_p6 }
 0x286   : > { %p2470_p0 = pnand %p2469_p5, %p2465_p13 }
 0x288   : > { %2473 = shalt.err (!%p2470_p0)
}
 0x289   : > { %s2531_s26 = smov 128   ;;  %s2532_s29 = smov 256  }
 0x28a   : > { %s2533_s11 = smov 8  }
 0x28b   : > { %2271 = dma.vmem_to_hbm [thread:$0]  (%p3149_p3), %s3082_s10, 2048, %s3080_s7, %s1597_s19, %s2531_s26, %s2532_s29, %s2533_s11  }
 0x28c PF: > { %s1624_s23 = sand.u32 1, %s2508_s15   ;;  %p3150_p4 = scmp.ne.s32.totalorder %s3139_s28, 0 }
 0x28d   : > { %p3151_p11 = scmp.ge.s32.totalorder %s2520_s18, 2  ;;  %s1625_s6 = scalar_lea.sflag [#allocation5], %s1624_s23 }
 0x28f   : > { %p2288_p12 = pnand %p3151_p11, %p3150_p4 }
 0x291   : > { %p2289_p9 = pneg %p2288_p12 }
 0x293   : > { %2503 = dma.done.wait (%p2289_p9), %s1625_s6, 2048  }
 0x294   : > { %2505 = vsyncadd (%p2289_p9), %s1625_s6, 4294965248  ;;  %p19_p7 = scmp.ge.s32.totalorder %s2584_s21, 4   ;;  %s3152_s15 = smov %s2512_s16 }
 0x295   : > { %s3153_s16 = smov %s2516_s17  ;;  %s3154_s17 = smov %s2596_s24 }
 0x296   : > { %s3155_s18 = smov %s2584_s21  ;;  %21 = sbr.rel (!%p19_p7) target bundleno = 7 (0x7), region = 97 }
 0x29b   :  { %1630 = vsyncpa [#allocation4], 1 }
 0x29c   :  { %1632 = vsyncpa [#allocation4 + $0x1], 1 }
 0x29d   :  { %1633 = vsyncpa [#allocation7], 1 }
 0x29e   :  { %1634 = vsyncpa [#allocation10], 1 }
 0x29f   :  { %1635 = vsyncpa [#allocation5], 1 }
 0x2a0   :  { %1637 = vsyncpa [#allocation5 + $0x1], 1 }

// kernel: tpu_custom_call.1
= control target key start
LH: loop header
LB: loop body
LE: loop exit
PB: predicated region body
PF: predicated region fallthrough
CT: control target
= control target key end

     0   :  { %9 = vsyncpa [#allocation4], 0  ;;  %s3127_s0 = inlined_call_operand.hbm [shape: f32[16,16,128], index: 0, kind: input, shape index: {}]   ;;  %s3128_s1 = inlined_call_operand.hbm [shape: f32[3,128,128], index: 1, kind: input, shape index: {}]   ;;  %s3129_s2 = inlined_call_operand.hbm [shape: f32[3,128,128], index: 2, kind: input, shape index: {}]   ;;  %s3130_s3 = inlined_call_operand.hbm [shape: f32[8,128], index: 3, kind: input, shape index: {}]   ;;  %s3131_s4 = inlined_call_operand.hbm [shape: f32[16,16,128], index: 4, kind: output, shape index: {}]  }
   0x1   :  { %11 = vsyncpa [#allocation4 + $0x1], 0 }
   0x2   :  { %12 = vsyncpa [#allocation7], 0 }
   0x3   :  { %13 = vsyncpa [#allocation10], 0 }
   0x4   :  { %14 = vsyncpa [#allocation5], 0 }
   0x5   :  { %16 = vsyncpa [#allocation5 + $0x1], 0  ;;  %s2559_s15 = smov 0   ;;  %s2561_s16 = smov 0  }
   0x6   :  { %s2563_s17 = smov 0   ;;  %s2565_s18 = smov 0  }
   0x7 LB: > { %s2580_s19 = sadd.s32 4294967295, %s2520_s18   ;;  %s1711_s20 = sadd.s32 4294967294, %s2520_s18   ;;  %s2520_s18 = sphi %s2565_s18, %s3155_s18   ;;  %s2516_s17 = sphi %s2563_s17, %s3154_s17   ;;  %s2512_s16 = sphi %s2561_s16, %s3153_s16   ;;  %s2508_s15 = sphi %s2559_s15, %s3152_s15  }
   0x8   : > { %s2584_s21 = sadd.s32 1, %s2520_s18   ;;  %s29_s22 = sadd.s32 1, %s2516_s17 }
   0x9   : > { %s26_s23 = ssub.s32 %s2520_s18, %s2584_s21  ;;  %p36_p0 = scmp.ne.s32.totalorder %s2516_s17, %s2512_s16 }
   0xa   : > { %p27_p1 = scmp.eq.s32.totalorder %s26_s23, 0  ;;  %p37_p2 = scmp.eq.s32.totalorder %s2520_s18, 0 }
   0xb   : > { %p42_p3 = scmp.ne.s32.totalorder %s2512_s16, %s2508_s15  ;;  %p3133_p4 = scmp.eq.s32.totalorder %s2580_s19, 0 }
   0xc   : > { %s2596_s24 = scalar_select %p27_p1, %s2516_s17, %s29_s22  }
   0xd   : > { %p2598_p5 = por %p37_p2, %p36_p0  ;;  %p2604_p6 = por %p3133_p4, %p42_p3 }
   0xe   : > { %p129_p7 = scmp.eq.s32.totalorder %s2580_s19, 1  ;;  %p135_p8 = scmp.eq.s32.totalorder %s1711_s20, 1 }
   0xf   : > { %s3137_s26 = scalar_select %p2604_p6, 1, 0 }
  0x10   : > { %p1712_p9 = scmp.ge.s32.totalorder %s2520_s18, 1  ;;  %p142_p10 = scmp.lt.s32.totalorder %s2520_s18, 3 }
  0x11   : > { %p2611_p11 = por %p129_p7, %p36_p0  ;;  %p2615_p12 = por %p135_p8, %p42_p3 }
  0x12   : > { %p2619_p13 = pnand %p1712_p9, %p142_p10  ;;  %s2522_s30 = smov [#allocation6]  }
  0x13   : > { %s3138_s27 = scalar_select %p2611_p11, 1, 0 }
  0x14   : > { %s3139_s28 = scalar_select %p2615_p12, 1, 0 }
  0x15   : > { %s3140_s29 = scalar_select %p2619_p13, 1, 0 }
  0x16   : > { %p2273_p1 = pneg %p2619_p13  ;;  %s154_s5 = sshll.u32 %s2522_s30, 4  ;;  %s155_s5 = int_to_ptr.vmem [resolvable:$true] %s154_s5 }
  0x17   : > { %p2294_p3 = scmp.lt.s32.totalorder %s2520_s18, 2  ;;  %s2523_s7 = smov [#allocation8]  }
  0x18   : > { %p2627_p2 = pnand %p2273_p1, %p3133_p4  ;;  %s167_s8 = sshll.u32 %s2523_s7, 4  ;;  %s168_s8 = int_to_ptr.vmem [resolvable:$true] %s167_s8 }
  0x19   : > { %s2353_s9 = scalar_lea.vmem %s155_s5, 6144  ;;  %p2361_p12 = scmp.lt.s32.totalorder %s155_s5, %s155_s5 }
  0x1a   : > { %p2344_p7 = pneg %p2627_p2  ;;  %p2354_p8 = scmp.ne.s32.totalorder %s155_s5, %s2353_s9 }
  0x1b   : > { %p2362_p11 = scmp.lt.s32.totalorder %s2353_s9, %s2353_s9 }
  0x1c   : > { %p2356_p9 = pnand %p2354_p8, %p2344_p7 }
  0x1d   : > { %p2363_p1 = por %p2362_p11, %p2361_p12 }
  0x1e   : > { %p2357_p10 = pneg %p2356_p9 }
  0x20   : > { %p2364_p4 = pnand %p2363_p1, %p2357_p10 }
  0x22   : > { %2367 = shalt.err (!%p2364_p4)
}
  0x23   : > { %s2524_s10 = smov 128   ;;  %s2525_s11 = smov 8  }
  0x24   : > { %2276 = dma.hbm_to_vmem [thread:$0]  (!%p2627_p2), %s3128_s1, 6144, %s155_s5, [#allocation7], %s2524_s10, %s2524_s10, %s2525_s11  }
  0x25   : > { %p2650_p8 = pnand %p2294_p3, %p2598_p5  ;;  %s2379_s20 = scalar_lea.vmem %s168_s8, 6144 }
  0x26   : > { %p2380_p4 = scmp.ne.s32.totalorder %s168_s8, %s2379_s20  ;;  %p2387_p9 = scmp.lt.s32.totalorder %s168_s8, %s168_s8 }
  0x27   : > { %p2388_p10 = scmp.lt.s32.totalorder %s2379_s20, %s2379_s20 }
  0x28   : > { %p2382_p11 = pnand %p2380_p4, %p2344_p7 }
  0x29   : > { %p2389_p1 = por %p2388_p10, %p2387_p9 }
  0x2a   : > { %p2383_p12 = pneg %p2382_p11 }
  0x2c   : > { %p2390_p0 = pnand %p2389_p1, %p2383_p12 }
  0x2e   : > { %2393 = shalt.err (!%p2390_p0)
}
  0x2f   : > { %2279 = dma.hbm_to_vmem [thread:$0]  (!%p2627_p2), %s3129_s2, 6144, %s168_s8, [#allocation7], %s2524_s10, %s2524_s10, %s2525_s11  }
  0x30   : > { %s2526_s25 = smov [#allocation9]   ;;  %s192_s5 = sand.u32 1, %s2516_s17  }
  0x31   : > { %s181_s30 = sshll.u32 %s2526_s25, 4  ;;  %s182_s30 = int_to_ptr.vmem [resolvable:$true] %s181_s30 }
  0x32   : > { %s2405_s7 = scalar_lea.vmem %s182_s30, 128  ;;  %p2413_p4 = scmp.lt.s32.totalorder %s182_s30, %s182_s30 }
  0x33   : > { %p2406_p5 = scmp.ne.s32.totalorder %s182_s30, %s2405_s7  ;;  %p2414_p11 = scmp.lt.s32.totalorder %s2405_s7, %s2405_s7 }
  0x35   : > { %p2408_p0 = pnand %p2406_p5, %p2344_p7  ;;  %p2415_p12 = por %p2414_p11, %p2413_p4 }
  0x37   : > { %p2409_p3 = pneg %p2408_p0 }
  0x39   : > { %p2416_p9 = pnand %p2415_p12, %p2409_p3 }
  0x3b   : > { %2419 = shalt.err (!%p2416_p9)
}
  0x3c   : > { %2282 = dma.hbm_to_vmem [thread:$0]  (!%p2627_p2), %s3130_s3, 128, %s182_s30, [#allocation10]  }
  0x3d   : > { %s1717_s8 = sshll.u32 %s192_s5, 7  ;;  %s1718_s13 = sshll.u32 %s2520_s18, 7 }
  0x3e   : > { %s2678_s23 = scalar_lea.hbm %s3127_s0, %s1718_s13  ;;  %s196_s25 = scalar_lea.vmem [#allocation3], %s1717_s8 }
  0x3f   : > { %s202_s7 = sshll.u32 %s196_s25, 4  ;;  %s2682_s6 = scalar_lea.sflag [#allocation4], %s192_s5  ;;  %s2680_s7 = int_to_ptr.vmem [resolvable:$true] %s202_s7 }
  0x40   : > { %s2420_s9 = scalar_lea.hbm %s2678_s23, 2048  ;;  %p2422_p2 = pneg %p2650_p8 }
  0x41   : > { %p2421_p7 = scmp.ne.s32.totalorder %s2678_s23, %s2420_s9  ;;  %s2425_s13 = scalar_lea.hbm %s3127_s0, 4096 }
  0x42   : > { %p2426_p5 = scmp.lt.s32.totalorder %s2678_s23, %s3127_s0  ;;  %p2427_p0 = scmp.lt.s32.totalorder %s2425_s13, %s2420_s9 }
  0x43   : > { %p2423_p10 = pnand %p2422_p2, %p2421_p7 }
  0x44   : > { %p2428_p3 = por %p2427_p0, %p2426_p5 }
  0x45   : > { %p2424_p1 = pneg %p2423_p10 }
  0x47   : > { %p2429_p4 = pnand %p2428_p3, %p2424_p1 }
  0x49   : > { %2432 = shalt.err (!%p2429_p4)
}
  0x4a   : > { %s2433_s5 = scalar_lea.vmem %s2680_s7, 2048  ;;  %s2527_s8 = smov [#allocation3]  }
  0x4b   : > { %p2434_p11 = scmp.ne.s32.totalorder %s2680_s7, %s2433_s5  ;;  %s2438_s25 = sshll.u32 %s2527_s8, 4  ;;  %s2439_s25 = int_to_ptr.vmem [resolvable:$false] %s2438_s25 }
  0x4c   : > { %s2440_s30 = scalar_lea.vmem %s2439_s25, 4096  ;;  %p2441_p7 = scmp.lt.s32.totalorder %s2680_s7, %s2439_s25 }
  0x4d   : > { %p2436_p12 = pnand %p2434_p11, %p2422_p2  ;;  %p2442_p10 = scmp.lt.s32.totalorder %s2440_s30, %s2433_s5 }
  0x4f   : > { %p2437_p9 = pneg %p2436_p12  ;;  %p2443_p6 = por %p2442_p10, %p2441_p7 }
  0x51   : > { %p2444_p13 = pnand %p2443_p6, %p2437_p9 }
  0x53   : > { %2447 = shalt.err (!%p2444_p13)
}
  0x54   : > { %s2528_s9 = smov 256   ;;  %p3143_p2 = scmp.ne.s32.totalorder %s3140_s29, 0 }
  0x55   : > { %2286 = dma.hbm_to_vmem [thread:$0]  (!%p2650_p8), %s2678_s23, 2048, %s2680_s7, %s2682_s6, %s2528_s9, %s2524_s10, %s2525_s11  }
  0x56   : > { %214 = sbr.rel (%p3143_p2) target bundleno = 652 (0x28c), region = 36  ;;  %s2708_s12 = sand.u32 (!%p3143_p2), 1, %s2512_s16  }
  0x57   : > { %s1720_s13 = sshll.u32 (!%p3143_p2), %s2708_s12, 7  ;;  %s217_s20 = scalar_lea.sflag (!%p3143_p2), [#allocation4], %s2708_s12 }
  0x58   : > { %s2714_s14 = scalar_lea.vmem (!%p3143_p2), [#allocation3], %s1720_s13  ;;  %p3144_p6 = scmp.ne.s32.totalorder (!%p3143_p2), %s3137_s26, 0 }
  0x5b   : > { %2491 = dma.done.wait (%p3144_p6), %s217_s20, 2048  }
  0x5c   : > { %2493 = vsyncadd (%p3144_p6), %s217_s20, 4294965248  ;;  %p3145_p13 = scmp.eq.s32.totalorder %s2580_s19, 0 }
  0x5e   : > { %2495 = dma.done.wait (%p3145_p13), [#allocation7], 12288   ;;  %p3146_p8 = pmov %p3145_p13 }
  0x60   : > { %2497 = vsyncadd (%p3146_p8), [#allocation7], 4294955008  ;;  %p3147_p1 = pmov %p3146_p8 }
  0x62   : > { %2499 = dma.done.wait (%p3147_p1), [#allocation10], 128   ;;  %p3148_p5 = pmov %p3147_p1 }
  0x63   : > { %v2529_v0 = vmov 0.0   ;;  %v381_v1 = vld [vmem:[#allocation6 + $0xf8] sm:$0xff]  ;;  %v380_v3 = vld [vmem:[#allocation6 + $0xf0] sm:$0xff]  ;;  %v379_v5 = vld [vmem:[#allocation6 + $0xe8] sm:$0xff]  ;;  %v276_v13 = vlaneseq  ;;  %s3011_s26 = scalar_lea.vmem [#allocation11], %s1720_s13  ;;  %s1726_s29 = sshll.u32 %s2580_s19, 7 }
  0x64   : > { %2501 = vsyncadd (%p3148_p5), [#allocation10], 4294967168  ;;  %2009 = vmatprep.mubr.f32.mxu1 %v2529_v0  ;;  %v363_v2 = vld [vmem:[#allocation6 + $0x78] sm:$0xff]  ;;  %1921 = vmatprep.subr.mxu0 %v381_v1  ;;  %v362_v4 = vld [vmem:[#allocation6 + $0x70] sm:$0xff]  ;;  %s1609_s10 = sshll.u32 %s3011_s26, 4  ;;  %s3080_s7 = scalar_lea.hbm %s3131_s4, %s1726_s29  ;;  %s3082_s10 = int_to_ptr.vmem [resolvable:$true] %s1609_s10 }
  0x65   : > { %1977 = vmatprep.subr.mxu1 %v363_v2  ;;  %1922 = vmatpush3.msra.mxu0 %v381_v1  ;;  %v361_v6 = vld [vmem:[#allocation6 + $0x68] sm:$0xff]  ;;  %v378_v7 = vld [vmem:[#allocation6 + $0xe0] sm:$0xff]  ;;  %v377_v9 = vld [vmem:[#allocation6 + $0xd8] sm:$0xff]  ;;  %v2729_v18 = vshrl.u32 %v276_v13, 7  ;;  %s1597_s19 = scalar_lea.sflag [#allocation5], %s2708_s12  ;;  %s2448_s6 = scalar_lea.vmem %s3082_s10, 2048 }
  0x66   : > { %1978 = vmatpush3.msra.mxu1 %v363_v2  ;;  %1923 = vmatprep.subr.mxu0 %v380_v3  ;;  %v360_v8 = vld [vmem:[#allocation6 + $0x60] sm:$0xff]  ;;  %v359_v10 = vld [vmem:[#allocation6 + $0x58] sm:$0xff]  ;;  %v376_v11 = vld [vmem:[#allocation6 + $0xd0] sm:$0xff]  ;;  %p2449_p0 = scmp.ne.s32.totalorder %s3082_s10, %s2448_s6  ;;  %p3149_p3 = scmp.ne.s32.totalorder %s3138_s27, 0 }
  0x67   : > { %1979 = vmatprep.subr.mxu1 %v362_v4  ;;  %1924 = vmatpush3.msra.mxu0 %v380_v3  ;;  %v358_v12 = vld [vmem:[#allocation6 + $0x50] sm:$0xff]  ;;  %v375_v14 = vld [vmem:[#allocation6 + $0xc8] sm:$0xff]  ;;  %v374_v16 = vld [vmem:[#allocation6 + $0xc0] sm:$0xff]  ;;  %v278_v23 = vsub.s32 0, %v2729_v18  ;;  %v298_v30 = vsub.s32 1, %v2729_v18  ;;  %s2530_s22 = smov [#allocation11]  }
  0x68   : > { %1980 = vmatpush3.msra.mxu1 %v362_v4  ;;  %1925 = vmatprep.subr.mxu0 %v379_v5  ;;  %v357_v15 = vld [vmem:[#allocation6 + $0x48] sm:$0xff]  ;;  %v356_v17 = vld [vmem:[#allocation6 + $0x40] sm:$0xff]  ;;  %v373_v19 = vld [vmem:[#allocation6 + $0xb8] sm:$0xff]  ;;  %p2450_p4 = pnand %p2449_p0, %p3149_p3  ;;  %s2452_s5 = sshll.u32 %s2530_s22, 4  ;;  %s2453_s5 = int_to_ptr.vmem [resolvable:$false] %s2452_s5 }
  0x69   : > { %1981 = vmatprep.subr.mxu1 %v361_v6  ;;  %1926 = vmatpush3.msra.mxu0 %v379_v5  ;;  %v355_v20 = vld [vmem:[#allocation6 + $0x38] sm:$0xff]  ;;  %v372_v21 = vld [vmem:[#allocation6 + $0xb0] sm:$0xff]  ;;  %v2732_v24 = vld [vmem:[#allocation9] sm:$0xff]  ;;  %s2454_s8 = scalar_lea.vmem %s2453_s5, 4096  ;;  %p2455_p12 = scmp.lt.s32.totalorder %s3082_s10, %s2453_s5 }
  0x6a   : > { %1982 = vmatpush3.msra.mxu1 %v361_v6  ;;  %1927 = vmatprep.subr.mxu0 %v378_v7  ;;  %v354_v22 = vld [vmem:[#allocation6 + $0x30] sm:$0xff]  ;;  %v371_v25 = vld [vmem:[#allocation6 + $0xa8] sm:$0xff]  ;;  %v370_v27 = vld [vmem:[#allocation6 + $0xa0] sm:$0xff]  ;;  %v2735_v29 = vrot.slane %v2732_v24, %v278_v23  ;;  %v2742_v38 = vrot.slane %v2732_v24, %v298_v30  ;;  %p2451_p11 = pneg %p2450_p4  ;;  %p2456_p9 = scmp.lt.s32.totalorder %s2454_s8, %s2448_s6 }
  0x6b   : > { %1983 = vmatprep.subr.mxu1 %v360_v8  ;;  %1928 = vmatpush3.msra.mxu0 %v378_v7  ;;  %v353_v26 = vld [vmem:[#allocation6 + $0x28] sm:$0xff]  ;;  %v352_v28 = vld [vmem:[#allocation6 + $0x20] sm:$0xff]  ;;  %v369_v32 = vld [vmem:[#allocation6 + $0x98] sm:$0xff] }
  0x6c   : > { %1984 = vmatpush3.msra.mxu1 %v360_v8  ;;  %1929 = vmatprep.subr.mxu0 %v377_v9  ;;  %v260_v31 = vld [vmem:[%s2714_s14] sm:$0xff]  ;;  %v351_v33 = vld [vmem:[#allocation6 + $0x18] sm:$0xff]  ;;  %v261_v34 = vld [vmem:[%s2714_s14 + $0x8] sm:$0xff]  ;;  %p2457_p7 = por %p2456_p9, %p2455_p12 }
  0x6d   : > { %1985 = vmatprep.subr.mxu1 %v359_v10  ;;  %1930 = vmatpush3.msra.mxu0 %v377_v9  ;;  %v368_v35 = vld [vmem:[#allocation6 + $0x90] sm:$0xff]  ;;  %v280_v37 = vmul.f32 %v2735_v29, %v260_v31  ;;  %v281_v40 = vmul.f32 %v2735_v29, %v261_v34  ;;  %v367_v41 = vld [vmem:[#allocation6 + $0x88] sm:$0xff]  ;;  %v263_v44 = vld [vmem:[%s2714_s14 + $0x18] sm:$0xff] }
  0x6e   : > { %1986 = vmatpush3.msra.mxu1 %v359_v10  ;;  %1931 = vmatprep.subr.mxu0 %v376_v11  ;;  %v350_v36 = vld [vmem:[#allocation6 + $0x10] sm:$0xff]  ;;  %v349_v42 = vld [vmem:[#allocation6 + $0x8] sm:$0xff]  ;;  %v366_v45 = vld [vmem:[#allocation6 + $0x80] sm:$0xff]  ;;  %v283_v50 = vmul.f32 %v2735_v29, %v263_v44  ;;  %p2458_p10 = pnand %p2457_p7, %p2451_p11 }
  0x6f   : > { %1987 = vmatprep.subr.mxu1 %v358_v12  ;;  %1932 = vmatpush3.msra.mxu0 %v376_v11  ;;  %v262_v39 = vld [vmem:[%s2714_s14 + $0x10] sm:$0xff]  ;;  %v348_v46 = vld [vmem:[#allocation6] sm:$0xff]  ;;  %v300_v47 = vadd.f32 %v2742_v38, %v280_v37  ;;  %v2751_v49 = vadd.f32 %v2742_v38, %v281_v40  ;;  %v704_v51 = vld [vmem:[#allocation6 + $0x178] sm:$0xff] }
  0x70   : > { %1988 = vmatpush3.msra.mxu1 %v358_v12  ;;  %1933 = vmatprep.subr.mxu0 %v375_v14  ;;  %v282_v43 = vmul.f32 %v2735_v29, %v262_v39  ;;  %v264_v48 = vld [vmem:[%s2714_s14 + $0x20] sm:$0xff]  ;;  %v265_v54 = vld [vmem:[%s2714_s14 + $0x28] sm:$0xff]  ;;  %v703_v55 = vld [vmem:[#allocation6 + $0x170] sm:$0xff]  ;;  %v2762_v57 = vadd.f32 %v2742_v38, %v283_v50 }
  0x71   : > { %1989 = vmatprep.subr.mxu1 %v357_v15  ;;  %1934 = vmatpush3.msra.mxu0 %v375_v14  ;;  %v284_v53 = vmul.f32 %v2735_v29, %v264_v48  ;;  %v266_v56 = vld [vmem:[%s2714_s14 + $0x30] sm:$0xff]  ;;  %v285_v59 = vmul.f32 %v2735_v29, %v265_v54  ;;  %v702_v60 = vld [vmem:[#allocation6 + $0x168] sm:$0xff]  ;;  %v267_v62 = vld [vmem:[%s2714_s14 + $0x38] sm:$0xff] }
  0x72   : > { %1990 = vmatpush3.msra.mxu1 %v357_v15  ;;  %1935 = vmatprep.subr.mxu0 %v374_v16  ;;  %v2755_v52 = vadd.f32 %v2742_v38, %v282_v43  ;;  %v286_v61 = vmul.f32 %v2735_v29, %v266_v56  ;;  %v268_v63 = vld [vmem:[%s2714_s14 + $0x40] sm:$0xff]  ;;  %v287_v3 = vmul.f32 %v2735_v29, %v267_v62  ;;  %v700_v4 = vld [vmem:[#allocation6 + $0x158] sm:$0xff]  ;;  %v269_v7 = vld [vmem:[%s2714_s14 + $0x48] sm:$0xff] }
  0x73   : > { %1991 = vmatprep.subr.mxu1 %v356_v17  ;;  %1936 = vmatpush3.msra.mxu0 %v374_v16  ;;  %v2766_v58 = vadd.f32 %v2742_v38, %v284_v53  ;;  %v701_v1 = vld [vmem:[#allocation6 + $0x160] sm:$0xff]  ;;  %v2777_v2 = vadd.f32 %v2742_v38, %v285_v59  ;;  %v288_v6 = vmul.f32 %v2735_v29, %v268_v63  ;;  %v270_v8 = vld [vmem:[%s2714_s14 + $0x50] sm:$0xff]  ;;  %v698_v12 = vld [vmem:[#allocation6 + $0x148] sm:$0xff] }
  0x74   : > { %1992 = vmatpush3.msra.mxu1 %v356_v17  ;;  %1937 = vmatprep.subr.mxu0 %v373_v19  ;;  %v2782_v5 = vadd.f32 %v2742_v38, %v286_v61  ;;  %v699_v9 = vld [vmem:[#allocation6 + $0x150] sm:$0xff]  ;;  %v2790_v10 = vadd.f32 %v2742_v38, %v287_v3  ;;  %v289_v11 = vmul.f32 %v2735_v29, %v269_v7  ;;  %v271_v15 = vld [vmem:[%s2714_s14 + $0x58] sm:$0xff]  ;;  %v272_v16 = vld [vmem:[%s2714_s14 + $0x60] sm:$0xff] }
  0x75   : > { %1993 = vmatprep.subr.mxu1 %v355_v20  ;;  %1938 = vmatpush3.msra.mxu0 %v373_v19  ;;  %v2795_v13 = vadd.f32 %v2742_v38, %v288_v6  ;;  %v290_v14 = vmul.f32 %v2735_v29, %v270_v8  ;;  %v697_v17 = vld [vmem:[#allocation6 + $0x140] sm:$0xff]  ;;  %v292_v23 = vmul.f32 %v2735_v29, %v272_v16  ;;  %v694_v31 = vld [vmem:[#allocation6 + $0x128] sm:$0xff]  ;;  %v275_v34 = vld [vmem:[%s2714_s14 + $0x78] sm:$0xff] }
  0x76   : > { %1994 = vmatpush3.msra.mxu1 %v355_v20  ;;  %1939 = vmatprep.subr.mxu0 %v372_v21  ;;  %v2804_v19 = vadd.f32 %v2742_v38, %v289_v11  ;;  %v291_v20 = vmul.f32 %v2735_v29, %v271_v15  ;;  %v295_v37 = vmul.f32 %v2735_v29, %v275_v34  ;;  %v692_v39 = vld [vmem:[#allocation6 + $0x118] sm:$0xff]  ;;  %v690_v43 = vld [vmem:[#allocation6 + $0x108] sm:$0xff]  ;;  %v1020_v50 = vld [vmem:[#allocation8 + $0xe0] sm:$0xff] }
  0x77   : > { %1995 = vmatprep.subr.mxu1 %v354_v22  ;;  %1940 = vmatpush3.msra.mxu0 %v372_v21  ;;  %v696_v21 = vld [vmem:[#allocation6 + $0x138] sm:$0xff]  ;;  %v1021_v48 = vld [vmem:[#allocation8 + $0xe8] sm:$0xff]  ;;  %v1000_v53 = vld [vmem:[#allocation8 + $0x50] sm:$0xff] }
  0x78   : > { %1996 = vmatpush3.msra.mxu1 %v354_v22  ;;  %1941 = vmatprep.subr.mxu0 %v371_v25  ;;  %v310_v22 = vadd.f32 %v2742_v38, %v290_v14  ;;  %v1023_v44 = vld [vmem:[#allocation8 + $0xf8] sm:$0xff]  ;;  %v1018_v54 = vld [vmem:[#allocation8 + $0xd0] sm:$0xff]  ;;  %v1017_v56 = vld [vmem:[#allocation8 + $0xc8] sm:$0xff] }
  0x79   : > { %1997 = vmatprep.subr.mxu1 %v353_v26  ;;  %1942 = vmatpush3.msra.mxu0 %v371_v25  ;;  %v273_v25 = vld [vmem:[%s2714_s14 + $0x68] sm:$0xff]  ;;  %v997_v59 = vld [vmem:[#allocation8 + $0x38] sm:$0xff]  ;;  %v996_v61 = vld [vmem:[#allocation8 + $0x30] sm:$0xff] }
  0x7a   : > { %1998 = vmatpush3.msra.mxu1 %v353_v26  ;;  %1943 = vmatprep.subr.mxu0 %v370_v27  ;;  %v274_v26 = vld [vmem:[%s2714_s14 + $0x70] sm:$0xff]  ;;  %v293_v30 = vmul.f32 %v2735_v29, %v273_v25  ;;  %v995_v63 = vld [vmem:[#allocation8 + $0x28] sm:$0xff]  ;;  %v1012_v3 = vld [vmem:[#allocation8 + $0xa0] sm:$0xff] }
  0x7b   : > { %1999 = vmatprep.subr.mxu1 %v352_v28  ;;  %1944 = vmatpush3.msra.mxu0 %v370_v27  ;;  %v695_v27 = vld [vmem:[#allocation6 + $0x130] sm:$0xff]  ;;  %v991_v8 = vld [vmem:[#allocation8 + $0x8] sm:$0xff]  ;;  %v1008_v11 = vld [vmem:[#allocation8 + $0x80] sm:$0xff] }
  0x7c   : > { %2000 = vmatpush3.msra.mxu1 %v352_v28  ;;  %1945 = vmatprep.subr.mxu0 %v369_v32  ;;  %v311_v28 = vadd.f32 %v2742_v38, %v291_v20  ;;  %v1014_v62 = vld [vmem:[#allocation8 + $0xb0] sm:$0xff] }
  0x7d   : > { %2001 = vmatprep.subr.mxu1 %v351_v33  ;;  %1946 = vmatpush3.msra.mxu0 %v369_v32  ;;  %v312_v32 = vadd.f32 %v2742_v38, %v292_v23  ;;  %v992_v6 = vld [vmem:[#allocation8 + $0x10] sm:$0xff] }
  0x7e   : > { %2002 = vmatpush3.msra.mxu1 %v351_v33  ;;  %1947 = vmatprep.subr.mxu0 %v368_v35  ;;  %v294_v33 = vmul.f32 %v2735_v29, %v274_v26  ;;  %v689_v29 = vld [vmem:[#allocation6 + $0x100] sm:$0xff]  ;;  %v1010_v7 = vld [vmem:[#allocation8 + $0x90] sm:$0xff] }
  0x7f   : > { %2003 = vmatprep.subr.mxu1 %v350_v36  ;;  %1948 = vmatpush3.msra.mxu0 %v368_v35  ;;  %v693_v35 = vld [vmem:[#allocation6 + $0x120] sm:$0xff] }
  0x80   : > { %2004 = vmatpush3.msra.mxu1 %v350_v36  ;;  %1949 = vmatprep.subr.mxu0 %v367_v41  ;;  %v313_v36 = vadd.f32 %v2742_v38, %v293_v30  ;;  %v314_v40 = vadd.f32 %v2742_v38, %v294_v33 }
  0x81   : > { %2005 = vmatprep.subr.mxu1 %v349_v42  ;;  %1950 = vmatpush3.msra.mxu0 %v367_v41  ;;  %v691_v41 = vld [vmem:[#allocation6 + $0x110] sm:$0xff] }
  0x82   : > { %2006 = vmatpush3.msra.mxu1 %v349_v42  ;;  %1951 = vmatprep.subr.mxu0 %v366_v45  ;;  %v315_v42 = vadd.f32 %v2742_v38, %v295_v37  ;;  %v1005_v38 = vld [vmem:[#allocation8 + $0x78] sm:$0xff] }
  0x83   : > { %2007 = vmatprep.subr.mxu1 %v348_v46  ;;  %1952 = vmatpush3.msra.mxu0 %v366_v45  ;;  %v1004_v45 = vld [vmem:[#allocation8 + $0x70] sm:$0xff] }
  0x84   : > { %1953 = vmatprep.mubr.f32.mxu0 %v300_v47  ;;  %2008 = vmatpush3.msra.mxu1 %v348_v46  ;;  %v1022_v46 = vld [vmem:[#allocation8 + $0xf0] sm:$0xff] }
  0x85   : > { %1954 = vmatmul.mubr.f32.vlgmr.msra.gmra.mxu0 %v2751_v49  ;;  %2010 = vmatmul.mubr.f32.vlgmr.msra.gmra.mxu1 %v300_v47  ;;  %v1003_v47 = vld [vmem:[#allocation8 + $0x68] sm:$0xff] }
  0x86   : > { %2033 = vmatprep.subr.mxu0 %v704_v51  ;;  %1956 = vmatprep.mubr.f32.mxu0 %v2755_v52 }
  0x87   : > { %2034 = vmatpush3.msra.mxu0 %v704_v51  ;;  %2012 = vmatprep.mubr.f32.mxu1 %v2751_v49  ;;  %v1001_v51 = vld [vmem:[#allocation8 + $0x58] sm:$0xff] }
  0x88   : > { %2035 = vmatprep.subr.mxu0 %v703_v55  ;;  %2089 = vmatprep.subr.mxu1 %v1023_v44 }
  0x89   : > { %2036 = vmatpush3.msra.mxu0 %v703_v55  ;;  %2013 = vmatmul.mubr.f32.gmra.mxu1 %v2755_v52  ;;  %v999_v55 = vld [vmem:[#allocation8 + $0x48] sm:$0xff] }
  0x8a   : > { %1957 = vmatmul.mubr.f32.gmra.mxu0 %v2762_v57  ;;  %2037 = vmatprep.subr.mxu0 %v702_v60 }
  0x8b   : > { %1959 = vmatprep.mubr.f32.mxu0 %v2766_v58  ;;  %2038 = vmatpush3.msra.mxu0 %v702_v60  ;;  %v1015_v60 = vld [vmem:[#allocation8 + $0xb8] sm:$0xff] }
  0x8c   : > { %2015 = vmatprep.mubr.f32.mxu1 %v2762_v57  ;;  %2039 = vmatprep.subr.mxu0 %v701_v1 }
  0x8d   : > { %2040 = vmatpush3.msra.mxu0 %v701_v1  ;;  %2016 = vmatmul.mubr.f32.gmra.mxu1 %v2766_v58  ;;  %v1013_v1 = vld [vmem:[#allocation8 + $0xa8] sm:$0xff] }
  0x8e   : > { %1960 = vmatmul.mubr.f32.gmra.mxu0 %v2777_v2  ;;  %2041 = vmatprep.subr.mxu0 %v700_v4 }
  0x8f   : > { %2042 = vmatpush3.msra.mxu0 %v700_v4  ;;  %1962 = vmatprep.mubr.f32.mxu0 %v2782_v5  ;;  %v993_v4 = vld [vmem:[#allocation8 + $0x18] sm:$0xff] }
  0x90   : > { %2043 = vmatprep.subr.mxu0 %v699_v9  ;;  %2018 = vmatprep.mubr.f32.mxu1 %v2777_v2 }
  0x91   : > { %2044 = vmatpush3.msra.mxu0 %v699_v9  ;;  %2019 = vmatmul.mubr.f32.gmra.mxu1 %v2782_v5  ;;  %v1009_v9 = vld [vmem:[#allocation8 + $0x88] sm:$0xff] }
  0x92   : > { %1963 = vmatmul.mubr.f32.gmra.mxu0 %v2790_v10  ;;  %2045 = vmatprep.subr.mxu0 %v698_v12 }
  0x93   : > { %2046 = vmatpush3.msra.mxu0 %v698_v12  ;;  %1965 = vmatprep.mubr.f32.mxu0 %v2795_v13  ;;  %v2836_v12 = vld [vmem:[#allocation8 + $0x178] sm:$0xff] }
  0x94   : > { %2047 = vmatprep.subr.mxu0 %v697_v17  ;;  %2021 = vmatprep.mubr.f32.mxu1 %v2790_v10 }
  0x95   : > { %2048 = vmatpush3.msra.mxu0 %v697_v17  ;;  %2022 = vmatmul.mubr.f32.gmra.mxu1 %v2795_v13 }
  0x96   : > { %1966 = vmatmul.mubr.f32.gmra.mxu0 %v2804_v19  ;;  %2049 = vmatprep.subr.mxu0 %v696_v21 }
  0x97   : > { %2050 = vmatpush3.msra.mxu0 %v696_v21  ;;  %1968 = vmatprep.mubr.f32.mxu0 %v310_v22 }
  0x98   : > { %2051 = vmatprep.subr.mxu0 %v695_v27  ;;  %2024 = vmatprep.mubr.f32.mxu1 %v2804_v19 }
  0x99   : > { %2052 = vmatpush3.msra.mxu0 %v695_v27  ;;  %2025 = vmatmul.mubr.f32.gmra.mxu1 %v310_v22 }
  0x9a   : > { %1969 = vmatmul.mubr.f32.gmra.mxu0 %v311_v28  ;;  %2053 = vmatprep.subr.mxu0 %v694_v31 }
  0x9b   : > { %2054 = vmatpush3.msra.mxu0 %v694_v31  ;;  %1971 = vmatprep.mubr.f32.mxu0 %v312_v32 }
  0x9c   : > { %2055 = vmatprep.subr.mxu0 %v693_v35  ;;  %2027 = vmatprep.mubr.f32.mxu1 %v311_v28 }
  0x9d   : > { %2056 = vmatpush3.msra.mxu0 %v693_v35  ;;  %2028 = vmatmul.mubr.f32.gmra.mxu1 %v312_v32 }
  0x9e   : > { %1972 = vmatmul.mubr.f32.gmra.mxu0 %v313_v36  ;;  %2057 = vmatprep.subr.mxu0 %v692_v39 }
  0x9f   : > { %2058 = vmatpush3.msra.mxu0 %v692_v39  ;;  %1974 = vmatprep.mubr.f32.mxu0 %v314_v40  ;;  %v868_v39 = vsub.s32 2, %v2729_v18 }
  0xa0   : > { %2059 = vmatprep.subr.mxu0 %v691_v41  ;;  %2030 = vmatprep.mubr.f32.mxu1 %v313_v36 }
  0xa1   : > { %2060 = vmatpush3.msra.mxu0 %v691_v41  ;;  %2031 = vmatmul.mubr.f32.gmra.mxu1 %v314_v40 }
  0xa2   : > { %1975 = vmatmul.mubr.f32.gmra.mxu0 %v315_v42  ;;  %2061 = vmatprep.subr.mxu0 %v690_v43 }
  0xa3   : > { %2062 = vmatpush3.msra.mxu0 %v690_v43  ;;  %2065 = vmatprep.mubr.f32.mxu0 %v2751_v49  ;;  %v1002_v49 = vld [vmem:[#allocation8 + $0x60] sm:$0xff] }
  0xa4   : > { %2063 = vmatprep.subr.mxu0 %v689_v29  ;;  %2090 = vmatpush3.msra.mxu1 %v1023_v44 }
  0xa5   : > { %2064 = vmatpush3.msra.mxu0 %v689_v29  ;;  %2091 = vmatprep.subr.mxu1 %v1022_v46 }
  0xa6   : > { %2066 = vmatmul.mubr.f32.vlgmr.msra.gmra.mxu0 %v2755_v52  ;;  %2145 = vmatprep.subr.mxu0 %v1005_v38  ;;  %v1019_v52 = vld [vmem:[#allocation8 + $0xd8] sm:$0xff] }
  0xa7   : > { %2068 = vmatprep.mubr.f32.mxu0 %v2762_v57  ;;  %2146 = vmatpush3.msra.mxu0 %v1005_v38  ;;  %v998_v57 = vld [vmem:[#allocation8 + $0x40] sm:$0xff]  ;;  %v2858_v38 = vrot.slane %v2732_v24, %v868_v39 }
  0xa8   : > { %2147 = vmatprep.subr.mxu0 %v1004_v45  ;;  %2092 = vmatpush3.msra.mxu1 %v1022_v46 }
  0xa9   : > { %2148 = vmatpush3.msra.mxu0 %v1004_v45  ;;  %2093 = vmatprep.subr.mxu1 %v1021_v48  ;;  %v924_v45 = vsub.s32 4, %v2729_v18 }
  0xaa   : > { %2069 = vmatmul.mubr.f32.gmra.mxu0 %v2766_v58  ;;  %2149 = vmatprep.subr.mxu0 %v1003_v47  ;;  %v1016_v58 = vld [vmem:[#allocation8 + $0xc0] sm:$0xff] }
  0xab   : > { %2071 = vmatprep.mubr.f32.mxu0 %v2777_v2  ;;  %2150 = vmatpush3.msra.mxu0 %v1003_v47  ;;  %v994_v2 = vld [vmem:[#allocation8 + $0x20] sm:$0xff] }
  0xac   : > { %2094 = vmatpush3.msra.mxu1 %v1021_v48  ;;  %2151 = vmatprep.subr.mxu0 %v1002_v49 }
  0xad   : > { %2095 = vmatprep.subr.mxu1 %v1020_v50  ;;  %2152 = vmatpush3.msra.mxu0 %v1002_v49 }
  0xae   : > { %2072 = vmatmul.mubr.f32.gmra.mxu0 %v2782_v5  ;;  %2096 = vmatpush3.msra.mxu1 %v1020_v50  ;;  %v1011_v5 = vld [vmem:[#allocation8 + $0x98] sm:$0xff] }
  0xaf   : > { %2074 = vmatprep.mubr.f32.mxu0 %v2790_v10  ;;  %2153 = vmatprep.subr.mxu0 %v1001_v51  ;;  %v990_v10 = vld [vmem:[#allocation8] sm:$0xff] }
  0xb0   : > { %2097 = vmatprep.subr.mxu1 %v1019_v52  ;;  %2154 = vmatpush3.msra.mxu0 %v1001_v51 }
  0xb1   : > { %2098 = vmatpush3.msra.mxu1 %v1019_v52  ;;  %2155 = vmatprep.subr.mxu0 %v1000_v53 }
  0xb2   : > { %2075 = vmatmul.mubr.f32.gmra.mxu0 %v2795_v13  ;;  %2099 = vmatprep.subr.mxu1 %v1018_v54 }
  0xb3   : > { %2077 = vmatprep.mubr.f32.mxu0 %v2804_v19  ;;  %2156 = vmatpush3.msra.mxu0 %v1000_v53 }
  0xb4   : > { %2100 = vmatpush3.msra.mxu1 %v1018_v54  ;;  %2157 = vmatprep.subr.mxu0 %v999_v55  ;;  %v2866_v54 = vrot.slane %v2732_v24, %v924_v45 }
  0xb5   : > { %2101 = vmatprep.subr.mxu1 %v1017_v56  ;;  %2158 = vmatpush3.msra.mxu0 %v999_v55 }
  0xb6   : > { %2078 = vmatmul.mubr.f32.gmra.mxu0 %v310_v22  ;;  %2102 = vmatpush3.msra.mxu1 %v1017_v56 }
  0xb7   : > { %2080 = vmatprep.mubr.f32.mxu0 %v311_v28  ;;  %2159 = vmatprep.subr.mxu0 %v998_v57 }
  0xb8   : > { %2103 = vmatprep.subr.mxu1 %v1016_v58  ;;  %2160 = vmatpush3.msra.mxu0 %v998_v57 }
  0xb9   : > { %2104 = vmatpush3.msra.mxu1 %v1016_v58  ;;  %2161 = vmatprep.subr.mxu0 %v997_v59 }
  0xba   : > { %2081 = vmatmul.mubr.f32.gmra.mxu0 %v312_v32  ;;  %2105 = vmatprep.subr.mxu1 %v1015_v60 }
  0xbb   : > { %2083 = vmatprep.mubr.f32.mxu0 %v313_v36  ;;  %2162 = vmatpush3.msra.mxu0 %v997_v59 }
  0xbc   : > { %2106 = vmatpush3.msra.mxu1 %v1015_v60  ;;  %2163 = vmatprep.subr.mxu0 %v996_v61 }
  0xbd   : > { %2107 = vmatprep.subr.mxu1 %v1014_v62  ;;  %2164 = vmatpush3.msra.mxu0 %v996_v61 }
  0xbe   : > { %2084 = vmatmul.mubr.f32.gmra.mxu0 %v314_v40  ;;  %2108 = vmatpush3.msra.mxu1 %v1014_v62 }
  0xbf   : > { %2086 = vmatprep.mubr.f32.mxu0 %v315_v42  ;;  %2165 = vmatprep.subr.mxu0 %v995_v63  ;;  %v888_v42 = vsub.s32 3, %v2729_v18 }
  0xc0   : > { %2109 = vmatprep.subr.mxu1 %v1013_v1  ;;  %2166 = vmatpush3.msra.mxu0 %v995_v63 }
  0xc1   : > { %2110 = vmatpush3.msra.mxu1 %v1013_v1  ;;  %2167 = vmatprep.subr.mxu0 %v994_v2  ;;  %v2862_v49 = vrot.slane %v2732_v24, %v888_v42 }
  0xc2   : > { %2087 = vmatmul.mubr.f32.gmra.mxu0 %v2529_v0  ;;  %2111 = vmatprep.subr.mxu1 %v1012_v3 }
  0xc3   : > { %2177 = vmatprep.mubr.f32.mxu0 %v2529_v0  ;;  %2168 = vmatpush3.msra.mxu0 %v994_v2 }
  0xc4   : > { %2112 = vmatpush3.msra.mxu1 %v1012_v3  ;;  %2169 = vmatprep.subr.mxu0 %v993_v4 }
  0xc5   : > { %2113 = vmatprep.subr.mxu1 %v1011_v5  ;;  %2170 = vmatpush3.msra.mxu0 %v993_v4 }
  0xc6   : > { %2114 = vmatpush3.msra.mxu1 %v1011_v5  ;;  %2171 = vmatprep.subr.mxu0 %v992_v6 }
  0xc7   : > { %2115 = vmatprep.subr.mxu1 %v1010_v7  ;;  %2172 = vmatpush3.msra.mxu0 %v992_v6 }
  0xc8   : > { %2116 = vmatpush3.msra.mxu1 %v1010_v7  ;;  %2173 = vmatprep.subr.mxu0 %v991_v8 }
  0xc9   : > { %2117 = vmatprep.subr.mxu1 %v1009_v9  ;;  %2174 = vmatpush3.msra.mxu0 %v991_v8 }
  0xca   : > { %2118 = vmatpush3.msra.mxu1 %v1009_v9  ;;  %2175 = vmatprep.subr.mxu0 %v990_v10 }
  0xcb   : > { %2119 = vmatprep.subr.mxu1 %v1008_v11  ;;  %2176 = vmatpush3.msra.mxu0 %v990_v10 }
  0xcc   : > { %2120 = vmatpush3.msra.mxu1 %v1008_v11 }
  0xcd   : > { %2201 = vmatprep.subr.mxu1 %v2836_v12 }
 0x145   : > { %v1955_v13 = vpop.f32.mrf.mxu0  ;;  %v2011_v14 = vpop.f32.mrf.mxu1 }
 0x146   : > { %v599_v29 = vadd.f32 %v2011_v14, %v1955_v13 }
 0x147   : > { %v448_v15 = vpop.f32.mrf.mxu0  ;;  %v593_v16 = vpop.f32.mrf.mxu1 }
 0x148   : > { %v594_v46 = vadd.f32 %v593_v16, %v448_v15 }
 0x149   : > { %v2014_v19 = vpop.f32.mrf.mxu1 }
 0x14a   : > { %v1958_v17 = vpop.f32.mrf.mxu0 }
 0x14b   : > { %v603_v22 = vpop.f32.mrf.mxu1  ;;  %v609_v51 = vadd.f32 %v2014_v19, %v1958_v17 }
 0x14c   : > { %v458_v20 = vpop.f32.mrf.mxu0 }
 0x14d   : > { %v2017_v26 = vpop.f32.mrf.mxu1  ;;  %v604_v56 = vadd.f32 %v603_v22, %v458_v20 }
 0x14e   : > { %v1961_v21 = vpop.f32.mrf.mxu0 }
 0x14f   : > { %v613_v30 = vpop.f32.mrf.mxu1  ;;  %v619_v62 = vadd.f32 %v2017_v26, %v1961_v21  ;;  %v1345_v26 = vld [vmem:[#allocation8 + $0x170] sm:$0xff] }
 0x150   : > { %v468_v23 = vpop.f32.mrf.mxu0 }
 0x151   : > { %v2020_v33 = vpop.f32.mrf.mxu1  ;;  %v614_v3 = vadd.f32 %v613_v30, %v468_v23 }
 0x152   : > { %v1964_v25 = vpop.f32.mrf.mxu0 }
 0x153   : > { %v623_v36 = vpop.f32.mrf.mxu1  ;;  %v629_v11 = vadd.f32 %v2020_v33, %v1964_v25 }
 0x154   : > { %v478_v27 = vpop.f32.mrf.mxu0 }
 0x155   : > { %v2023_v41 = vpop.f32.mrf.mxu1  ;;  %v624_v16 = vadd.f32 %v623_v36, %v478_v27 }
 0x156   : > { %v2839_v28 = vpop.f32.mrf.mxu0 }
 0x157   : > { %v633_v47 = vpop.f32.mrf.mxu1  ;;  %v639_v36 = vadd.f32 %v2023_v41, %v2839_v28 }
 0x158   : > { %v2841_v31 = vpop.f32.mrf.mxu0 }
 0x159   : > { %v2026_v57 = vpop.f32.mrf.mxu1 }
 0x15a   : > { %v2843_v32 = vpop.f32.mrf.mxu0 }
 0x15b   : > { %v643_v5 = vpop.f32.mrf.mxu1  ;;  %v649_v45 = vadd.f32 %v2026_v57, %v2843_v32 }
 0x15c   : > { %v2845_v34 = vpop.f32.mrf.mxu0 }
 0x15d   : > { %v2029_v21 = vpop.f32.mrf.mxu1 }
 0x15e   : > { %v2847_v35 = vpop.f32.mrf.mxu0 }
 0x160   : > { %v2849_v37 = vpop.f32.mrf.mxu0 }
 0x162   : > { %v2852_v40 = vpop.f32.mrf.mxu0 }
 0x164   : > { %v2855_v43 = vpop.f32.mrf.mxu0 }
 0x166   : > { %v2067_v44 = vpop.f32.mrf.mxu0 }
 0x167   : > { %v851_v48 = vadd.f32 %v2067_v44, %v599_v29  ;;  %v634_v44 = vadd.f32 %v633_v47, %v2841_v31  ;;  %v1343_v47 = vld [vmem:[#allocation8 + $0x160] sm:$0xff] }
 0x168   : > { %v771_v50 = vpop.f32.mrf.mxu0 }
 0x169   : > { %v871_v52 = vmul.f32 %v2858_v38, %v851_v48  ;;  %v850_v53 = vadd.f32 %v771_v50, %v594_v46  ;;  %v1344_v50 = vld [vmem:[#allocation8 + $0x168] sm:$0xff] }
 0x16a   : > { %v2070_v55 = vpop.f32.mrf.mxu0 }
 0x16b   : > { %v891_v58 = vadd.f32 %v2862_v49, %v871_v52  ;;  %v870_v59 = vmul.f32 %v2858_v38, %v850_v53  ;;  %v853_v60 = vadd.f32 %v2070_v55, %v609_v51  ;;  %v653_v51 = vpop.f32.mrf.mxu1 }
 0x16c   : > { %v781_v61 = vpop.f32.mrf.mxu0 }
 0x16d   : > { %v890_v63 = vadd.f32 %v2862_v49, %v870_v59  ;;  %v873_v1 = vmul.f32 %v2858_v38, %v853_v60  ;;  %v852_v2 = vadd.f32 %v781_v61, %v604_v56  ;;  %v927_v4 = vmul.f32 %v2866_v54, %v891_v58 }
 0x16e   : > { %v2073_v24 = vpop.f32.mrf.mxu0  ;;  %vm907_vm0 = vcmp.ge.f32.partialorder %v891_v58, 0.0  ;;  %v659_v59 = vadd.f32 %v2029_v21, %v2847_v35 }
 0x16f   : > { %v893_v6 = vadd.f32 %v2862_v49, %v873_v1  ;;  %v872_v7 = vmul.f32 %v2858_v38, %v852_v2  ;;  %v855_v8 = vadd.f32 %v2073_v24, %v619_v62  ;;  %vm906_vm1 = vcmp.ge.f32.partialorder %v890_v63, 0.0  ;;  %v2032_v62 = vpop.f32.mrf.mxu1 }
 0x170   : > { %v791_v9 = vpop.f32.mrf.mxu0  ;;  %v926_v10 = vmul.f32 %v2866_v54, %v890_v63  ;;  %v2878_v20 = vsel %vm907_vm0, %v891_v58, %v927_v4  ;;  %v644_v58 = vadd.f32 %v643_v5, %v2845_v34 }
 0x171   : > { %v892_v13 = vadd.f32 %v2862_v49, %v872_v7  ;;  %v875_v14 = vmul.f32 %v2858_v38, %v855_v8  ;;  %v854_v15 = vadd.f32 %v791_v9, %v614_v3  ;;  %v929_v25 = vmul.f32 %v2866_v54, %v893_v6  ;;  %v1342_v3 = vld [vmem:[#allocation8 + $0x158] sm:$0xff]  ;;  %v1341_v8 = vld [vmem:[#allocation8 + $0x150] sm:$0xff] }
 0x172   : > { %v2076_v17 = vpop.f32.mrf.mxu0  ;;  %v942_v19 = vsel %vm906_vm1, %v890_v63, %v926_v10  ;;  %vm909_vm3 = vcmp.ge.f32.partialorder %v893_v6, 0.0  ;;  %v654_v9 = vadd.f32 %v653_v51, %v2849_v37  ;;  %v669_v10 = vadd.f32 %v2032_v62, %v2852_v40 }
 0x173   : > { %v874_v22 = vmul.f32 %v2858_v38, %v854_v15  ;;  %v857_v23 = vadd.f32 %v2076_v17, %v629_v11  ;;  %2121 = vmatprep.mubr.f32.mxu1 %v942_v19  ;;  %2178 = vmatmul.mubr.f32.vlgmr.msra.gmra.mxu0 %v942_v19  ;;  %vm908_vm2 = vcmp.ge.f32.partialorder %v892_v13, 0.0  ;;  %v895_v30 = vadd.f32 %v2862_v49, %v875_v14  ;;  %v663_v14 = vpop.f32.mrf.mxu1  ;;  %v1340_v17 = vld [vmem:[#allocation8 + $0x148] sm:$0xff] }
 0x174   : > { %2122 = vmatmul.mubr.f32.vlgmr.msra.gmra.mxu1 %v2878_v20  ;;  %2180 = vmatprep.mubr.f32.mxu0 %v2878_v20  ;;  %v801_v27 = vpop.f32.mrf.mxu0  ;;  %v928_v33 = vmul.f32 %v2866_v54, %v892_v13 }
 0x175   : > { %v894_v39 = vadd.f32 %v2862_v49, %v874_v22  ;;  %v877_v42 = vmul.f32 %v2858_v38, %v857_v23  ;;  %v856_v29 = vadd.f32 %v801_v27, %v624_v16  ;;  %2202 = vmatpush3.msra.mxu1 %v2836_v12  ;;  %v2899_v12 = vsel %vm909_vm3, %v893_v6, %v929_v25 }
 0x176   : > { %2203 = vmatprep.subr.mxu1 %v1345_v26  ;;  %v2079_v46 = vpop.f32.mrf.mxu0  ;;  %v2893_v48 = vsel %vm908_vm2, %v892_v13, %v928_v33  ;;  %v931_v53 = vmul.f32 %v2866_v54, %v895_v30  ;;  %vm911_vm5 = vcmp.ge.f32.partialorder %v895_v30, 0.0  ;;  %v664_v27 = vadd.f32 %v663_v14, %v2855_v43 }
 0x177   : > { %v876_v28 = vmul.f32 %v2858_v38, %v856_v29  ;;  %v859_v41 = vadd.f32 %v2079_v46, %v639_v36  ;;  %2124 = vmatprep.mubr.f32.mxu1 %v2893_v48  ;;  %2181 = vmatmul.mubr.f32.gmra.mxu0 %v2893_v48  ;;  %vm910_vm4 = vcmp.ge.f32.partialorder %v894_v39, 0.0  ;;  %v897_v31 = vadd.f32 %v2862_v49, %v877_v42 }
 0x178   : > { %2204 = vmatpush3.msra.mxu1 %v1345_v26  ;;  %2183 = vmatprep.mubr.f32.mxu0 %v2899_v12  ;;  %v811_v32 = vpop.f32.mrf.mxu0  ;;  %v930_v52 = vmul.f32 %v2866_v54, %v894_v39  ;;  %v2918_v34 = vsel %vm911_vm5, %v895_v30, %v931_v53  ;;  %v1339_v30 = vld [vmem:[#allocation8 + $0x140] sm:$0xff] }
 0x179   : > { %v896_v55 = vadd.f32 %v2862_v49, %v876_v28  ;;  %v879_v56 = vmul.f32 %v2858_v38, %v859_v41  ;;  %2125 = vmatmul.mubr.f32.gmra.mxu1 %v2899_v12  ;;  %2205 = vmatprep.subr.mxu1 %v1344_v50  ;;  %v858_v57 = vadd.f32 %v811_v32, %v634_v44  ;;  %vm913_vm7 = vcmp.ge.f32.partialorder %v897_v31, 0.0  ;;  %v1338_v44 = vld [vmem:[#allocation8 + $0x138] sm:$0xff] }
 0x17a   : > { %2206 = vmatpush3.msra.mxu1 %v1344_v50  ;;  %v2082_v60 = vpop.f32.mrf.mxu0  ;;  %v2911_v61 = vsel %vm910_vm4, %v894_v39, %v930_v52  ;;  %v933_v24 = vmul.f32 %v2866_v54, %v897_v31  ;;  %v1336_v52 = vld [vmem:[#allocation8 + $0x128] sm:$0xff] }
 0x17b   : > { %v899_v63 = vadd.f32 %v2862_v49, %v879_v56  ;;  %v878_v1 = vmul.f32 %v2858_v38, %v858_v57  ;;  %2207 = vmatprep.subr.mxu1 %v1343_v47  ;;  %v861_v2 = vadd.f32 %v2082_v60, %v649_v45  ;;  %2127 = vmatprep.mubr.f32.mxu1 %v2911_v61  ;;  %vm912_vm6 = vcmp.ge.f32.partialorder %v896_v55, 0.0 }
 0x17c   : > { %2184 = vmatmul.mubr.f32.gmra.mxu0 %v2911_v61  ;;  %2208 = vmatpush3.msra.mxu1 %v1343_v47  ;;  %v821_v35 = vpop.f32.mrf.mxu0  ;;  %v932_v4 = vmul.f32 %v2866_v54, %v896_v55  ;;  %v2937_v40 = vsel %vm913_vm7, %v897_v31, %v933_v24  ;;  %v1337_v31 = vld [vmem:[#allocation8 + $0x130] sm:$0xff] }
 0x17d   : > { %v898_v5 = vadd.f32 %v2862_v49, %v878_v1  ;;  %v881_v6 = vmul.f32 %v2858_v38, %v861_v2  ;;  %2128 = vmatmul.mubr.f32.gmra.mxu1 %v2918_v34  ;;  %2186 = vmatprep.mubr.f32.mxu0 %v2918_v34  ;;  %v860_v7 = vadd.f32 %v821_v35, %v644_v58  ;;  %vm915_vm9 = vcmp.ge.f32.partialorder %v899_v63, 0.0  ;;  %v1333_v1 = vld [vmem:[#allocation8 + $0x110] sm:$0xff] }
 0x17e   : > { %2209 = vmatprep.subr.mxu1 %v1342_v3  ;;  %v2085_v11 = vpop.f32.mrf.mxu0  ;;  %v2929_v13 = vsel %vm912_vm6, %v896_v55, %v932_v4  ;;  %v935_v19 = vmul.f32 %v2866_v54, %v899_v63  ;;  %v1331_v4 = vld [vmem:[#allocation8 + $0x100] sm:$0xff] }
 0x17f   : > { %v880_v15 = vmul.f32 %v2858_v38, %v860_v7  ;;  %2210 = vmatpush3.msra.mxu1 %v1342_v3  ;;  %v863_v16 = vadd.f32 %v2085_v11, %v659_v59  ;;  %2130 = vmatprep.mubr.f32.mxu1 %v2929_v13  ;;  %vm914_vm8 = vcmp.ge.f32.partialorder %v898_v5, 0.0  ;;  %v901_v37 = vadd.f32 %v2862_v49, %v881_v6  ;;  %v1335_v59 = vld [vmem:[#allocation8 + $0x120] sm:$0xff]  ;;  %v1332_v3 = vld [vmem:[#allocation8 + $0x108] sm:$0xff] }
 0x180   : > { %2211 = vmatprep.subr.mxu1 %v1341_v8  ;;  %2187 = vmatmul.mubr.f32.gmra.mxu0 %v2929_v13  ;;  %v831_v21 = vpop.f32.mrf.mxu0  ;;  %v934_v22 = vmul.f32 %v2866_v54, %v898_v5  ;;  %v2951_v29 = vsel %vm915_vm9, %v899_v63, %v935_v19 }
 0x181   : > { %v900_v23 = vadd.f32 %v2862_v49, %v880_v15  ;;  %v883_v26 = vmul.f32 %v2858_v38, %v863_v16  ;;  %2212 = vmatpush3.msra.mxu1 %v1341_v8  ;;  %2189 = vmatprep.mubr.f32.mxu0 %v2937_v40  ;;  %v862_v25 = vadd.f32 %v831_v21, %v654_v9  ;;  %vm917_vm11 = vcmp.ge.f32.partialorder %v901_v37, 0.0 }
 0x182   : > { %2131 = vmatmul.mubr.f32.gmra.mxu1 %v2937_v40  ;;  %2213 = vmatprep.subr.mxu1 %v1340_v17  ;;  %v2088_v33 = vpop.f32.mrf.mxu0  ;;  %v2946_v36 = vsel %vm914_vm8, %v898_v5, %v934_v22  ;;  %v937_v50 = vmul.f32 %v2866_v54, %v901_v37 }
 0x183   : > { %v882_v39 = vmul.f32 %v2858_v38, %v862_v25  ;;  %2214 = vmatpush3.msra.mxu1 %v1340_v17  ;;  %v865_v42 = vadd.f32 %v2088_v33, %v669_v10  ;;  %2133 = vmatprep.mubr.f32.mxu1 %v2946_v36  ;;  %vm916_vm10 = vcmp.ge.f32.partialorder %v900_v23, 0.0  ;;  %v903_v43 = vadd.f32 %v2862_v49, %v883_v26 }
 0x184   : > { %2215 = vmatprep.subr.mxu1 %v1339_v30  ;;  %2190 = vmatmul.mubr.f32.gmra.mxu0 %v2946_v36  ;;  %v841_v45 = vpop.f32.mrf.mxu0  ;;  %v936_v46 = vmul.f32 %v2866_v54, %v900_v23  ;;  %v953_v55 = vsel %vm917_vm11, %v901_v37, %v937_v50 }
 0x185   : > { %v902_v51 = vadd.f32 %v2862_v49, %v882_v39  ;;  %v885_v28 = vmul.f32 %v2858_v38, %v865_v42  ;;  %2216 = vmatpush3.msra.mxu1 %v1339_v30  ;;  %2192 = vmatprep.mubr.f32.mxu0 %v2951_v29  ;;  %v864_v41 = vadd.f32 %v841_v45, %v664_v27  ;;  %vm919_vm13 = vcmp.ge.f32.partialorder %v903_v43, 0.0  ;;  %v2341_v30 = vld [vmem:[#allocation9] sm:$0xff] }
 0x186   : > { %2134 = vmatmul.mubr.f32.gmra.mxu1 %v2951_v29  ;;  %2217 = vmatprep.subr.mxu1 %v1338_v44  ;;  %v952_v32 = vsel %vm916_vm10, %v900_v23, %v936_v46  ;;  %v939_v56 = vmul.f32 %v2866_v54, %v903_v43  ;;  %v1530_v23 = vsub.s32 6, %v2729_v18 }
 0x187   : > { %v884_v47 = vmul.f32 %v2858_v38, %v864_v41  ;;  %2218 = vmatpush3.msra.mxu1 %v1338_v44  ;;  %2136 = vmatprep.mubr.f32.mxu1 %v952_v32  ;;  %vm918_vm12 = vcmp.ge.f32.partialorder %v902_v51, 0.0  ;;  %v938_v53 = vmul.f32 %v2866_v54, %v902_v51  ;;  %v905_v57 = vadd.f32 %v2862_v49, %v885_v28  ;;  %v1334_v38 = vld [vmem:[#allocation8 + $0x118] sm:$0xff] }
 0x188   : > { %2219 = vmatprep.subr.mxu1 %v1337_v31  ;;  %2193 = vmatmul.mubr.f32.gmra.mxu0 %v952_v32  ;;  %v955_v63 = vsel %vm919_vm13, %v903_v43, %v939_v56 }
 0x189   : > { %v904_v58 = vadd.f32 %v2862_v49, %v884_v47  ;;  %2220 = vmatpush3.msra.mxu1 %v1337_v31  ;;  %2195 = vmatprep.mubr.f32.mxu0 %v953_v55  ;;  %v954_v60 = vsel %vm918_vm12, %v902_v51, %v938_v53  ;;  %v941_v2 = vmul.f32 %v2866_v54, %v905_v57  ;;  %vm921_vm15 = vcmp.ge.f32.partialorder %v905_v57, 0.0 }
 0x18a   : > { %2137 = vmatmul.mubr.f32.gmra.mxu1 %v953_v55  ;;  %2221 = vmatprep.subr.mxu1 %v1336_v52 }
 0x18b   : > { %2222 = vmatpush3.msra.mxu1 %v1336_v52  ;;  %2139 = vmatprep.mubr.f32.mxu1 %v954_v60  ;;  %vm920_vm14 = vcmp.ge.f32.partialorder %v904_v58, 0.0  ;;  %v940_v62 = vmul.f32 %v2866_v54, %v904_v58  ;;  %v957_v35 = vsel %vm921_vm15, %v905_v57, %v941_v2  ;;  %v1548_v52 = vld [vmem:[%s2714_s14] sm:$0xff] }
 0x18c   : > { %2223 = vmatprep.subr.mxu1 %v1335_v59  ;;  %2196 = vmatmul.mubr.f32.gmra.mxu0 %v954_v60 }
 0x18d   : > { %2224 = vmatpush3.msra.mxu1 %v1335_v59  ;;  %2198 = vmatprep.mubr.f32.mxu0 %v955_v63  ;;  %v956_v49 = vsel %vm920_vm14, %v904_v58, %v940_v62 }
 0x18e   : > { %2140 = vmatmul.mubr.f32.gmra.mxu1 %v955_v63  ;;  %2225 = vmatprep.subr.mxu1 %v1334_v38 }
 0x18f   : > { %2226 = vmatpush3.msra.mxu1 %v1334_v38  ;;  %2142 = vmatprep.mubr.f32.mxu1 %v956_v49 }
 0x190   : > { %2227 = vmatprep.subr.mxu1 %v1333_v1  ;;  %2199 = vmatmul.mubr.f32.gmra.mxu0 %v956_v49 }
 0x191   : > { %2228 = vmatpush3.msra.mxu1 %v1333_v1 }
 0x192   : > { %2143 = vmatmul.mubr.f32.gmra.mxu1 %v957_v35  ;;  %2229 = vmatprep.subr.mxu1 %v1332_v3 }
 0x193   : > { %2230 = vmatpush3.msra.mxu1 %v1332_v3  ;;  %2233 = vmatprep.mubr.f32.mxu1 %v2878_v20 }
 0x194   : > { %2231 = vmatprep.subr.mxu1 %v1331_v4 }
 0x195   : > { %2232 = vmatpush3.msra.mxu1 %v1331_v4 }
 0x196   : > { %2234 = vmatmul.mubr.f32.vlgmr.msra.gmra.mxu1 %v2893_v48 }
 0x197   : > { %2236 = vmatprep.mubr.f32.mxu1 %v2899_v12 }
 0x19a   : > { %2237 = vmatmul.mubr.f32.gmra.mxu1 %v2911_v61 }
 0x19b   : > { %2239 = vmatprep.mubr.f32.mxu1 %v2918_v34 }
 0x19e   : > { %2240 = vmatmul.mubr.f32.gmra.mxu1 %v2929_v13 }
 0x19f   : > { %2242 = vmatprep.mubr.f32.mxu1 %v2937_v40  ;;  %v1510_v40 = vsub.s32 5, %v2729_v18  ;;  %v1549_v18 = vld [vmem:[%s2714_s14 + $0x8] sm:$0xff] }
 0x1a1   : > { %v2997_v27 = vrot.slane %v2341_v30, %v1510_v40 }
 0x1a2   : > { %2243 = vmatmul.mubr.f32.gmra.mxu1 %v2946_v36 }
 0x1a3   : > { %2245 = vmatprep.mubr.f32.mxu1 %v2951_v29  ;;  %v2999_v29 = vrot.slane %v2341_v30, %v1530_v23 }
 0x1a6   : > { %2246 = vmatmul.mubr.f32.gmra.mxu1 %v952_v32 }
 0x1a7   : > { %2248 = vmatprep.mubr.f32.mxu1 %v953_v55 }
 0x1aa   : > { %2249 = vmatmul.mubr.f32.gmra.mxu1 %v954_v60  ;;  %v1551_v60 = vld [vmem:[%s2714_s14 + $0x18] sm:$0xff] }
 0x1ab   : > { %2251 = vmatprep.mubr.f32.mxu1 %v955_v63 }
 0x1ae   : > { %2252 = vmatmul.mubr.f32.gmra.mxu1 %v956_v49 }
 0x1af   : > { %2254 = vmatprep.mubr.f32.mxu1 %v957_v35  ;;  %v1550_v35 = vld [vmem:[%s2714_s14 + $0x10] sm:$0xff] }
 0x1b2   : > { %2255 = vmatmul.mubr.f32.gmra.mxu1 %v2529_v0 }
 0x233   : > { %v2179_v54 = vpop.f32.mrf.mxu0 }
 0x234   : > { %v2123_v20 = vpop.f32.mrf.mxu1 }
 0x235   : > { %v1235_v12 = vpop.f32.mrf.mxu0  ;;  %v1241_v25 = vadd.f32 %v2179_v54, %v2123_v20 }
 0x236   : > { %v1090_v48 = vpop.f32.mrf.mxu1 }
 0x237   : > { %v2182_v34 = vpop.f32.mrf.mxu0  ;;  %v1236_v36 = vadd.f32 %v1235_v12, %v1090_v48 }
 0x239   : > { %v2126_v61 = vpop.f32.mrf.mxu1  ;;  %v1245_v6 = vpop.f32.mrf.mxu0 }
 0x23a   : > { %v1251_v43 = vadd.f32 %v2182_v34, %v2126_v61  ;;  %v1553_v34 = vld [vmem:[%s2714_s14 + $0x28] sm:$0xff] }
 0x23b   : > { %v1100_v24 = vpop.f32.mrf.mxu1 }
 0x23c   : > { %v2185_v9 = vpop.f32.mrf.mxu0  ;;  %v1246_v51 = vadd.f32 %v1245_v6, %v1100_v24 }
 0x23d   : > { %v2129_v5 = vpop.f32.mrf.mxu1 }
 0x23e   : > { %v1255_v13 = vpop.f32.mrf.mxu0  ;;  %v1261_v47 = vadd.f32 %v2185_v9, %v2129_v5 }
 0x23f   : > { %v1110_v7 = vpop.f32.mrf.mxu1 }
 0x240   : > { %v2188_v0 = vpop.f32.mrf.mxu0  ;;  %v1256_v59 = vadd.f32 %v1255_v13, %v1110_v7 }
 0x242   : > { %v2132_v8 = vpop.f32.mrf.mxu1  ;;  %v1265_v19 = vpop.f32.mrf.mxu0 }
 0x243   : > { %v1271_v3 = vadd.f32 %v2188_v0, %v2132_v8  ;;  %v1552_v0 = vld [vmem:[%s2714_s14 + $0x20] sm:$0xff] }
 0x244   : > { %v1120_v10 = vpop.f32.mrf.mxu1  ;;  %v2191_v22 = vpop.f32.mrf.mxu0 }
 0x245   : > { %v1266_v61 = vadd.f32 %v1265_v19, %v1120_v10 }
 0x246   : > { %v2979_v11 = vpop.f32.mrf.mxu1  ;;  %v1275_v39 = vpop.f32.mrf.mxu0 }
 0x247   : > { %v1281_v13 = vadd.f32 %v2191_v22, %v2979_v11 }
 0x248   : > { %v2981_v14 = vpop.f32.mrf.mxu1  ;;  %v2194_v28 = vpop.f32.mrf.mxu0 }
 0x249   : > { %v1276_v30 = vadd.f32 %v1275_v39, %v2981_v14 }
 0x24a   : > { %v2983_v15 = vpop.f32.mrf.mxu1  ;;  %v1285_v62 = vpop.f32.mrf.mxu0 }
 0x24c   : > { %v2985_v16 = vpop.f32.mrf.mxu1  ;;  %v2197_v5 = vpop.f32.mrf.mxu0 }
 0x24e   : > { %v2987_v17 = vpop.f32.mrf.mxu1 }
 0x250   : > { %v2989_v37 = vpop.f32.mrf.mxu1 }
 0x252   : > { %v2992_v21 = vpop.f32.mrf.mxu1 }
 0x254   : > { %v2995_v26 = vpop.f32.mrf.mxu1 }
 0x256   : > { %v2235_v33 = vpop.f32.mrf.mxu1 }
 0x257   : > { %v1493_v42 = vadd.f32 %v2235_v33, %v1241_v25  ;;  %v1555_v33 = vld [vmem:[%s2714_s14 + $0x38] sm:$0xff] }
 0x258   : > { %v1413_v44 = vpop.f32.mrf.mxu1 }
 0x259   : > { %v1513_v45 = vmul.f32 %v2997_v27, %v1493_v42  ;;  %v1492_v46 = vadd.f32 %v1413_v44, %v1236_v36  ;;  %v1295_v42 = vpop.f32.mrf.mxu0 }
 0x25a   : > { %v2238_v50 = vpop.f32.mrf.mxu1 }
 0x25b   : > { %v1533_v41 = vadd.f32 %v2999_v29, %v1513_v45  ;;  %v1512_v31 = vmul.f32 %v2997_v27, %v1492_v46  ;;  %v1495_v32 = vadd.f32 %v2238_v50, %v1251_v43  ;;  %v1291_v45 = vadd.f32 %v2194_v28, %v2983_v15  ;;  %v1554_v46 = vld [vmem:[%s2714_s14 + $0x30] sm:$0xff] }
 0x25c   : > { %v1423_v53 = vpop.f32.mrf.mxu1 }
 0x25d   : > { %v1565_v55 = vadd.f32 %v1549_v18, %v1533_v41  ;;  %v1532_v56 = vadd.f32 %v2999_v29, %v1512_v31  ;;  %v1515_v57 = vmul.f32 %v2997_v27, %v1495_v32  ;;  %v1494_v58 = vadd.f32 %v1423_v53, %v1246_v51  ;;  %v1557_v31 = vld [vmem:[%s2714_s14 + $0x48] sm:$0xff] }
 0x25e   : > { %v2241_v38 = vpop.f32.mrf.mxu1  ;;  %v1286_v41 = vadd.f32 %v1285_v62, %v2985_v16  ;;  %v1559_v62 = vld [vmem:[%s2714_s14 + $0x58] sm:$0xff] }
 0x25f   : > { %1581 = vst [vmem:[%s3011_s26 + $0x8] sm:$0xff] %v1565_v55  ;;  %v1564_v63 = vadd.f32 %v1548_v52, %v1532_v56  ;;  %v1535_v1 = vadd.f32 %v2999_v29, %v1515_v57  ;;  %v1514_v49 = vmul.f32 %v2997_v27, %v1494_v58  ;;  %v1497_v2 = vadd.f32 %v2241_v38, %v1261_v47  ;;  %v2200_v47 = vpop.f32.mrf.mxu0  ;;  %v1556_v56 = vld [vmem:[%s2714_s14 + $0x40] sm:$0xff] }
 0x260   : > { %v1433_v4 = vpop.f32.mrf.mxu1  ;;  %v1301_v55 = vadd.f32 %v2197_v5, %v2987_v17  ;;  %v1296_v38 = vadd.f32 %v1295_v42, %v2989_v37 }
 0x261   : > { %1580 = vst [vmem:[%s3011_s26] sm:$0xff] %v1564_v63  ;;  %v1567_v54 = vadd.f32 %v1551_v60, %v1535_v1  ;;  %v1534_v20 = vadd.f32 %v2999_v29, %v1514_v49  ;;  %v1517_v48 = vmul.f32 %v2997_v27, %v1497_v2  ;;  %v1496_v12 = vadd.f32 %v1433_v4, %v1256_v59  ;;  %v1305_v1 = vpop.f32.mrf.mxu0  ;;  %v1558_v4 = vld [vmem:[%s2714_s14 + $0x50] sm:$0xff] }
 0x262   : > { %v2244_v24 = vpop.f32.mrf.mxu1 }
 0x263   : > { %1583 = vst [vmem:[%s3011_s26 + $0x18] sm:$0xff] %v1567_v54  ;;  %v1566_v6 = vadd.f32 %v1550_v35, %v1534_v20  ;;  %v1537_v7 = vadd.f32 %v2999_v29, %v1517_v48  ;;  %v1516_v8 = vmul.f32 %v2997_v27, %v1496_v12  ;;  %v1499_v9 = vadd.f32 %v2244_v24, %v1271_v3 }
 0x264   : > { %v1443_v40 = vpop.f32.mrf.mxu1  ;;  %v1311_v35 = vadd.f32 %v2200_v47, %v2992_v21 }
 0x265   : > { %1582 = vst [vmem:[%s3011_s26 + $0x10] sm:$0xff] %v1566_v6  ;;  %v1569_v23 = vadd.f32 %v1553_v34, %v1537_v7  ;;  %v1536_v10 = vadd.f32 %v2999_v29, %v1516_v8  ;;  %v1519_v19 = vmul.f32 %v2997_v27, %v1499_v9  ;;  %v1498_v25 = vadd.f32 %v1443_v40, %v1266_v61  ;;  %v1561_v34 = vld [vmem:[%s2714_s14 + $0x68] sm:$0xff]  ;;  %v1560_v8 = vld [vmem:[%s2714_s14 + $0x60] sm:$0xff] }
 0x266   : > { %v2247_v36 = vpop.f32.mrf.mxu1  ;;  %v1306_v61 = vadd.f32 %v1305_v1, %v2995_v26 }
 0x267   : > { %1585 = vst [vmem:[%s3011_s26 + $0x28] sm:$0xff] %v1569_v23  ;;  %v1568_v44 = vadd.f32 %v1552_v0, %v1536_v10  ;;  %v1539_v11 = vadd.f32 %v2999_v29, %v1519_v19  ;;  %v1518_v22 = vmul.f32 %v2997_v27, %v1498_v25  ;;  %v1501_v43 = vadd.f32 %v2247_v36, %v1281_v13  ;;  %v1563_v23 = vld [vmem:[%s2714_s14 + $0x78] sm:$0xff] }
 0x268   : > { %v1453_v18 = vpop.f32.mrf.mxu1 }
 0x269   : > { %1584 = vst [vmem:[%s3011_s26 + $0x20] sm:$0xff] %v1568_v44  ;;  %v1571_v50 = vadd.f32 %v1555_v33, %v1539_v11  ;;  %v1538_v14 = vadd.f32 %v2999_v29, %v1518_v22  ;;  %v1521_v39 = vmul.f32 %v2997_v27, %v1501_v43  ;;  %v1500_v51 = vadd.f32 %v1453_v18, %v1276_v30  ;;  %v1562_v30 = vld [vmem:[%s2714_s14 + $0x70] sm:$0xff] }
 0x26a   : > { %v2250_v32 = vpop.f32.mrf.mxu1 }
 0x26b   : > { %1587 = vst [vmem:[%s3011_s26 + $0x38] sm:$0xff] %v1571_v50  ;;  %v1570_v52 = vadd.f32 %v1554_v46, %v1538_v14  ;;  %v1541_v15 = vadd.f32 %v2999_v29, %v1521_v39  ;;  %v1520_v28 = vmul.f32 %v2997_v27, %v1500_v51  ;;  %v1503_v53 = vadd.f32 %v2250_v32, %v1291_v45 }
 0x26c   : > { %v1463_v57 = vpop.f32.mrf.mxu1 }
 0x26d   : > { %1586 = vst [vmem:[%s3011_s26 + $0x30] sm:$0xff] %v1570_v52  ;;  %v1573_v58 = vadd.f32 %v1557_v31, %v1541_v15  ;;  %v1540_v16 = vadd.f32 %v2999_v29, %v1520_v28  ;;  %v1523_v59 = vmul.f32 %v2997_v27, %v1503_v53  ;;  %v1502_v60 = vadd.f32 %v1463_v57, %v1286_v41 }
 0x26e   : > { %v2253_v63 = vpop.f32.mrf.mxu1 }
 0x26f   : > { %1589 = vst [vmem:[%s3011_s26 + $0x48] sm:$0xff] %v1573_v58  ;;  %v1572_v17 = vadd.f32 %v1556_v56, %v1540_v16  ;;  %v1543_v49 = vadd.f32 %v2999_v29, %v1523_v59  ;;  %v1522_v2 = vmul.f32 %v2997_v27, %v1502_v60  ;;  %v1505_v3 = vadd.f32 %v2253_v63, %v1301_v55 }
 0x270   : > { %v1473_v54 = vpop.f32.mrf.mxu1 }
 0x271   : > { %1588 = vst [vmem:[%s3011_s26 + $0x40] sm:$0xff] %v1572_v17  ;;  %v1575_v37 = vadd.f32 %v1559_v62, %v1543_v49  ;;  %v1542_v20 = vadd.f32 %v2999_v29, %v1522_v2  ;;  %v1525_v48 = vmul.f32 %v2997_v27, %v1505_v3  ;;  %v1504_v12 = vadd.f32 %v1473_v54, %v1296_v38 }
 0x272   : > { %v2256_v24 = vpop.f32.mrf.mxu1 }
 0x273   : > { %1591 = vst [vmem:[%s3011_s26 + $0x58] sm:$0xff] %v1575_v37  ;;  %v1574_v21 = vadd.f32 %v1558_v4, %v1542_v20  ;;  %v1545_v5 = vadd.f32 %v2999_v29, %v1525_v48  ;;  %v1524_v6 = vmul.f32 %v2997_v27, %v1504_v12  ;;  %v1507_v7 = vadd.f32 %v2256_v24, %v1311_v35 }
 0x274   : > { %v1483_v9 = vpop.f32.mrf.mxu1 }
 0x275   : > { %1590 = vst [vmem:[%s3011_s26 + $0x50] sm:$0xff] %v1574_v21  ;;  %v1577_v13 = vadd.f32 %v1561_v34, %v1545_v5  ;;  %v1544_v26 = vadd.f32 %v2999_v29, %v1524_v6  ;;  %v1527_v0 = vmul.f32 %v2997_v27, %v1507_v7  ;;  %v1506_v40 = vadd.f32 %v1483_v9, %v1306_v61 }
 0x277   : > { %1593 = vst [vmem:[%s3011_s26 + $0x68] sm:$0xff] %v1577_v13  ;;  %v1576_v10 = vadd.f32 %v1560_v8, %v1544_v26  ;;  %v1547_v19 = vadd.f32 %v2999_v29, %v1527_v0  ;;  %v1526_v25 = vmul.f32 %v2997_v27, %v1506_v40 }
 0x279   : > { %1592 = vst [vmem:[%s3011_s26 + $0x60] sm:$0xff] %v1576_v10  ;;  %v1579_v33 = vadd.f32 %v1563_v23, %v1547_v19  ;;  %v1546_v36 = vadd.f32 %v2999_v29, %v1526_v25 }
 0x27b   : > { %1595 = vst [vmem:[%s3011_s26 + $0x78] sm:$0xff] %v1579_v33  ;;  %v1578_v42 = vadd.f32 %v1562_v30, %v1546_v36 }
 0x27d   : > { %1594 = vst [vmem:[%s3011_s26 + $0x70] sm:$0xff] %v1578_v42 }
 0x27e   : > { %2461 = shalt.err (!%p2458_p10)
}
 0x27f   : > { %s2462_s25 = scalar_lea.hbm %s3080_s7, 2048  ;;  %s2466_s13 = scalar_lea.hbm %s3131_s4, 4096 }
 0x280   : > { %p2463_p2 = scmp.ne.s32.totalorder %s3080_s7, %s2462_s25  ;;  %p2467_p8 = scmp.lt.s32.totalorder %s3080_s7, %s3131_s4 }
 0x281   : > { %p2468_p1 = scmp.lt.s32.totalorder %s2466_s13, %s2462_s25 }
 0x282   : > { %p2464_p6 = pnand %p2463_p2, %p3149_p3 }
 0x283   : > { %p2469_p5 = por %p2468_p1, %p2467_p8 }
 0x284   : > { %p2465_p13 = pneg %p2464_p6 }
 0x286   : > { %p2470_p0 = pnand %p2469_p5, %p2465_p13 }
 0x288   : > { %2473 = shalt.err (!%p2470_p0)
}
 0x289   : > { %s2531_s26 = smov 128   ;;  %s2532_s29 = smov 256  }
 0x28a   : > { %s2533_s11 = smov 8  }
 0x28b   : > { %2271 = dma.vmem_to_hbm [thread:$0]  (%p3149_p3), %s3082_s10, 2048, %s3080_s7, %s1597_s19, %s2531_s26, %s2532_s29, %s2533_s11  }
 0x28c PF: > { %s1624_s23 = sand.u32 1, %s2508_s15   ;;  %p3150_p4 = scmp.ne.s32.totalorder %s3139_s28, 0 }
 0x28d   : > { %p3151_p11 = scmp.ge.s32.totalorder %s2520_s18, 2  ;;  %s1625_s6 = scalar_lea.sflag [#allocation5], %s1624_s23 }
 0x28f   : > { %p2288_p12 = pnand %p3151_p11, %p3150_p4 }
 0x291   : > { %p2289_p9 = pneg %p2288_p12 }
 0x293   : > { %2503 = dma.done.wait (%p2289_p9), %s1625_s6, 2048  }
 0x294   : > { %2505 = vsyncadd (%p2289_p9), %s1625_s6, 4294965248  ;;  %p19_p7 = scmp.ge.s32.totalorder %s2584_s21, 4   ;;  %s3152_s15 = smov %s2512_s16 }
 0x295   : > { %s3153_s16 = smov %s2516_s17  ;;  %s3154_s17 = smov %s2596_s24 }
 0x296   : > { %s3155_s18 = smov %s2584_s21  ;;  %21 = sbr.rel (!%p19_p7) target bundleno = 7 (0x7), region = 97 }
 0x29b   :  { %1630 = vsyncpa [#allocation4], 1 }
 0x29c   :  { %1632 = vsyncpa [#allocation4 + $0x1], 1 }
 0x29d   :  { %1633 = vsyncpa [#allocation7], 1 }
 0x29e   :  { %1634 = vsyncpa [#allocation10], 1 }
 0x29f   :  { %1635 = vsyncpa [#allocation5], 1 }
 0x2a0   :  { %1637 = vsyncpa [#allocation5 + $0x1], 1 }

</bundles_post_ra>
